<compile_context>
chip_gen: v5e
topology: v5e:2x2
jax: 0.10.0
libtpu: 0.0.40
codegen_flags: <defaults>
</compile_context>

<pallas_src>
import jax
import jax.numpy as jnp
from jax import lax
from jax.experimental import pallas as pl
from jax.experimental.pallas import tpu as pltpu

# torchvision VGG16 `features[:30]`: 13 conv(3x3, pad=1)+ReLU and 4 MaxPool2d(2,2),
# stopping right before the 5th (final) MaxPool.
_VGG16_CFG = [64, 64, "M", 128, 128, "M", 256, 256, 256, "M",
              512, 512, 512, "M", 512, 512, 512]


def _vmem_limit_bytes():
    # v5e/v6e: 128 MiB physical VMEM per TensorCore; v7x: 64 MiB.
    # Use ~3/4 of physical, capped at 96 MiB -> 96 MiB on v5e/v6e, 48 MiB on v7x.
    try:
        cap = pltpu.get_tpu_info().vmem_capacity_bytes
    except Exception:
        cap = 64 * 1024 * 1024
    return int(min(cap * 3 // 4, 96 * 1024 * 1024))


_VMEM_LIMIT = _vmem_limit_bytes()


def _pick_row_tile(H, W, Kg, tn, fuse_pool):
    """Largest row tile tr dividing H (even when a 2x2 pool is fused) whose bf16
    patch scratch stays <= 3 MiB and whose f32 accumulator stays <= 4 MiB."""
    step = 2 if fuse_pool else 1
    best = step
    for tr in range(step, H + 1, step):
        if H % tr:
            continue
        if tr * W * Kg * 2 > (3 << 20):      # bf16 patch scratch
            continue
        if tr * W * tn * 4 > (4 << 20):      # f32 accumulator
            continue
        best = tr
    return best


# --------------------------------------------------------------------------- #
# Fused conv3x3 + bias + ReLU (+ optional 2x2 max-pool) kernel
# --------------------------------------------------------------------------- #
def _make_kernel(H, W, Cin, tn, tr, tap_groups, fuse_pool):
    Ho = H // 2 if fuse_pool else H
    Wo = W // 2 if fuse_pool else W
    tro = tr // 2 if fuse_pool else tr

    def kernel(x_ref, w_ref, b_ref, o_ref, patch_ref):
        # x_ref:     (1, H+2, W+2, Cin)  bf16  padded input image (resident across g)
        # w_ref:     (G, Kg, tn)         bf16  tap-concatenated weights (resident across n, g)
        # b_ref:     (1, tn)             f32
        # o_ref:     (1, Ho+2, Wo+2, tn) bf16  padded output slab (resident across g)
        # patch_ref: (tr*W, Kg)          bf16  VMEM scratch: K-concatenated im2col patch
        g = pl.program_id(2)
        r0 = g * tr                            # first conv-output row of this tile

        # Top / bottom padding rows of the output slab; the padded columns are
        # folded into the interior store below (keeps all stores column-aligned).
        @pl.when(g == 0)
        def _():
            o_ref[0, 0:1, :, :] = jnp.zeros((1, Wo + 2, tn), o_ref.dtype)

        @pl.when(g == pl.num_programs(2) - 1)
        def _():
            o_ref[0, Ho + 1:Ho + 2, :, :] = jnp.zeros((1, Wo + 2, tn), o_ref.dtype)

        # Conv: len(tap_groups) MXU dots with K = len(group)*Cin, f32 accumulation.
        acc = jnp.zeros((tr * W, tn), jnp.float32)
        for gi, grp in enumerate(tap_groups):
            for t, (kh, kw) in enumerate(grp):
                tap = x_ref[0, pl.ds(r0 + kh, tr), pl.ds(kw, W), :]   # (tr, W, Cin)
                patch_ref[:, t * Cin:(t + 1) * Cin] = tap.reshape(tr * W, Cin)
            acc = acc + jnp.dot(patch_ref[...], w_ref[gi],
                                preferred_element_type=jnp.float32)

        y = jnp.maximum(acc + b_ref[...], 0.0)                        # bias + ReLU (f32)
        if fuse_pool:
            a = y.reshape(tro, 2, Wo, 2, tn)
            m = jnp.maximum(a[:, 0], a[:, 1])                         # max over row pair
            y = jnp.maximum(m[:, :, 0], m[:, :, 1])                   # max over col pair
        else:
            y = y.reshape(tr, W, tn)

        # Fuse the next layer's column padding: store a full (Wo+2)-wide,
        # lane-dense, column-aligned row block.
        zc = jnp.zeros((tro, 1, tn), o_ref.dtype)
        o_ref[0, pl.ds(1 + g * tro, tro), :, :] = jnp.concatenate(
            [zc, y.astype(o_ref.dtype), zc], axis=1)

    return kernel


def conv3x3_relu_padded(xp, w, b, fuse_pool=False):
    """Fused 3x3 stride-1 pad-1 conv + bias + ReLU (+ optional MaxPool2d(2,2)).

    xp: (N, H+2, W+2, Cin) spatially pre-padded NHWC activations,
    w : (Cout, Cin, 3, 3) torch-layout weights, b: (Cout,).
    Returns the next layer's pre-padded input (N, Ho+2, Wo+2, Cout) bf16
    (Ho, Wo halved when fuse_pool=True), with a zero border of width 1.
    """
    N, Hp, Wp, Cin = xp.shape
    H, W = Hp - 2, Wp - 2
    Cout = w.shape[0]

    # First layer: pad Cin 3 -> 8 (zero channels in both x and w are benign).
    if Cin < 8:
        xp = jnp.pad(xp, ((0, 0), (0, 0), (0, 0), (0, 8 - Cin)))
        w = jnp.pad(w, ((0, 0), (0, 8 - Cin), (0, 0), (0, 0)))
        Cin = 8

    # K-concat tap grouping: one dot of K=9*Cin for small Cin, else 3 dots of K=3*Cin.
    if 9 * Cin <= 576:
        tap_groups = (tuple((kh, kw) for kh in range(3) for kw in range(3)),)
    else:
        tap_groups = tuple(tuple((kh, kw) for kw in range(3)) for kh in range(3))
    G = len(tap_groups)
    Kg = len(tap_groups[0]) * Cin

    tn = min(Cout, 256)                    # lane-dense / MXU-aligned Cout tile
    assert Cout % tn == 0
    if fuse_pool:
        assert H % 2 == 0 and W % 2 == 0
        Ho, Wo = H // 2, W // 2
    else:
        Ho, Wo = H, W
    tr = _pick_row_tile(H, W, Kg, tn, fuse_pool)

    # bf16 activations/weights, f32 MXU accumulation (no fp8 is ever selected).
    xp = xp.astype(jnp.bfloat16)
    wk = jnp.transpose(w, (2, 3, 1, 0)).astype(jnp.bfloat16).reshape(G, Kg, Cout)
    bk = b.reshape(1, Cout).astype(jnp.float32)

    # Per-grid-step VMEM footprint (double-buffered blocks + scratch + temps).
    est = (2 * (H + 2) * (W + 2) * Cin * 2
           + 2 * (Ho + 2) * (Wo + 2) * tn * 2
           + 2 * G * Kg * tn * 2
           + tr * W * Kg * 2
           + 3 * tr * W * tn * 4)
    if est > _VMEM_LIMIT:
        raise ValueError(f"conv3x3_relu_padded: estimated VMEM {est} B exceeds limit "
                         f"{_VMEM_LIMIT} B for H={H} W={W} Cin={Cin} Cout={Cout}")

    grid = (Cout // tn, N, H // tr)        # j outermost: weights DMA'd once per group
    return pl.pallas_call(
        _make_kernel(H, W, Cin, tn, tr, tap_groups, fuse_pool),
        out_shape=jax.ShapeDtypeStruct((N, Ho + 2, Wo + 2, Cout), jnp.bfloat16),
        grid_spec=pltpu.PrefetchScalarGridSpec(
            num_scalar_prefetch=0,
            grid=grid,
            in_specs=[
                pl.BlockSpec((1, H + 2, W + 2, Cin), lambda j, n, g: (n, 0, 0, 0)),
                pl.BlockSpec((G, Kg, tn),            lambda j, n, g: (0, 0, j)),
                pl.BlockSpec((1, tn),                lambda j, n, g: (0, j)),
            ],
            out_specs=pl.BlockSpec((1, Ho + 2, Wo + 2, tn),
                                   lambda j, n, g: (n, 0, 0, j)),
            scratch_shapes=[pltpu.VMEM((tr * W, Kg), jnp.bfloat16)],
        ),
        compiler_params=pltpu.CompilerParams(
            dimension_semantics=("parallel", "parallel", "arbitrary"),
            vmem_limit_bytes=_VMEM_LIMIT,
        ),
    )(xp, wk, bk)


# --------------------------------------------------------------------------- #
# Parameter init + forward pass (equivalent of VGG16.forward == features[:30])
# --------------------------------------------------------------------------- #
def init_vgg16_params(key, dtype=jnp.float32):
    params = []
    cin = 3
    for v in _VGG16_CFG:
        if v == "M":
            continue
        key, kw, kb = jax.random.split(key, 3)
        fan_in = 9 * cin
        w = jax.random.normal(kw, (v, cin, 3, 3), dtype) * jnp.sqrt(2.0 / fan_in)
        b = jax.random.normal(kb, (v,), dtype) * 0.01
        params.append((w, b))
        cin = v
    return params


def vgg16_features(x_nchw, params):
    """(N, 3, H, W) -> (N, 512, H/16, W/16), matching torch VGG16.features[:30]."""
    x = jnp.transpose(x_nchw, (0, 2, 3, 1)).astype(jnp.bfloat16)   # NCHW -> NHWC
    xp = jnp.pad(x, ((0, 0), (1, 1), (1, 1), (0, 0)))              # pad once, up front
    pi = 0
    n = len(_VGG16_CFG)
    for li, v in enumerate(_VGG16_CFG):
        if v == "M":
            continue                        # pools are fused into the conv before them
        w, b = params[pi]
        pi += 1
        fuse = (li + 1 < n) and (_VGG16_CFG[li + 1] == "M")
        xp = conv3x3_relu_padded(xp, w, b, fuse_pool=fuse)
    y = xp[:, 1:-1, 1:-1, :]                                       # strip last fused padding
    return jnp.transpose(y, (0, 3, 1, 2)).astype(jnp.float32)      # NHWC -> NCHW


# --------------------------------------------------------------------------- #
# Pure-JAX (XLA) references with matching bf16-in / f32-accumulate precision.
# --------------------------------------------------------------------------- #
def _reference_conv(x_nhwc, w, b, fuse_pool):
    whwio = jnp.transpose(w, (2, 3, 1, 0)).astype(jnp.bfloat16)
    y = lax.conv_general_dilated(
        x_nhwc.astype(jnp.bfloat16), whwio, (1, 1), "SAME",
        dimension_numbers=("NHWC", "HWIO", "NHWC"),
        preferred_element_type=jnp.float32)
    y = jnp.maximum(y + b.astype(jnp.float32), 0.0)
    if fuse_pool:
        y = lax.reduce_window(y, -jnp.inf, lax.max, (1, 2, 2, 1), (1, 2, 2, 1), "VALID")
    return y.astype(jnp.bfloat16).astype(jnp.float32)


def _reference_features(x_nchw, params):
    x = jnp.transpose(x_nchw, (0, 2, 3, 1)).astype(jnp.bfloat16)
    pi = 0
    n = len(_VGG16_CFG)
    for li, v in enumerate(_VGG16_CFG):
        if v == "M":
            continue
        w, b = params[pi]
        pi += 1
        fuse = (li + 1 < n) and (_VGG16_CFG[li + 1] == "M")
        x = _reference_conv(x, w, b, fuse).astype(jnp.bfloat16)
    return jnp.transpose(x, (0, 3, 1, 2)).astype(jnp.float32)


if __name__ == "__main__":
    key = jax.random.PRNGKey(0)
    kx, kp, k1, k2, k3 = jax.random.split(key, 5)

    # ---- single-layer unit checks (boundary / tile-edge / pool correctness) ----
    def _unit(k, N, H, W, Cin, Cout, pool):
        ka, kb_, kc = jax.random.split(k, 3)
        x = jax.random.normal(ka, (N, H, W, Cin), jnp.float32)
        w = jax.random.normal(kb_, (Cout, Cin, 3, 3), jnp.float32) / jnp.sqrt(9.0 * Cin)
        b = jax.random.normal(kc, (Cout,), jnp.float32) * 0.1
        xp = jnp.pad(x.astype(jnp.bfloat16), ((0, 0), (1, 1), (1, 1), (0, 0)))
        out = conv3x3_relu_padded(xp, w, b, fuse_pool=pool)[:, 1:-1, 1:-1, :]
        out = out.astype(jnp.float32)
        ref = _reference_conv(x, w, b, pool)
        rel = jnp.linalg.norm(out - ref) / (jnp.linalg.norm(ref) + 1e-6)
        assert float(rel) < 2e-2, f"unit check failed (pool={pool}): rel={float(rel)}"

    _unit(k1, 1, 16, 16, 16, 128, True)     # fused-pool path, K=9*Cin
    _unit(k2, 1, 8, 8, 256, 256, False)     # K=3*Cin path
    _unit(k3, 2, 16, 16, 3, 64, False)      # first-layer Cin 3->8 pad path

    # ---- full VGG16.features[:30] at a small shape ----
    x = jax.random.normal(kx, (2, 3, 32, 32), jnp.float32)   # small NCHW input
    params = init_vgg16_params(kp)

    out = jax.block_until_ready(jax.jit(vgg16_features)(x, params))
    assert out.shape == (2, 512, 2, 2), out.shape

    ref = jax.block_until_ready(jax.jit(_reference_features)(x, params))
    rel = jnp.linalg.norm(out - ref) / (jnp.linalg.norm(ref) + 1e-8)
    assert float(rel) < 2e-2, f"relative error too large: {float(rel)}"

    print("KERNEL_OK")
</pallas_src>

<mosaic_0001>
module attributes {stable_mosaic.version = 11 : i64} {
  func.func @kernel(%arg0: i32, %arg1: i32, %arg2: i32, %arg3: memref<1x18x18x16xbf16, #tpu.memory_space<vmem>>, %arg4: memref<1x144x128xbf16, #tpu.memory_space<vmem>>, %arg5: memref<1x128xf32, #tpu.memory_space<vmem>>, %arg6: memref<1x10x10x128xbf16, #tpu.memory_space<vmem>>, %arg7: memref<256x144xbf16, #tpu.memory_space<vmem>>) attributes {dimension_semantics = [#tpu.dimension_semantics<parallel>, #tpu.dimension_semantics<parallel>, #tpu.dimension_semantics<arbitrary>], iteration_bounds = array<i64: 1, 1, 1>, scalar_prefetch = 0 : i64, scratch_operands = 1 : i64, tpu.core_type = #tpu.core_type<tc>, window_params = [{transform_indices = @transform_0, window_bounds = array<i64: 1, 18, 18, 16>}, {transform_indices = @transform_1, window_bounds = array<i64: 1, 144, 128>}, {transform_indices = @transform_2, window_bounds = array<i64: 1, 128>}, {transform_indices = @transform_3, window_bounds = array<i64: 1, 10, 10, 128>}]} {
    %c16_i32 = arith.constant 16 : i32
    %0 = arith.muli %arg2, %c16_i32 : i32
    %c0_i32 = arith.constant 0 : i32
    %1 = arith.cmpi eq, %arg2, %c0_i32 : i32
    %2 = arith.extui %1 : i1 to i32
    %c0_i32_0 = arith.constant 0 : i32
    %3 = arith.cmpi ne, %2, %c0_i32_0 : i32
    scf.if %3 {
      %cst_58 = arith.constant 0.000000e+00 : bf16
      %92 = vector.broadcast %cst_58 : bf16 to vector<1x10x128xbf16>
      %c0_59 = arith.constant 0 : index
      %c0_60 = arith.constant 0 : index
      %c0_61 = arith.constant 0 : index
      %c0_62 = arith.constant 0 : index
      %93 = vector.load %arg6[%c0_59, %c0_60, %c0_61, %c0_62] : memref<1x10x10x128xbf16, #tpu.memory_space<vmem>>, vector<1x1x10x128xbf16>
      %94 = vector.shape_cast %93 : vector<1x1x10x128xbf16> to vector<1x10x128xbf16>
      %95 = vector.shape_cast %92 : vector<1x10x128xbf16> to vector<1x1x10x128xbf16>
      tpu.vector_store %arg6[%c0_59, %c0_60, %c0_61, %c0_62], %95 {strides = array<i32>} : memref<1x10x10x128xbf16, #tpu.memory_space<vmem>>, vector<1x1x10x128xbf16>,
    } else {
    }
    %c0_i32_1 = arith.constant 0 : i32
    %4 = arith.cmpi eq, %arg2, %c0_i32_1 : i32
    %5 = arith.extui %4 : i1 to i32
    %c0_i32_2 = arith.constant 0 : i32
    %6 = arith.cmpi ne, %5, %c0_i32_2 : i32
    scf.if %6 {
      %cst_58 = arith.constant 0.000000e+00 : bf16
      %92 = vector.broadcast %cst_58 : bf16 to vector<1x10x128xbf16>
      %c0_59 = arith.constant 0 : index
      %c9 = arith.constant 9 : index
      %c0_60 = arith.constant 0 : index
      %c0_61 = arith.constant 0 : index
      %93 = vector.load %arg6[%c0_59, %c9, %c0_60, %c0_61] : memref<1x10x10x128xbf16, #tpu.memory_space<vmem>>, vector<1x1x10x128xbf16>
      %94 = vector.shape_cast %93 : vector<1x1x10x128xbf16> to vector<1x10x128xbf16>
      %95 = vector.shape_cast %92 : vector<1x10x128xbf16> to vector<1x1x10x128xbf16>
      tpu.vector_store %arg6[%c0_59, %c9, %c0_60, %c0_61], %95 {strides = array<i32>} : memref<1x10x10x128xbf16, #tpu.memory_space<vmem>>, vector<1x1x10x128xbf16>,
    } else {
    }
    %cst = arith.constant 0.000000e+00 : f32
    %7 = vector.broadcast %cst : f32 to vector<256x128xf32>
    %c0_i32_3 = arith.constant 0 : i32
    %8 = arith.addi %0, %c0_i32_3 : i32
    %c0 = arith.constant 0 : index
    %9 = arith.index_cast %8 : i32 to index
    %c0_4 = arith.constant 0 : index
    %c0_5 = arith.constant 0 : index
    %10 = vector.load %arg3[%c0, %9, %c0_4, %c0_5] : memref<1x18x18x16xbf16, #tpu.memory_space<vmem>>, vector<1x16x16x16xbf16>
    %11 = vector.shape_cast %10 : vector<1x16x16x16xbf16> to vector<16x16x16xbf16>
    %12 = vector.shape_cast %11 : vector<16x16x16xbf16> to vector<256x16xbf16>
    %c0_6 = arith.constant 0 : index
    %c0_7 = arith.constant 0 : index
    %13 = vector.load %arg7[%c0_6, %c0_7] : memref<256x144xbf16, #tpu.memory_space<vmem>>, vector<256x16xbf16>
    tpu.vector_store %arg7[%c0_6, %c0_7], %12 {strides = array<i32>} : memref<256x144xbf16, #tpu.memory_space<vmem>>, vector<256x16xbf16>,
    %c0_i32_8 = arith.constant 0 : i32
    %14 = arith.addi %0, %c0_i32_8 : i32
    %c0_9 = arith.constant 0 : index
    %15 = arith.index_cast %14 : i32 to index
    %c1 = arith.constant 1 : index
    %c0_10 = arith.constant 0 : index
    %16 = vector.load %arg3[%c0_9, %15, %c1, %c0_10] : memref<1x18x18x16xbf16, #tpu.memory_space<vmem>>, vector<1x16x16x16xbf16>
    %17 = vector.shape_cast %16 : vector<1x16x16x16xbf16> to vector<16x16x16xbf16>
    %18 = vector.shape_cast %17 : vector<16x16x16xbf16> to vector<256x16xbf16>
    %c0_11 = arith.constant 0 : index
    %c16 = arith.constant 16 : index
    %19 = vector.load %arg7[%c0_11, %c16] : memref<256x144xbf16, #tpu.memory_space<vmem>>, vector<256x16xbf16>
    tpu.vector_store %arg7[%c0_11, %c16], %18 {strides = array<i32>} : memref<256x144xbf16, #tpu.memory_space<vmem>>, vector<256x16xbf16>,
    %c0_i32_12 = arith.constant 0 : i32
    %20 = arith.addi %0, %c0_i32_12 : i32
    %c0_13 = arith.constant 0 : index
    %21 = arith.index_cast %20 : i32 to index
    %c2 = arith.constant 2 : index
    %c0_14 = arith.constant 0 : index
    %22 = vector.load %arg3[%c0_13, %21, %c2, %c0_14] : memref<1x18x18x16xbf16, #tpu.memory_space<vmem>>, vector<1x16x16x16xbf16>
    %23 = vector.shape_cast %22 : vector<1x16x16x16xbf16> to vector<16x16x16xbf16>
    %24 = vector.shape_cast %23 : vector<16x16x16xbf16> to vector<256x16xbf16>
    %c0_15 = arith.constant 0 : index
    %c32 = arith.constant 32 : index
    %25 = vector.load %arg7[%c0_15, %c32] : memref<256x144xbf16, #tpu.memory_space<vmem>>, vector<256x16xbf16>
    tpu.vector_store %arg7[%c0_15, %c32], %24 {strides = array<i32>} : memref<256x144xbf16, #tpu.memory_space<vmem>>, vector<256x16xbf16>,
    %c1_i32 = arith.constant 1 : i32
    %26 = arith.addi %0, %c1_i32 : i32
    %c0_16 = arith.constant 0 : index
    %27 = arith.index_cast %26 : i32 to index
    %c0_17 = arith.constant 0 : index
    %c0_18 = arith.constant 0 : index
    %28 = vector.load %arg3[%c0_16, %27, %c0_17, %c0_18] : memref<1x18x18x16xbf16, #tpu.memory_space<vmem>>, vector<1x16x16x16xbf16>
    %29 = vector.shape_cast %28 : vector<1x16x16x16xbf16> to vector<16x16x16xbf16>
    %30 = vector.shape_cast %29 : vector<16x16x16xbf16> to vector<256x16xbf16>
    %c0_19 = arith.constant 0 : index
    %c48 = arith.constant 48 : index
    %31 = vector.load %arg7[%c0_19, %c48] : memref<256x144xbf16, #tpu.memory_space<vmem>>, vector<256x16xbf16>
    tpu.vector_store %arg7[%c0_19, %c48], %30 {strides = array<i32>} : memref<256x144xbf16, #tpu.memory_space<vmem>>, vector<256x16xbf16>,
    %c1_i32_20 = arith.constant 1 : i32
    %32 = arith.addi %0, %c1_i32_20 : i32
    %c0_21 = arith.constant 0 : index
    %33 = arith.index_cast %32 : i32 to index
    %c1_22 = arith.constant 1 : index
    %c0_23 = arith.constant 0 : index
    %34 = vector.load %arg3[%c0_21, %33, %c1_22, %c0_23] : memref<1x18x18x16xbf16, #tpu.memory_space<vmem>>, vector<1x16x16x16xbf16>
    %35 = vector.shape_cast %34 : vector<1x16x16x16xbf16> to vector<16x16x16xbf16>
    %36 = vector.shape_cast %35 : vector<16x16x16xbf16> to vector<256x16xbf16>
    %c0_24 = arith.constant 0 : index
    %c64 = arith.constant 64 : index
    %37 = vector.load %arg7[%c0_24, %c64] : memref<256x144xbf16, #tpu.memory_space<vmem>>, vector<256x16xbf16>
    tpu.vector_store %arg7[%c0_24, %c64], %36 {strides = array<i32>} : memref<256x144xbf16, #tpu.memory_space<vmem>>, vector<256x16xbf16>,
    %c1_i32_25 = arith.constant 1 : i32
    %38 = arith.addi %0, %c1_i32_25 : i32
    %c0_26 = arith.constant 0 : index
    %39 = arith.index_cast %38 : i32 to index
    %c2_27 = arith.constant 2 : index
    %c0_28 = arith.constant 0 : index
    %40 = vector.load %arg3[%c0_26, %39, %c2_27, %c0_28] : memref<1x18x18x16xbf16, #tpu.memory_space<vmem>>, vector<1x16x16x16xbf16>
    %41 = vector.shape_cast %40 : vector<1x16x16x16xbf16> to vector<16x16x16xbf16>
    %42 = vector.shape_cast %41 : vector<16x16x16xbf16> to vector<256x16xbf16>
    %c0_29 = arith.constant 0 : index
    %c80 = arith.constant 80 : index
    %43 = vector.load %arg7[%c0_29, %c80] : memref<256x144xbf16, #tpu.memory_space<vmem>>, vector<256x16xbf16>
    tpu.vector_store %arg7[%c0_29, %c80], %42 {strides = array<i32>} : memref<256x144xbf16, #tpu.memory_space<vmem>>, vector<256x16xbf16>,
    %c2_i32 = arith.constant 2 : i32
    %44 = arith.addi %0, %c2_i32 : i32
    %c0_30 = arith.constant 0 : index
    %45 = arith.index_cast %44 : i32 to index
    %c0_31 = arith.constant 0 : index
    %c0_32 = arith.constant 0 : index
    %46 = vector.load %arg3[%c0_30, %45, %c0_31, %c0_32] : memref<1x18x18x16xbf16, #tpu.memory_space<vmem>>, vector<1x16x16x16xbf16>
    %47 = vector.shape_cast %46 : vector<1x16x16x16xbf16> to vector<16x16x16xbf16>
    %48 = vector.shape_cast %47 : vector<16x16x16xbf16> to vector<256x16xbf16>
    %c0_33 = arith.constant 0 : index
    %c96 = arith.constant 96 : index
    %49 = vector.load %arg7[%c0_33, %c96] : memref<256x144xbf16, #tpu.memory_space<vmem>>, vector<256x16xbf16>
    tpu.vector_store %arg7[%c0_33, %c96], %48 {strides = array<i32>} : memref<256x144xbf16, #tpu.memory_space<vmem>>, vector<256x16xbf16>,
    %c2_i32_34 = arith.constant 2 : i32
    %50 = arith.addi %0, %c2_i32_34 : i32
    %c0_35 = arith.constant 0 : index
    %51 = arith.index_cast %50 : i32 to index
    %c1_36 = arith.constant 1 : index
    %c0_37 = arith.constant 0 : index
    %52 = vector.load %arg3[%c0_35, %51, %c1_36, %c0_37] : memref<1x18x18x16xbf16, #tpu.memory_space<vmem>>, vector<1x16x16x16xbf16>
    %53 = vector.shape_cast %52 : vector<1x16x16x16xbf16> to vector<16x16x16xbf16>
    %54 = vector.shape_cast %53 : vector<16x16x16xbf16> to vector<256x16xbf16>
    %c0_38 = arith.constant 0 : index
    %c112 = arith.constant 112 : index
    %55 = vector.load %arg7[%c0_38, %c112] : memref<256x144xbf16, #tpu.memory_space<vmem>>, vector<256x16xbf16>
    tpu.vector_store %arg7[%c0_38, %c112], %54 {strides = array<i32>} : memref<256x144xbf16, #tpu.memory_space<vmem>>, vector<256x16xbf16>,
    %c2_i32_39 = arith.constant 2 : i32
    %56 = arith.addi %0, %c2_i32_39 : i32
    %c0_40 = arith.constant 0 : index
    %57 = arith.index_cast %56 : i32 to index
    %c2_41 = arith.constant 2 : index
    %c0_42 = arith.constant 0 : index
    %58 = vector.load %arg3[%c0_40, %57, %c2_41, %c0_42] : memref<1x18x18x16xbf16, #tpu.memory_space<vmem>>, vector<1x16x16x16xbf16>
    %59 = vector.shape_cast %58 : vector<1x16x16x16xbf16> to vector<16x16x16xbf16>
    %60 = vector.shape_cast %59 : vector<16x16x16xbf16> to vector<256x16xbf16>
    %c0_43 = arith.constant 0 : index
    %c128 = arith.constant 128 : index
    %61 = vector.load %arg7[%c0_43, %c128] : memref<256x144xbf16, #tpu.memory_space<vmem>>, vector<256x16xbf16>
    tpu.vector_store %arg7[%c0_43, %c128], %60 {strides = array<i32>} : memref<256x144xbf16, #tpu.memory_space<vmem>>, vector<256x16xbf16>,
    %c0_44 = arith.constant 0 : index
    %c0_45 = arith.constant 0 : index
    %62 = vector.load %arg7[%c0_44, %c0_45] : memref<256x144xbf16, #tpu.memory_space<vmem>>, vector<256x144xbf16>
    %c0_46 = arith.constant 0 : index
    %c0_47 = arith.constant 0 : index
    %c0_48 = arith.constant 0 : index
    %63 = vector.load %arg4[%c0_46, %c0_47, %c0_48] : memref<1x144x128xbf16, #tpu.memory_space<vmem>>, vector<1x144x128xbf16>
    %64 = vector.shape_cast %63 : vector<1x144x128xbf16> to vector<144x128xbf16>
    %cst_49 = arith.constant dense<0.000000e+00> : vector<256x128xf32>
    %65 = tpu.matmul %62, %64, %cst_49 {dimension_numbers = #tpu.dot_dimension_numbers<[1], [0], [0], [1], [0, 0, 1, 1], [], []>} : vector<256x144xbf16>, vector<144x128xbf16>, vector<256x128xf32> -> vector<256x128xf32>
    %66 = arith.addf %7, %65 : vector<256x128xf32>
    %c0_50 = arith.constant 0 : index
    %c0_51 = arith.constant 0 : index
    %67 = vector.load %arg5[%c0_50, %c0_51] : memref<1x128xf32, #tpu.memory_space<vmem>>, vector<1x128xf32>
    %68 = vector.broadcast %67 : vector<1x128xf32> to vector<256x128xf32>
    %69 = arith.addf %66, %68 : vector<256x128xf32>
    %cst_52 = arith.constant 0.000000e+00 : f32
    %70 = vector.broadcast %cst_52 : f32 to vector<256x128xf32>
    %71 = arith.maximumf %69, %70 : vector<256x128xf32>
    %72 = vector.shape_cast %71 : vector<256x128xf32> to vector<8x2x8x2x128xf32>
    %73 = vector.extract_strided_slice %72 {offsets = [0, 0, 0, 0, 0], sizes = [8, 1, 8, 2, 128], strides = [1, 1, 1, 1, 1]} : vector<8x2x8x2x128xf32> to vector<8x1x8x2x128xf32>
    %74 = vector.shape_cast %73 : vector<8x1x8x2x128xf32> to vector<8x8x2x128xf32>
    %75 = vector.extract_strided_slice %72 {offsets = [0, 1, 0, 0, 0], sizes = [8, 1, 8, 2, 128], strides = [1, 1, 1, 1, 1]} : vector<8x2x8x2x128xf32> to vector<8x1x8x2x128xf32>
    %76 = vector.shape_cast %75 : vector<8x1x8x2x128xf32> to vector<8x8x2x128xf32>
    %77 = arith.maximumf %74, %76 : vector<8x8x2x128xf32>
    %78 = vector.extract_strided_slice %77 {offsets = [0, 0, 0, 0], sizes = [8, 8, 1, 128], strides = [1, 1, 1, 1]} : vector<8x8x2x128xf32> to vector<8x8x1x128xf32>
    %79 = vector.shape_cast %78 : vector<8x8x1x128xf32> to vector<8x8x128xf32>
    %80 = vector.extract_strided_slice %77 {offsets = [0, 0, 1, 0], sizes = [8, 8, 1, 128], strides = [1, 1, 1, 1]} : vector<8x8x2x128xf32> to vector<8x8x1x128xf32>
    %81 = vector.shape_cast %80 : vector<8x8x1x128xf32> to vector<8x8x128xf32>
    %82 = arith.maximumf %79, %81 : vector<8x8x128xf32>
    %cst_53 = arith.constant 0.000000e+00 : bf16
    %83 = vector.broadcast %cst_53 : bf16 to vector<8x1x128xbf16>
    %84 = arith.truncf %82 : vector<8x8x128xf32> to vector<8x8x128xbf16>
    %85 = tpu.concatenate %83, %84, %83 in 1 : vector<8x1x128xbf16>, vector<8x8x128xbf16>, vector<8x1x128xbf16> -> vector<8x10x128xbf16>
    %c8_i32 = arith.constant 8 : i32
    %86 = arith.muli %arg2, %c8_i32 : i32
    %c1_i32_54 = arith.constant 1 : i32
    %87 = arith.addi %c1_i32_54, %86 : i32
    %c0_55 = arith.constant 0 : index
    %88 = arith.index_cast %87 : i32 to index
    %c0_56 = arith.constant 0 : index
    %c0_57 = arith.constant 0 : index
    %89 = vector.load %arg6[%c0_55, %88, %c0_56, %c0_57] : memref<1x10x10x128xbf16, #tpu.memory_space<vmem>>, vector<1x8x10x128xbf16>
    %90 = vector.shape_cast %89 : vector<1x8x10x128xbf16> to vector<8x10x128xbf16>
    %91 = vector.shape_cast %85 : vector<8x10x128xbf16> to vector<1x8x10x128xbf16>
    tpu.vector_store %arg6[%c0_55, %88, %c0_56, %c0_57], %91 {strides = array<i32>} : memref<1x10x10x128xbf16, #tpu.memory_space<vmem>>, vector<1x8x10x128xbf16>,
    return
  }
  func.func @transform_0(%arg0: i32, %arg1: i32, %arg2: i32) -> (i32, i32, i32, i32) {
    %c0_i32 = arith.constant 0 : i32
    %c0_i32_0 = arith.constant 0 : i32
    %c0_i32_1 = arith.constant 0 : i32
    %c0_i32_2 = arith.constant 0 : i32
    return %arg1, %c0_i32, %c0_i32_0, %c0_i32_1 : i32, i32, i32, i32
  }
  func.func @transform_1(%arg0: i32, %arg1: i32, %arg2: i32) -> (i32, i32, i32) {
    %c0_i32 = arith.constant 0 : i32
    %c0_i32_0 = arith.constant 0 : i32
    %c0_i32_1 = arith.constant 0 : i32
    return %c0_i32, %c0_i32_0, %arg0 : i32, i32, i32
  }
  func.func @transform_2(%arg0: i32, %arg1: i32, %arg2: i32) -> (i32, i32) {
    %c0_i32 = arith.constant 0 : i32
    %c0_i32_0 = arith.constant 0 : i32
    return %c0_i32, %arg0 : i32, i32
  }
  func.func @transform_3(%arg0: i32, %arg1: i32, %arg2: i32) -> (i32, i32, i32, i32) {
    %c0_i32 = arith.constant 0 : i32
    %c0_i32_0 = arith.constant 0 : i32
    %c0_i32_1 = arith.constant 0 : i32
    return %arg1, %c0_i32, %c0_i32_0, %arg0 : i32, i32, i32, i32
  }
}

</mosaic_0001>

<bundles_post_ra>
// kernel: tpu_custom_call.1
= control target key start
LH: loop header
LB: loop body
LE: loop exit
PB: predicated region body
PF: predicated region fallthrough
CT: control target
= control target key end

     0   :  { %vm142_vm0 = vsmask.f32 3328  ;;  %vm143_vm1 = vsmask.f32 7440  ;;  %s5516_s30 = smov 16   ;;  %s8167_s0 = inlined_call_operand.vmem [shape: bf16[1,18,18,16], index: 0, kind: input, shape index: {}]   ;;  %s8168_s1 = inlined_call_operand.vmem [shape: bf16[1,144,128], index: 1, kind: input, shape index: {}]   ;;  %s8169_s2 = inlined_call_operand.vmem [shape: f32[1,128], index: 2, kind: input, shape index: {}]   ;;  %s8170_s3 = inlined_call_operand.hbm [shape: bf16[1,10,10,128], index: 3, kind: output, shape index: {}]  }
   0x1   :  { %v97_v0 = vld [vmem:[%s8167_s0 + $0xc] sm:$0xf]  ;;  %v98_v1 = vld [vmem:[%s8167_s0 + $0x10] sm:$0xf]  ;;  %v94_v6 = vld [vmem:[%s8167_s0] sm:$0xf] }
   0x2   :  { %v170_v2 = vshrl.u32 %v97_v0, 16  ;;  %v173_v3 = vshll.u32 %v97_v0, 16  ;;  %v179_v4 = vshll.u32 %v98_v1, 16  ;;  %v183_v5 = vshrl.u32 %v98_v1, 16  ;;  %v95_v7 = vld [vmem:[%s8167_s0 + $0x4] sm:$0xf]  ;;  %vm5566_vm2 = vmor %vm142_vm0, %vm143_vm1 }
   0x3   :  { %v146_v10 = vshrl.u32 %v94_v6, 16  ;;  %v99_v11 = vld [vmem:[%s8167_s0 + $0x14] sm:$0x1]  ;;  %v149_v13 = vshll.u32 %v94_v6, 16  ;;  %v155_v14 = vshll.u32 %v95_v7, 16  ;;  %v159_v15 = vshrl.u32 %v95_v7, 16 }
   0x4   :  { %v172_v8 = vrot.slane %v170_v2, 4  ;;  %v175_v9 = vrot.slane %v173_v3, 5  ;;  %v185_v12 = vrot.slane %v183_v5, 4  ;;  %v181_v17 = vrot.slane %v179_v4, 5  ;;  %v104_v19 = vld [vmem:[%s8167_s0 + $0x28] sm:$0xf] }
   0x5   :  { %v148_v18 = vrot.slane %v146_v10, 4  ;;  %v151_v21 = vrot.slane %v149_v13, 5  ;;  %v161_v22 = vrot.slane %v159_v15, 4  ;;  %v189_v23 = vshll.u32 %v99_v11, 16  ;;  %v96_v26 = vld [vmem:[%s8167_s0 + $0x8] sm:$0x1] }
   0x6   :  { %v176_v16 = vor.u32 %v175_v9, %v172_v8  ;;  %v186_v25 = vor.u32 %v185_v12, %v181_v17  ;;  %v227_v27 = vshll.u32 %v104_v19, 16  ;;  %v103_v28 = vld [vmem:[%s8167_s0 + $0x24] sm:$0xf]  ;;  %v157_v30 = vrot.slane %v155_v14, 5  ;;  %v109_v34 = vld [vmem:[%s8167_s0 + $0x3c] sm:$0xf] }
   0x7   :  { %v152_v29 = vor.u32 %v151_v21, %v148_v18  ;;  %v231_v31 = vshrl.u32 %v104_v19, 16  ;;  %v218_v33 = vshrl.u32 %v103_v28, 16  ;;  %v191_v36 = vrot.slane %v189_v23, 5  ;;  %v105_v44 = vld [vmem:[%s8167_s0 + $0x2c] sm:$0x1] }
   0x8   :  { %v177_v24 = vrot.slane %v176_v16, 4  ;;  %v162_v37 = vor.u32 %v161_v22, %v157_v30  ;;  %v165_v38 = vshll.u32 %v96_v26, 16  ;;  %v187_v39 = vrot.slane %v186_v25, 4  ;;  %v100_v47 = vld [vmem:[%s8167_s0 + $0x18] sm:$0xf] }
   0x9   :  { %v153_v35 = vrot.slane %v152_v29, 4  ;;  %v5582_v40 = vrot.slane %v227_v27, 5  ;;  %v233_v41 = vrot.slane %v231_v31, 4  ;;  %v221_v42 = vshll.u32 %v103_v28, 16  ;;  %v107_v50 = vld [vmem:[%s8167_s0 + $0x34] sm:$0xf] }
   0xa   :  { %v182_v32 = vsel %vm5566_vm2, %v177_v24, %v181_v17  ;;  %v266_v45 = vshrl.u32 %v109_v34, 16  ;;  %v269_v46 = vshll.u32 %v109_v34, 16  ;;  %v220_v48 = vrot.slane %v218_v33, 4  ;;  %v101_v56 = vld [vmem:[%s8167_s0 + $0x1c] sm:$0xf] }
   0xb   :  { %533 = vrot.lane.b32.xlu1 %v182_v32, %s5516_s30  ;;  %v158_v43 = vsel %vm5566_vm2, %v153_v35, %v157_v30  ;;  %v223_v49 = vrot.slane %v221_v42, 5  ;;  %v163_v51 = vrot.slane %v162_v37, 4  ;;  %v167_v52 = vrot.slane %v165_v38, 5  ;;  %v5605_v62 = vld [vmem:[%s8167_s0 + $0x40] sm:$0xf] }
   0xc   :  { %529 = vrot.lane.b32.xlu0 %v158_v43, %s5516_s30  ;;  %v192_v53 = vsel %vm5566_vm2, %v187_v39, %v191_v36  ;;  %v234_v54 = vor.u32 %v233_v41, %v5582_v40  ;;  %v237_v55 = vshll.u32 %v105_v44, 16  ;;  %v194_v57 = vshrl.u32 %v100_v47, 16  ;;  %v113_v8 = vld [vmem:[%s8167_s0 + $0x4c] sm:$0xf]  ;;  %v102_v13 = vld [vmem:[%s8167_s0 + $0x20] sm:$0x1] }
   0xd   :  { %v268_v58 = vrot.slane %v266_v45, 4  ;;  %v271_v59 = vrot.slane %v269_v46, 5  ;;  %v251_v60 = vshll.u32 %v107_v50, 16  ;;  %v224_v61 = vor.u32 %v223_v49, %v220_v48  ;;  %v108_v15 = vld [vmem:[%s8167_s0 + $0x38] sm:$0x1] }
   0xe   :  { %v255_v63 = vshrl.u32 %v107_v50, 16  ;;  %v196_v0 = vrot.slane %v194_v57, 4  ;;  %v197_v1 = vshll.u32 %v100_v47, 16  ;;  %v168_v2 = vsel %vm5566_vm2, %v163_v51, %v167_v52  ;;  %v112_v24 = vld [vmem:[%s8167_s0 + $0x48] sm:$0xf] }
   0xf   :  { %v203_v3 = vshll.u32 %v101_v56, 16  ;;  %v207_v4 = vshrl.u32 %v101_v56, 16  ;;  %v235_v5 = vrot.slane %v234_v54, 4  ;;  %v239_v6 = vrot.slane %v237_v55, 5 }
  0x10   :  { %v199_v7 = vrot.slane %v197_v1, 5  ;;  %v272_v9 = vor.u32 %v271_v59, %v268_v58  ;;  %v275_v10 = vshll.u32 %v5605_v62, 16  ;;  %v5614_v11 = vrot.slane %v251_v60, 5 }
  0x11   :  { %v209_v12 = vrot.slane %v207_v4, 4  ;;  %v225_v14 = vrot.slane %v224_v61, 4  ;;  %v257_v16 = vrot.slane %v255_v63, 4  ;;  %v205_v18 = vrot.slane %v203_v3, 5 }
  0x12   :  { %v200_v17 = vor.u32 %v199_v7, %v196_v0  ;;  %v299_v19 = vshll.u32 %v113_v8, 16  ;;  %v303_v21 = vshrl.u32 %v113_v8, 16  ;;  %v240_v22 = vsel %vm5566_vm2, %v235_v5, %v239_v6 }
  0x13   :  { %535 = vrot.lane.b32.xlu1 %v192_v53, %s5516_s30  ;;  %v210_v25 = vor.u32 %v209_v12, %v205_v18  ;;  %v213_v26 = vshll.u32 %v102_v13, 16 }
  0x14   :  { %531 = vrot.lane.b32.xlu0 %v168_v2, %s5516_s30  ;;  %v201_v23 = vrot.slane %v200_v17, 4 }
  0x15   :  { %8 = vsyncpa [#allocation4], 0  ;;  %v273_v27 = vrot.slane %v272_v9, 4  ;;  %v5628_v28 = vrot.slane %v275_v10, 5  ;;  %v261_v29 = vshll.u32 %v108_v15, 16  ;;  %v230_v30 = vsel %vm5566_vm2, %v225_v14, %v5582_v40  ;;  %s5517_s24 = smov 32  }
  0x16   :  { %v258_v31 = vor.u32 %v257_v16, %v5614_v11  ;;  %v206_v32 = vsel %vm5566_vm2, %v201_v23, %v205_v18  ;;  %v114_v33 = vld [vmem:[%s8167_s0 + $0x50] sm:$0x1]  ;;  %v5641_v34 = vrot.slane %v299_v19, 5  ;;  %v305_v35 = vrot.slane %v303_v21, 4  ;;  %v118_v41 = vld [vmem:[%s8167_s0 + $0x60] sm:$0xf] }
  0x17   :  { %537 = vrot.lane.b32.xlu2 %v206_v32, %s5516_s30  ;;  %v290_v36 = vshrl.u32 %v112_v24, 16  ;;  %v293_v37 = vshll.u32 %v112_v24, 16  ;;  %v106_v38 = vld [vmem:[%s8167_s0 + $0x30] sm:$0xf]  ;;  %v211_v39 = vrot.slane %v210_v25, 4  ;;  %v215_v40 = vrot.slane %v213_v26, 5 }
  0x18   :  { %v278_v42 = vsel %vm5566_vm2, %v273_v27, %v5628_v28  ;;  %v279_v43 = vshrl.u32 %v5605_v62, 16  ;;  %v263_v44 = vrot.slane %v261_v29, 5  ;;  %v259_v45 = vrot.slane %v258_v31, 4  ;;  %v116_v55 = vld [vmem:[%s8167_s0 + $0x58] sm:$0xf]  ;;  %s5518_s10 = smov 48  }
  0x19   :  { %v309_v46 = vshll.u32 %v114_v33, 16  ;;  %v242_v47 = vshrl.u32 %v106_v38, 16  ;;  %v245_v48 = vshll.u32 %v106_v38, 16  ;;  %v306_v49 = vor.u32 %v305_v35, %v5641_v34  ;;  %v122_v61 = vld [vmem:[%s8167_s0 + $0x70] sm:$0xf]  ;;  %s5519_s13 = smov 64  }
  0x1a   :  { %v292_v50 = vrot.slane %v290_v36, 4  ;;  %v295_v51 = vrot.slane %v293_v37, 5  ;;  %v338_v52 = vshrl.u32 %v118_v41, 16  ;;  %v216_v53 = vsel %vm5566_vm2, %v211_v39, %v215_v40  ;;  %v5670_v0 = vld [vmem:[%s8167_s0 + $0x64] sm:$0xf]  ;;  %s5520_s23 = smov 80  }
  0x1b   :  { %543 = vrot.lane.b32.xlu1 %v240_v22, %s5516_s30  ;;  %v341_v54 = vshll.u32 %v118_v41, 16  ;;  %v244_v56 = vrot.slane %v242_v47, 4  ;;  %v247_v57 = vrot.slane %v245_v48, 5  ;;  %v264_v58 = vsel %vm5566_vm2, %v259_v45, %v263_v44  ;;  %v111_v9 = vld [vmem:[%s8167_s0 + $0x44] sm:$0x1]  ;;  %s5521_s9 = smov 112  }
  0x1c   :  { %541 = vrot.lane.b32.xlu0 %v230_v30, %s5516_s30  ;;  %v311_v59 = vrot.slane %v309_v46, 5  ;;  %v307_v62 = vrot.slane %v306_v49, 4  ;;  %v296_v63 = vor.u32 %v295_v51, %v292_v50  ;;  %v323_v1 = vshll.u32 %v116_v55, 16  ;;  %v121_v12 = vld [vmem:[%s8167_s0 + $0x6c] sm:$0xf]  ;;  %s5522_s19 = smov 96  }
  0x1d   :  { %v248_v60 = vor.u32 %v247_v57, %v244_v56  ;;  %v327_v2 = vshrl.u32 %v116_v55, 16  ;;  %v340_v3 = vrot.slane %v338_v52, 4  ;;  %v343_v4 = vrot.slane %v341_v54, 5  ;;  %v115_v17 = vld [vmem:[%s8167_s0 + $0x54] sm:$0xf]  ;;  %s4793_s6 = sshll.u32 %s8170_s3, 4  ;;  %s4794_s6 = int_to_ptr.hbm [resolvable:$true] %s4793_s6 }
  0x1e   :  { %v281_v6 = vrot.slane %v279_v43, 4  ;;  %v371_v7 = vshll.u32 %v122_v61, 16  ;;  %v375_v8 = vshrl.u32 %v122_v61, 16  ;;  %v347_v10 = vshll.u32 %v5670_v0, 16  ;;  %v117_v19 = vld [vmem:[%s8167_s0 + $0x5c] sm:$0x1] }
  0x1f   :  { %539 = vrot.lane.b32.xlu2 %v216_v53, %s5516_s30  ;;  %v249_v5 = vrot.slane %v248_v60, 4  ;;  %v312_v13 = vsel %vm5566_vm2, %v307_v62, %v311_v59  ;;  %v297_v14 = vrot.slane %v296_v63, 4  ;;  %v5682_v15 = vrot.slane %v323_v1, 5  ;;  %v123_v27 = vld [vmem:[%s8167_s0 + $0x74] sm:$0x1]  ;;  %s5524_s7 = smov [#allocation3]  }
  0x20   :  { %v329_v16 = vrot.slane %v327_v2, 4  ;;  %v344_v18 = vor.u32 %v343_v4, %v340_v3  ;;  %v282_v22 = vor.u32 %v281_v6, %v5628_v28  ;;  %v285_v23 = vshll.u32 %v111_v9, 16  ;;  %v127_v33 = vld [vmem:[%s8167_s0 + $0x84] sm:$0xf]  ;;  %v125_v48 = vld [vmem:[%s8167_s0 + $0x7c] sm:$0xf] }
  0x21   :  { %v254_v21 = vsel %vm5566_vm2, %v249_v5, %v5614_v11  ;;  %v5694_v24 = vrot.slane %v371_v7, 5  ;;  %v377_v25 = vrot.slane %v375_v8, 4  ;;  %v5696_v26 = vrot.slane %v347_v10, 5  ;;  %v5724_v56 = vld [vmem:[%s8167_s0 + $0x88] sm:$0xf]  ;;  %s4791_s8 = sshll.u32 %s5524_s7, 4  ;;  %s4792_s8 = int_to_ptr.vmem [resolvable:$true] %s4791_s8 }
  0x22   :  { %v362_v29 = vshrl.u32 %v121_v12, 16  ;;  %v365_v30 = vshll.u32 %v121_v12, 16  ;;  %v314_v31 = vshrl.u32 %v115_v17, 16  ;;  %v302_v11 = vsel %vm5566_vm2, %v297_v14, %v5641_v34  ;;  %v131_v63 = vld [vmem:[%s8167_s0 + $0x94] sm:$0xf]  ;;  %s5525_s11 = smov 4  }
  0x23   :  { %549 = vrot.lane.b32.xlu1 %v278_v42, %s5516_s30  ;;  %v330_v28 = vor.u32 %v329_v16, %v5682_v15  ;;  %v333_v32 = vshll.u32 %v117_v19, 16  ;;  %v317_v35 = vshll.u32 %v115_v17, 16  ;;  %v345_v36 = vrot.slane %v344_v18, 4  ;;  %v124_v3 = vld [vmem:[%s8167_s0 + $0x78] sm:$0xf] }
  0x24   :  { %547 = vrot.lane.b32.xlu0 %v264_v58, %s5516_s30  ;;  %v283_v37 = vrot.slane %v282_v22, 4  ;;  %v287_v38 = vrot.slane %v285_v23, 5  ;;  %v316_v39 = vrot.slane %v314_v31, 4  ;;  %v378_v40 = vor.u32 %v377_v25, %v5694_v24  ;;  %v130_v8 = vld [vmem:[%s8167_s0 + $0x90] sm:$0xf] }
  0x25   :  { %v381_v41 = vshll.u32 %v123_v27, 16  ;;  %v319_v42 = vrot.slane %v317_v35, 5  ;;  %v364_v34 = vrot.slane %v362_v29, 4  ;;  %v367_v43 = vrot.slane %v365_v30, 5  ;;  %v126_v9 = vld [vmem:[%s8167_s0 + $0x80] sm:$0x1] }
  0x26   :  { %v410_v44 = vshrl.u32 %v127_v33, 16  ;;  %v413_v45 = vshll.u32 %v127_v33, 16  ;;  %v331_v46 = vrot.slane %v330_v28, 4  ;;  %v335_v47 = vrot.slane %v333_v32, 5  ;;  %v136_v31 = vld [vmem:[%s8167_s0 + $0xa8] sm:$0xf] }
  0x27   :  { %545 = vrot.lane.b32.xlu2 %v254_v21, %s5516_s30  ;;  %v350_v49 = vsel %vm5566_vm2, %v345_v36, %v5696_v26  ;;  %v351_v50 = vshrl.u32 %v5670_v0, 16  ;;  %v288_v51 = vsel %vm5566_vm2, %v283_v37, %v287_v38  ;;  %v320_v52 = vor.u32 %v319_v42, %v316_v39  ;;  %v120_v0 = vld [vmem:[%s8167_s0 + $0x68] sm:$0x1]  ;;  %v7870_v20 = vld [vmem:[%s8169_s2] ss:$0 sm:$0xff] }
  0x28   :  { %v379_v53 = vrot.slane %v378_v40, 4  ;;  %v383_v54 = vrot.slane %v381_v41, 5  ;;  %v368_v55 = vor.u32 %v367_v43, %v364_v34  ;;  %v412_v57 = vrot.slane %v410_v44, 4  ;;  %v134_v34 = vld [vmem:[%s8167_s0 + $0xa0] sm:$0xf] }
  0x29   :  { %v415_v58 = vrot.slane %v413_v45, 5  ;;  %v395_v59 = vshll.u32 %v125_v48, 16  ;;  %v336_v60 = vsel %vm5566_vm2, %v331_v46, %v335_v47  ;;  %v399_v61 = vshrl.u32 %v125_v48, 16  ;;  %v5785_v48 = vld [vmem:[%s8167_s0 + $0xac] sm:$0xf] }
  0x2a   :  { %v321_v62 = vrot.slane %v320_v52, 4  ;;  %v353_v1 = vrot.slane %v351_v50, 4  ;;  %v419_v2 = vshll.u32 %v5724_v56, 16  ;;  %v384_v4 = vsel %vm5566_vm2, %v379_v53, %v383_v54 }
  0x2b   :  { %555 = vrot.lane.b32.xlu1 %v312_v13, %s5516_s30  ;;  %v369_v5 = vrot.slane %v368_v55, 4  ;;  %v416_v6 = vor.u32 %v415_v58, %v412_v57  ;;  %v5743_v7 = vrot.slane %v395_v59, 5  ;;  %v401_v10 = vrot.slane %v399_v61, 4  ;;  %v140_v57 = vld [vmem:[%s8167_s0 + $0xb8] sm:$0xf] }
  0x2c   :  { %553 = vrot.lane.b32.xlu0 %v302_v11, %s5516_s30  ;;  %v443_v12 = vshll.u32 %v131_v63, 16  ;;  %v447_v13 = vshrl.u32 %v131_v63, 16  ;;  %v357_v14 = vshll.u32 %v120_v0, 16  ;;  %v326_v16 = vsel %vm5566_vm2, %v321_v62, %v5682_v15  ;;  %v129_v58 = vld [vmem:[%s8167_s0 + $0x8c] sm:$0x1] }
  0x2d   :  { %v354_v17 = vor.u32 %v353_v1, %v5696_v26  ;;  %v386_v18 = vshrl.u32 %v124_v3, 16  ;;  %v389_v19 = vshll.u32 %v124_v3, 16  ;;  %v434_v21 = vshrl.u32 %v130_v8, 16  ;;  %v133_v61 = vld [vmem:[%s8167_s0 + $0x9c] sm:$0xf] }
  0x2e   :  { %v437_v22 = vshll.u32 %v130_v8, 16  ;;  %v374_v23 = vsel %vm5566_vm2, %v369_v5, %v5694_v24  ;;  %v5758_v25 = vrot.slane %v419_v2, 5  ;;  %v405_v27 = vshll.u32 %v126_v9, 16  ;;  %v132_v24 = vld [vmem:[%s8167_s0 + $0x98] sm:$0x1] }
  0x2f   :  { %551 = vrot.lane.b32.xlu2 %v288_v51, %s5516_s30  ;;  %v417_v29 = vrot.slane %v416_v6, 4  ;;  %v402_v30 = vor.u32 %v401_v10, %v5743_v7  ;;  %v5763_v15 = vrot.slane %v443_v12, 5  ;;  %v449_v26 = vrot.slane %v447_v13, 4  ;;  %v135_v3 = vld [vmem:[%s8167_s0 + $0xa4] sm:$0x1] }
  0x30   :  { %v355_v11 = vrot.slane %v354_v17, 4  ;;  %v359_v28 = vrot.slane %v357_v14, 5  ;;  %v388_v32 = vrot.slane %v386_v18, 4  ;;  %v391_v33 = vrot.slane %v389_v19, 5  ;;  %v139_v9 = vld [vmem:[%s8167_s0 + $0xb4] sm:$0xf] }
  0x31   :  { %v436_v35 = vrot.slane %v434_v21, 4  ;;  %v439_v36 = vrot.slane %v437_v22, 5  ;;  %v482_v37 = vshrl.u32 %v136_v31, 16  ;;  %v485_v38 = vshll.u32 %v136_v31, 16 }
  0x32   :  { %v403_v39 = vrot.slane %v402_v30, 4  ;;  %v407_v40 = vrot.slane %v405_v27, 5  ;;  %v450_v41 = vor.u32 %v449_v26, %v5763_v15  ;;  %v453_v42 = vshll.u32 %v132_v24, 16 }
  0x33   :  { %561 = vrot.lane.b32.xlu1 %v350_v49, %s5516_s30  ;;  %v422_v43 = vsel %vm5566_vm2, %v417_v29, %v5758_v25  ;;  %v423_v44 = vshrl.u32 %v5724_v56, 16  ;;  %v360_v45 = vsel %vm5566_vm2, %v355_v11, %v359_v28  ;;  %v392_v46 = vor.u32 %v391_v33, %v388_v32 }
  0x34   :  { %559 = vrot.lane.b32.xlu0 %v336_v60, %s5516_s30  ;;  %v440_v47 = vor.u32 %v439_v36, %v436_v35  ;;  %v484_v49 = vrot.slane %v482_v37, 4  ;;  %v487_v50 = vrot.slane %v485_v38, 5  ;;  %v467_v51 = vshll.u32 %v134_v34, 16 }
  0x35   :  { %v471_v52 = vshrl.u32 %v134_v34, 16  ;;  %v408_v53 = vsel %vm5566_vm2, %v403_v39, %v407_v40  ;;  %v451_v54 = vrot.slane %v450_v41, 4  ;;  %v455_v55 = vrot.slane %v453_v42, 5 }
  0x36   :  { %v393_v56 = vrot.slane %v392_v46, 4  ;;  %v425_v59 = vrot.slane %v423_v44, 4  ;;  %v491_v60 = vshll.u32 %v5785_v48, 16  ;;  %v441_v62 = vrot.slane %v440_v47, 4  ;;  %v659_v46 = vld [vmem:[%s8167_s0 + $0x4] sm:$0xf] }
  0x37   :  { %557 = vrot.lane.b32.xlu2 %v326_v16, %s5516_s30  ;;  %v488_v63 = vor.u32 %v487_v50, %v484_v49  ;;  %v469_v0 = vrot.slane %v467_v51, 5  ;;  %v473_v1 = vrot.slane %v471_v52, 4  ;;  %v456_v2 = vsel %vm5566_vm2, %v451_v54, %v455_v55  ;;  %v661_v50 = vld [vmem:[%s8167_s0 + $0xc] sm:$0xe]  ;;  %v662_v51 = vld [vmem:[%s8167_s0 + $0x10] sm:$0xf] }
  0x38   :  { %v519_v5 = vshrl.u32 %v140_v57, 16  ;;  %v429_v6 = vshll.u32 %v129_v58, 16  ;;  %v398_v8 = vsel %vm5566_vm2, %v393_v56, %v5743_v7  ;;  %v426_v10 = vor.u32 %v425_v59, %v5758_v25  ;;  %v141_v25 = vld [vmem:[%s8167_s0 + $0xbc] sm:$0x1]  ;;  %v660_v56 = vld [vmem:[%s8167_s0 + $0x8] sm:$0x1] }
  0x39   :  { %v458_v12 = vshrl.u32 %v133_v61, 16  ;;  %v461_v13 = vshll.u32 %v133_v61, 16  ;;  %v493_v14 = vrot.slane %v491_v60, 5  ;;  %v446_v16 = vsel %vm5566_vm2, %v441_v62, %v5763_v15  ;;  %v665_v60 = vld [vmem:[%s8167_s0 + $0x1c] sm:$0xf] }
  0x3a   :  { %v489_v17 = vrot.slane %v488_v63, 4  ;;  %v474_v18 = vor.u32 %v473_v1, %v469_v0  ;;  %v477_v19 = vshll.u32 %v135_v3, 16  ;;  %v521_v21 = vrot.slane %v519_v5, 4  ;;  %v31_v61 = vld [vmem:[%s8167_s0 + $0xc] sm:$0xf] }
  0x3b   :  { %567 = vrot.lane.b32.xlu1 %v384_v4, %s5516_s30  ;;  %v515_v4 = vshll.u32 %v140_v57, 16  ;;  %v506_v22 = vshrl.u32 %v139_v9, 16  ;;  %v427_v27 = vrot.slane %v426_v10, 4  ;;  %v431_v29 = vrot.slane %v429_v6, 5  ;;  %v658_v5 = vld [vmem:[%s8167_s0] sm:$0xe] }
  0x3c   :  { %565 = vrot.lane.b32.xlu0 %v374_v23, %s5516_s30  ;;  %v509_v23 = vshll.u32 %v139_v9, 16  ;;  %v460_v30 = vrot.slane %v458_v12, 4  ;;  %v463_v26 = vrot.slane %v461_v13, 5  ;;  %v495_v15 = vshrl.u32 %v5785_v48, 16  ;;  %v33_v6 = vld [vmem:[%s8167_s0 + $0x18] sm:$0xf] }
  0x3d   :  { %v517_v7 = vrot.slane %v515_v4, 5  ;;  %v479_v31 = vrot.slane %v477_v19, 5  ;;  %v475_v24 = vrot.slane %v474_v18, 4  ;;  %v525_v11 = vshll.u32 %v141_v25, 16  ;;  %v666_v4 = vld [vmem:[%s8167_s0 + $0x20] sm:$0x1] }
  0x3e   :  { %v508_v28 = vrot.slane %v506_v22, 4  ;;  %v511_v32 = vrot.slane %v509_v23, 5  ;;  %v494_v33 = vsel %vm5566_vm2, %v489_v17, %v493_v14  ;;  %v432_v36 = vsel %vm5566_vm2, %v427_v27, %v431_v29  ;;  %v664_v12 = vld [vmem:[%s8167_s0 + $0x18] sm:$0xe]  ;;  %v30_v17 = vld [vmem:[%s8167_s0 + $0x4] sm:$0xf] }
  0x3f   :  { %563 = vrot.lane.b32.xlu2 %v360_v45, %s5516_s30  ;;  %v522_v35 = vor.u32 %v521_v21, %v517_v7  ;;  %v464_v37 = vor.u32 %v463_v26, %v460_v30  ;;  %v480_v38 = vsel %vm5566_vm2, %v475_v24, %v479_v31  ;;  %v527_v41 = vrot.slane %v525_v11, 5  ;;  %v670_v19 = vld [vmem:[%s8167_s0 + $0x30] sm:$0xe]  ;;  %v671_v22 = vld [vmem:[%s8167_s0 + $0x34] sm:$0xf] }
  0x40   :  { %v512_v39 = vor.u32 %v511_v32, %v508_v28  ;;  %v497_v34 = vrot.slane %v495_v15, 4  ;;  %vm754_vm3 = vcmask 1042432   ;;  %vm755_vm4 = vcmask 1046532   ;;  %v663_v23 = vld [vmem:[%s8167_s0 + $0x14] sm:$0x1] }
  0x41   :  { %v523_v40 = vrot.slane %v522_v35, 4  ;;  %v465_v42 = vrot.slane %v464_v37, 4  ;;  %v4809_v54 = vrot.slane %v661_v50, 9  ;;  %v766_v55 = vrot.slane %v662_v51, 5  ;;  %vm5856_vm5 = vmor %vm754_vm3, %vm755_vm4  ;;  %v34_v25 = vld [vmem:[%s8167_s0 + $0x1c] sm:$0xf] }
  0x42   :  { %v513_v44 = vrot.slane %v512_v39, 4  ;;  %v498_v48 = vor.u32 %v497_v34, %v493_v14  ;;  %vm61_vm6 = vcmask 125952   ;;  %v762_v63 = vrot.slane %v660_v56, 5  ;;  %v32_v14 = vld [vmem:[%s8167_s0 + $0x10] sm:$0xf] }
  0x43   :  { %573 = vrot.lane.b32.xlu1 %v422_v43, %s5516_s30  ;;  %v138_v43 = vld [vmem:[%s8167_s0 + $0xb0] sm:$0x1]  ;;  %v528_v45 = vsel %vm5566_vm2, %v523_v40, %v527_v41  ;;  %v470_v47 = vsel %vm5566_vm2, %v465_v42, %v469_v0  ;;  %64 = vst.msk [vmem:[#allocation2 + $0x10] sm:$0xf] %vm61_vm6, %v31_v61  ;;  %v29_v0 = vld [vmem:[%s8167_s0] sm:$0xf]  ;;  %v767_v1 = vsel %vm5856_vm5, %v4809_v54, %v766_v55 }
  0x44   :  { %571 = vrot.lane.b32.xlu0 %v408_v53, %s5516_s30  ;;  %v501_v49 = vshll.u32 %v138_v43, 16  ;;  %v518_v52 = vsel %vm5566_vm2, %v513_v44, %v517_v7  ;;  %v759_v53 = vrot.slane %v659_v46, 5  ;;  %v499_v57 = vrot.slane %v498_v48, 4  ;;  %62 = vst.msk [vmem:[#allocation2] sm:$0xf] %vm61_vm6, %v29_v0 }
  0x45   :  { %66 = vst.msk [vmem:[#allocation2 + $0x20] sm:$0xf] %vm61_vm6, %v33_v6  ;;  %v776_v10 = vrot.slane %v666_v4, 5  ;;  %v4808_v13 = vrot.slane %v658_v5, 9  ;;  %v668_v7 = vld [vmem:[%s8167_s0 + $0x28] sm:$0xf] }
  0x46   :  { %v503_v58 = vrot.slane %v501_v49, 5  ;;  %v761_v62 = vrot.slane %v759_v53, 4  ;;  %65 = vst.msk [vmem:[#allocation2 + $0x18] sm:$0xf] %vm61_vm6, %v32_v14  ;;  %v780_v29 = vrot.slane %v668_v7, 5  ;;  %v4812_v30 = vrot.slane %v670_v19, 9 }
  0x47   :  { %569 = vrot.lane.b32.xlu2 %v398_v8, %s5516_s30  ;;  %v760_v21 = vsel %vm5856_vm5, %v4808_v13, %v759_v53  ;;  %63 = vst.msk [vmem:[#allocation2 + $0x8] sm:$0xf] %vm61_vm6, %v30_v17  ;;  %v787_v26 = vrot.slane %v671_v22, 5  ;;  %v669_v15 = vld [vmem:[%s8167_s0 + $0x2c] sm:$0x1]  ;;  %v768_v31 = vrot.slane %v766_v55, 4 }
  0x48   :  { %v504_v3 = vsel %vm5566_vm2, %v499_v57, %v503_v58  ;;  %v763_v8 = vsel %vm5856_vm5, %v761_v62, %v762_v63  ;;  %67 = vst.msk [vmem:[#allocation2 + $0x28] sm:$0xf] %vm61_vm6, %v34_v25  ;;  %v769_v24 = vrot.slane %v663_v23, 5  ;;  %v674_v11 = vld [vmem:[%s8167_s0 + $0x40] sm:$0xf]  ;;  %v782_v32 = vrot.slane %v780_v29, 4 }
  0x49   :  { %v36_v28 = vld [vmem:[%s8167_s0 + $0x28] sm:$0xf]  ;;  %v35_v35 = vld [vmem:[%s8167_s0 + $0x24] sm:$0xf]  ;;  %v794_v37 = vrot.slane %v674_v11, 5  ;;  %vm625_vm7 = vcmask 257152  }
  0x4a   :  { %69 = vst.msk [vmem:[#allocation2 + $0x38] sm:$0xf] %vm61_vm6, %v36_v28  ;;  %v675_v39 = vld [vmem:[%s8167_s0 + $0x44] sm:$0x1]  ;;  %v667_v40 = vld [vmem:[%s8167_s0 + $0x24] sm:$0xe] }
  0x4b   :  { %579 = vrot.lane.b32.xlu1 %v456_v2, %s5516_s30  ;;  %v773_v2 = vrot.slane %v665_v60, 5  ;;  %68 = vst.msk [vmem:[#allocation2 + $0x30] sm:$0xf] %vm61_vm6, %v35_v35  ;;  %v37_v41 = vld [vmem:[%s8167_s0 + $0x30] sm:$0xf]  ;;  %v796_v34 = vrot.slane %v794_v37, 4 }
  0x4c   :  { %577 = vrot.lane.b32.xlu0 %v446_v16, %s5516_s30  ;;  %v4810_v16 = vrot.slane %v664_v12, 9  ;;  %70 = vst.msk [vmem:[#allocation2 + $0x40] sm:$0xf] %vm61_vm6, %v37_v41  ;;  %v797_v43 = vrot.slane %v675_v39, 5  ;;  %v673_v44 = vld [vmem:[%s8167_s0 + $0x3c] sm:$0xe] }
  0x4d   :  { %v775_v9 = vrot.slane %v773_v2, 4  ;;  %v4813_v48 = vrot.slane %v673_v44, 9  ;;  %v38_v49 = vld [vmem:[%s8167_s0 + $0x34] sm:$0xf]  ;;  %v5985_v54 = vld [vmem:[%s8167_s0 + $0x58] sm:$0xf] }
  0x4e   :  { %v774_v27 = vsel %vm5856_vm5, %v4810_v16, %v773_v2  ;;  %v798_v50 = vsel %vm5856_vm5, %v796_v34, %v797_v43  ;;  %v679_v51 = vld [vmem:[%s8167_s0 + $0x54] sm:$0xe]  ;;  %71 = vst.msk [vmem:[#allocation2 + $0x48] sm:$0xf] %vm61_vm6, %v38_v49  ;;  %v672_v55 = vld [vmem:[%s8167_s0 + $0x38] sm:$0x1] }
  0x4f   :  { %575 = vrot.lane.b32.xlu2 %v432_v36, %s5516_s30  ;;  %v777_v18 = vsel %vm5856_vm5, %v775_v9, %v776_v10  ;;  %v788_v36 = vsel %vm5856_vm5, %v4812_v30, %v787_v26  ;;  %v40_v56 = vld [vmem:[%s8167_s0 + $0x40] sm:$0xf]  ;;  %v795_v57 = vsel %vm5856_vm5, %v4813_v48, %v794_v37  ;;  %v4815_v60 = vrot.slane %v679_v51, 9  ;;  %v678_v62 = vld [vmem:[%s8167_s0 + $0x50] sm:$0x1] }
  0x50   :  { %73 = vst.msk [vmem:[#allocation2 + $0x58] sm:$0xf] %vm61_vm6, %v40_v56  ;;  %v808_v61 = vrot.slane %v5985_v54, 5  ;;  %v789_v63 = vrot.slane %v787_v26, 4  ;;  %v790_v0 = vrot.slane %v672_v55, 5  ;;  %v804_v6 = vrot.slane %v678_v62, 5 }
  0x51   :  { %v42_v4 = vld [vmem:[%s8167_s0 + $0x4c] sm:$0xf]  ;;  %v684_v12 = vld [vmem:[%s8167_s0 + $0x68] sm:$0x1]  ;;  %v676_v16 = vld [vmem:[%s8167_s0 + $0x48] sm:$0xe] }
  0x52   :  { %v809_v10 = vsel %vm5856_vm5, %v4815_v60, %v808_v61  ;;  %v791_v14 = vsel %vm5856_vm5, %v789_v63, %v790_v0  ;;  %75 = vst.msk [vmem:[#allocation2 + $0x68] sm:$0xf] %vm61_vm6, %v42_v4  ;;  %v43_v17 = vld [vmem:[%s8167_s0 + $0x54] sm:$0xf]  ;;  %v682_v19 = vld [vmem:[%s8167_s0 + $0x60] sm:$0xe] }
  0x53   :  { %585 = vrot.lane.b32.xlu1 %v494_v33, %s5516_s30  ;;  %v783_v33 = vrot.slane %v669_v15, 5  ;;  %76 = vst.msk [vmem:[#allocation2 + $0x70] sm:$0xf] %vm61_vm6, %v43_v17  ;;  %v4814_v22 = vrot.slane %v676_v16, 9  ;;  %v6047_v30 = vld [vmem:[%s8167_s0 + $0x70] sm:$0xf] }
  0x54   :  { %583 = vrot.lane.b32.xlu0 %v480_v38, %s5516_s30  ;;  %v770_v38 = vsel %vm5856_vm5, %v768_v31, %v769_v24  ;;  %v44_v26 = vld [vmem:[%s8167_s0 + $0x58] sm:$0xf]  ;;  %v6060_v11 = vld [vmem:[%s8167_s0 + $0x7c] sm:$0xf]  ;;  %v687_v39 = vld [vmem:[%s8167_s0 + $0x74] sm:$0x1] }
  0x55   :  { %v784_v42 = vsel %vm5856_vm5, %v782_v32, %v783_v33  ;;  %v688_v24 = vld [vmem:[%s8167_s0 + $0x78] sm:$0xe]  ;;  %v681_v32 = vld [vmem:[%s8167_s0 + $0x5c] sm:$0x1]  ;;  %v46_v33 = vld [vmem:[%s8167_s0 + $0x64] sm:$0xf] }
  0x56   :  { %77 = vst.msk [vmem:[#allocation2 + $0x78] sm:$0xf] %vm61_vm6, %v44_v26  ;;  %v4818_v37 = vrot.slane %v688_v24, 9  ;;  %v811_v41 = vrot.slane %v681_v32, 5  ;;  %v692_v43 = vld [vmem:[%s8167_s0 + $0x88] sm:$0xf] }
  0x57   :  { %581 = vrot.lane.b32.xlu2 %v470_v47, %s5516_s30  ;;  %v39_v47 = vld [vmem:[%s8167_s0 + $0x3c] sm:$0xf]  ;;  %79 = vst.msk [vmem:[#allocation2 + $0x88] sm:$0xf] %vm61_vm6, %v46_v33  ;;  %v48_v44 = vld [vmem:[%s8167_s0 + $0x70] sm:$0xf] }
  0x58   :  { %72 = vst.msk [vmem:[#allocation2 + $0x50] sm:$0xf] %vm61_vm6, %v39_v47  ;;  %v47_v47 = vld [vmem:[%s8167_s0 + $0x6c] sm:$0xf]  ;;  %v836_v51 = vrot.slane %v692_v43, 5  ;;  %vm965_vm8 = vcmask 388352  }
  0x59   :  { %81 = vst.msk [vmem:[#allocation2 + $0x98] sm:$0xf] %vm61_vm6, %v48_v44  ;;  %v49_v54 = vld [vmem:[%s8167_s0 + $0x78] sm:$0xf]  ;;  %v691_v56 = vld [vmem:[%s8167_s0 + $0x84] sm:$0xe] }
  0x5a   :  { %80 = vst.msk [vmem:[#allocation2 + $0x90] sm:$0xf] %vm61_vm6, %v47_v47  ;;  %v4819_v63 = vrot.slane %v691_v56, 9  ;;  %v51_v0 = vld [vmem:[%s8167_s0 + $0x84] sm:$0xf]  ;;  %vm1162_vm9 = vcmask 519552  }
  0x5b   :  { %591 = vrot.lane.b32.xlu1 %v528_v45, %s5516_s30  ;;  %v4811_v45 = vrot.slane %v667_v40, 9  ;;  %v810_v40 = vrot.slane %v808_v61, 4  ;;  %82 = vst.msk [vmem:[#allocation2 + $0xa0] sm:$0xf] %vm61_vm6, %v49_v54  ;;  %v696_v17 = vld [vmem:[%s8167_s0 + $0x98] sm:$0x1] }
  0x5c   :  { %589 = vrot.lane.b32.xlu0 %v518_v52, %s5516_s30  ;;  %v677_v52 = vld [vmem:[%s8167_s0 + $0x4c] sm:$0xf]  ;;  %84 = vst.msk [vmem:[#allocation2 + $0xb0] sm:$0xf] %vm61_vm6, %v51_v0  ;;  %v704_v44 = vld [vmem:[%s8167_s0 + $0xb8] sm:$0xf] }
  0x5d   :  { %v781_v53 = vsel %vm5856_vm5, %v4811_v45, %v780_v29  ;;  %v801_v58 = vrot.slane %v677_v52, 5  ;;  %v45_v29 = vld [vmem:[%s8167_s0 + $0x60] sm:$0xf]  ;;  %v812_v52 = vsel %vm5856_vm5, %v810_v40, %v811_v41  ;;  %v57_v40 = vld [vmem:[%s8167_s0 + $0xa8] sm:$0xf]  ;;  %vm3375_vm10 = vcmask 130048  }
  0x5e   :  { %78 = vst.msk [vmem:[#allocation2 + $0x80] sm:$0xf] %vm61_vm6, %v45_v29  ;;  %v53_v29 = vld [vmem:[%s8167_s0 + $0x90] sm:$0xf]  ;;  %v58_v47 = vld [vmem:[%s8167_s0 + $0xac] sm:$0xf] }
  0x5f   :  { %587 = vrot.lane.b32.xlu2 %v504_v3, %s5516_s30  ;;  %v683_v3 = vld [vmem:[%s8167_s0 + $0x64] sm:$0xf]  ;;  %v803_v5 = vrot.slane %v801_v58, 4  ;;  %v802_v28 = vsel %vm5856_vm5, %v4814_v22, %v801_v58  ;;  %v701_v22 = vld [vmem:[%s8167_s0 + $0xac] sm:$0xf]  ;;  %vm8171_vm11 = vcmask 650752  }
  0x60   :  { %v815_v13 = vrot.slane %v683_v3, 5  ;;  %86 = vst.msk [vmem:[#allocation2 + $0xc0] sm:$0xf] %vm61_vm6, %v53_v29  ;;  %v4836_v29 = vld [vmem:[%s8167_s0 + $0x54] sm:$0xf]  ;;  %vm2060_vm12 = vcmask 781952  }
  0x61   :  { %90 = vst.msk [vmem:[#allocation2 + $0xe0] sm:$0xf] %vm61_vm6, %v57_v40  ;;  %vm2257_vm13 = vcmask 913152   ;;  %vm2818_vm14 = vcmask 1044352   ;;  %vm4564_vm15 = vcmask 1042434   ;;  %vm4567_vm0 = vcmask 1043459  }
  0x62   :  { %v817_v7 = vrot.slane %v815_v13, 4  ;;  %91 = vst.msk [vmem:[#allocation2 + $0xe8] sm:$0xf] %vm61_vm6, %v58_v47  ;;  %vm8172_vm1 = vcmask 1044484   ;;  %vm8173_vm3 = vcmask 1046534   ;;  %vm4579_vm4 = vcmask 1047559  }
  0x63   :  { %873 = vrot.lane.b32.xlu1 %v767_v1, %s5517_s24 }
  0x64   :  { %871 = vrot.lane.b32.xlu0 %v763_v8, %s5517_s24  ;;  %v41_v8 = vld [vmem:[%s8167_s0 + $0x48] sm:$0xf] }
  0x65   :  { %74 = vst.msk [vmem:[#allocation2 + $0x60] sm:$0xf] %vm61_vm6, %v41_v8 }
  0x67   :  { %869 = vrot.lane.b32.xlu2 %v760_v21, %s5517_s24  ;;  %v818_v21 = vrot.slane %v684_v12, 5  ;;  %v837_v12 = vsel %vm5856_vm5, %v4819_v63, %v836_v51  ;;  %v703_v63 = vld [vmem:[%s8167_s0 + $0xb4] sm:$0xe] }
  0x69   :  { %v819_v31 = vsel %vm5856_vm5, %v817_v7, %v818_v21 }
  0x6b   :  { %879 = vrot.lane.b32.xlu1 %v777_v18, %s5517_s24  ;;  %v805_v18 = vsel %vm5856_vm5, %v803_v5, %v804_v6  ;;  %v697_v5 = vld [vmem:[%s8167_s0 + $0x9c] sm:$0xe]  ;;  %v6141_v6 = vld [vmem:[%s8167_s0 + $0xa0] sm:$0xf] }
  0x6c   :  { %877 = vrot.lane.b32.xlu0 %v774_v27, %s5517_s24  ;;  %v4816_v27 = vrot.slane %v682_v19, 9  ;;  %v850_v16 = vrot.slane %v6141_v6, 5 }
  0x6e   :  { %v816_v35 = vsel %vm5856_vm5, %v4816_v27, %v815_v13  ;;  %v846_v27 = vrot.slane %v696_v17, 5 }
  0x6f   :  { %875 = vrot.lane.b32.xlu2 %v770_v38, %s5517_s24  ;;  %v829_v38 = vrot.slane %v6060_v11, 5  ;;  %v694_v11 = vld [vmem:[%s8167_s0 + $0x90] sm:$0xe] }
  0x71   :  { %v538_v46 = vpop.permute.xlu2 %537  ;;  %v830_v49 = vsel %vm5856_vm5, %v4818_v37, %v829_v38  ;;  %v4820_v37 = vrot.slane %v694_v11, 9  ;;  %v4839_v11 = vld [vmem:[%s8167_s0 + $0x64] sm:$0xf] }
  0x72   :  { %630 = vst.msk [vmem:[#allocation2 + $0x20] sm:$0xf] %vm625_vm7, %v538_v46  ;;  %v825_v46 = vrot.slane %v687_v39, 5 }
  0x73   :  { %885 = vrot.lane.b32.xlu1 %v788_v36, %s5517_s24  ;;  %v822_v36 = vrot.slane %v6047_v30, 5 }
  0x74   :  { %883 = vrot.lane.b32.xlu0 %v784_v42, %s5517_s24 }
  0x75   :  { %v824_v45 = vrot.slane %v822_v36, 4 }
  0x77   :  { %881 = vrot.lane.b32.xlu2 %v781_v53, %s5517_s24  ;;  %v685_v53 = vld [vmem:[%s8167_s0 + $0x6c] sm:$0xe]  ;;  %v826_v55 = vsel %vm5856_vm5, %v824_v45, %v825_v46  ;;  %v699_v46 = vld [vmem:[%s8167_s0 + $0xa4] sm:$0x1] }
  0x78   :  { %v4817_v60 = vrot.slane %v685_v53, 9 }
  0x79   :  { %v540_v2 = vpop.permute.xlu2 %539 }
  0x7a   :  { %631 = vst.msk [vmem:[#allocation2 + $0x28] sm:$0xf] %vm625_vm7, %v540_v2  ;;  %v50_v2 = vld [vmem:[%s8167_s0 + $0x7c] sm:$0xf]  ;;  %v823_v8 = vsel %vm5856_vm5, %v4817_v60, %v822_v36  ;;  %v700_v36 = vld [vmem:[%s8167_s0 + $0xa8] sm:$0xe] }
  0x7b   :  { %891 = vrot.lane.b32.xlu1 %v798_v50, %s5517_s24  ;;  %v693_v50 = vld [vmem:[%s8167_s0 + $0x8c] sm:$0x1]  ;;  %83 = vst.msk [vmem:[#allocation2 + $0xa8] sm:$0xf] %vm61_vm6, %v50_v2  ;;  %v4822_v41 = vrot.slane %v700_v36, 9 }
  0x7c   :  { %889 = vrot.lane.b32.xlu0 %v795_v57, %s5517_s24  ;;  %v838_v57 = vrot.slane %v836_v51, 4  ;;  %v839_v58 = vrot.slane %v693_v50, 5  ;;  %v705_v50 = vld [vmem:[%s8167_s0 + $0xbc] sm:$0x1]  ;;  %v852_v51 = vrot.slane %v850_v16, 4 }
  0x7d   :  { %v534_v1 = vpop.permute.xlu1 %533 }
  0x7e   :  { %628 = vst.msk [vmem:[#allocation2 + $0x10] sm:$0xf] %vm625_vm7, %v534_v1  ;;  %v530_v9 = vpop.permute.xlu0 %529  ;;  %v6128_v1 = vld [vmem:[%s8167_s0 + $0x94] sm:$0xf]  ;;  %v840_v4 = vsel %vm5856_vm5, %v838_v57, %v839_v58  ;;  %v867_v57 = vrot.slane %v705_v50, 5 }
  0x7f   :  { %626 = vst.msk [vmem:[#allocation2] sm:$0xf] %vm625_vm7, %v530_v9  ;;  %887 = vrot.lane.b32.xlu2 %v791_v14, %s5517_s24  ;;  %v690_v9 = vld [vmem:[%s8167_s0 + $0x80] sm:$0x1]  ;;  %v843_v13 = vrot.slane %v6128_v1, 5  ;;  %v4821_v14 = vrot.slane %v697_v5, 9 }
  0x80   :  { %v832_v19 = vrot.slane %v690_v9, 5  ;;  %v59_v58 = vld [vmem:[%s8167_s0 + $0xb4] sm:$0xf]  ;;  %v4823_v1 = vrot.slane %v703_v63, 9  ;;  %v4827_v5 = vld [vmem:[%s8167_s0 + $0x1c] sm:$0xf] }
  0x81   :  { %v546_v25 = vpop.permute.xlu2 %545  ;;  %v851_v26 = vsel %vm5856_vm5, %v4821_v14, %v850_v16  ;;  %v844_v45 = vsel %vm5856_vm5, %v4820_v37, %v843_v13  ;;  %92 = vst.msk [vmem:[#allocation2 + $0xf0] sm:$0xf] %vm61_vm6, %v59_v58  ;;  %v4825_v14 = vld [vmem:[%s8167_s0 + $0x10] sm:$0xf]  ;;  %v4829_v16 = vld [vmem:[%s8167_s0 + $0x28] sm:$0xf] }
  0x82   :  { %634 = vst.msk [vmem:[#allocation2 + $0x40] sm:$0xf] %vm625_vm7, %v546_v25  ;;  %v845_v25 = vrot.slane %v843_v13, 4  ;;  %v4830_v13 = vld [vmem:[%s8167_s0 + $0x30] sm:$0xf] }
  0x83   :  { %897 = vrot.lane.b32.xlu1 %v809_v10, %s5517_s24  ;;  %v52_v10 = vld [vmem:[%s8167_s0 + $0x88] sm:$0xf]  ;;  %v4842_v37 = vld [vmem:[%s8167_s0 + $0x78] sm:$0xf]  ;;  %v4847_v50 = vld [vmem:[%s8167_s0 + $0x94] sm:$0xf] }
  0x84   :  { %895 = vrot.lane.b32.xlu0 %v805_v18, %s5517_s24  ;;  %85 = vst.msk [vmem:[#allocation2 + $0xb8] sm:$0xf] %vm61_vm6, %v52_v10  ;;  %v831_v18 = vrot.slane %v829_v38, 4  ;;  %v847_v32 = vsel %vm5856_vm5, %v845_v25, %v846_v27  ;;  %v4851_v58 = vld [vmem:[%s8167_s0 + $0xac] sm:$0xf] }
  0x85   :  { %v536_v23 = vpop.permute.xlu1 %535  ;;  %v4850_v63 = vld [vmem:[%s8167_s0 + $0xa8] sm:$0xf] }
  0x86   :  { %629 = vst.msk [vmem:[#allocation2 + $0x18] sm:$0xf] %vm625_vm7, %v536_v23  ;;  %v532_v15 = vpop.permute.xlu0 %531  ;;  %v54_v23 = vld [vmem:[%s8167_s0 + $0x94] sm:$0xf]  ;;  %v833_v24 = vsel %vm5856_vm5, %v831_v18, %v832_v19 }
  0x87   :  { %627 = vst.msk [vmem:[#allocation2 + $0x8] sm:$0xf] %vm625_vm7, %v532_v15  ;;  %893 = vrot.lane.b32.xlu2 %v802_v28, %s5517_s24  ;;  %v702_v15 = vld [vmem:[%s8167_s0 + $0xb0] sm:$0x1]  ;;  %v55_v28 = vld [vmem:[%s8167_s0 + $0x9c] sm:$0xf] }
  0x88   :  { %87 = vst.msk [vmem:[#allocation2 + $0xc8] sm:$0xf] %vm61_vm6, %v54_v23 }
  0x89   :  { %v552_v34 = vpop.permute.xlu2 %551  ;;  %88 = vst.msk [vmem:[#allocation2 + $0xd0] sm:$0xf] %vm61_vm6, %v55_v28  ;;  %v4834_v28 = vld [vmem:[%s8167_s0 + $0x48] sm:$0xf] }
  0x8a   :  { %637 = vst.msk [vmem:[#allocation2 + $0x58] sm:$0xf] %vm625_vm7, %v552_v34 }
  0x8b   :  { %903 = vrot.lane.b32.xlu1 %v819_v31, %s5517_s24  ;;  %v857_v31 = vrot.slane %v701_v22, 5  ;;  %v4832_v22 = vld [vmem:[%s8167_s0 + $0x3c] sm:$0xf] }
  0x8c   :  { %901 = vrot.lane.b32.xlu0 %v816_v35, %s5517_s24  ;;  %v860_v35 = vrot.slane %v702_v15, 5 }
  0x8d   :  { %v544_v42 = vpop.permute.xlu1 %543  ;;  %v859_v33 = vrot.slane %v857_v31, 4 }
  0x8e   :  { %633 = vst.msk [vmem:[#allocation2 + $0x38] sm:$0xf] %vm625_vm7, %v544_v42  ;;  %v542_v48 = vpop.permute.xlu0 %541  ;;  %v56_v42 = vld [vmem:[%s8167_s0 + $0xa0] sm:$0xf] }
  0x8f   :  { %632 = vst.msk [vmem:[#allocation2 + $0x30] sm:$0xf] %vm625_vm7, %v542_v48  ;;  %899 = vrot.lane.b32.xlu2 %v812_v52, %s5517_s24  ;;  %v861_v43 = vsel %vm5856_vm5, %v859_v33, %v860_v35  ;;  %v858_v48 = vsel %vm5856_vm5, %v4822_v41, %v857_v31  ;;  %v853_v52 = vrot.slane %v699_v46, 5 }
  0x90   :  { %89 = vst.msk [vmem:[#allocation2 + $0xd8] sm:$0xf] %vm61_vm6, %v56_v42 }
  0x91   :  { %v558_v62 = vpop.permute.xlu2 %557 }
  0x92   :  { %640 = vst.msk [vmem:[#allocation2 + $0x70] sm:$0xf] %vm625_vm7, %v558_v62  ;;  %v854_v62 = vsel %vm5856_vm5, %v852_v51, %v853_v52  ;;  %v4857_v51 = vld [vmem:[%s8167_s0 + $0x10] sm:$0xf] }
  0x93   :  { %909 = vrot.lane.b32.xlu1 %v830_v49, %s5517_s24  ;;  %v864_v49 = vrot.slane %v704_v44, 5  ;;  %v4844_v44 = vld [vmem:[%s8167_s0 + $0x84] sm:$0xf] }
  0x94   :  { %907 = vrot.lane.b32.xlu0 %v826_v55, %s5517_s24  ;;  %v60_v55 = vld [vmem:[%s8167_s0 + $0xb8] sm:$0xf] }
  0x95   :  { %v550_v61 = vpop.permute.xlu1 %549  ;;  %v866_v56 = vrot.slane %v864_v49, 4  ;;  %93 = vst.msk [vmem:[#allocation2 + $0xf8] sm:$0xf] %vm61_vm6, %v60_v55  ;;  %v865_v6 = vsel %vm5856_vm5, %v4823_v1, %v864_v49  ;;  %v4843_v49 = vld [vmem:[%s8167_s0 + $0x7c] sm:$0xf]  ;;  %v1257_v55 = vshrl.u32 %v4857_v51, 16 }
  0x96   :  { %636 = vst.msk [vmem:[#allocation2 + $0x50] sm:$0xf] %vm625_vm7, %v550_v61  ;;  %v548_v3 = vpop.permute.xlu0 %547  ;;  %v4824_v61 = vld [vmem:[%s8167_s0 + $0xc] sm:$0xf] }
  0x97   :  { %635 = vst.msk [vmem:[#allocation2 + $0x48] sm:$0xf] %vm625_vm7, %v548_v3  ;;  %905 = vrot.lane.b32.xlu2 %v823_v8, %s5517_s24  ;;  %v868_v0 = vsel %vm5856_vm5, %v866_v56, %v867_v57  ;;  %v4826_v8 = vld [vmem:[%s8167_s0 + $0x18] sm:$0xf]  ;;  %v4856_v56 = vld [vmem:[%s8167_s0 + $0xc] sm:$0xf] }
  0x99   :  { %v564_v21 = vpop.permute.xlu2 %563 }
  0x9a   :  { %643 = vst.msk [vmem:[#allocation2 + $0x88] sm:$0xf] %vm625_vm7, %v564_v21  ;;  %v4828_v21 = vld [vmem:[%s8167_s0 + $0x24] sm:$0xf] }
  0x9b   :  { %915 = vrot.lane.b32.xlu1 %v840_v4, %s5517_s24 }
  0x9c   :  { %913 = vrot.lane.b32.xlu0 %v837_v12, %s5517_s24 }
  0x9d   :  { %v556_v7 = vpop.permute.xlu1 %555 }
  0x9e   :  { %639 = vst.msk [vmem:[#allocation2 + $0x68] sm:$0xf] %vm625_vm7, %v556_v7  ;;  %v554_v30 = vpop.permute.xlu0 %553  ;;  %v4833_v7 = vld [vmem:[%s8167_s0 + $0x40] sm:$0xf] }
  0x9f   :  { %638 = vst.msk [vmem:[#allocation2 + $0x60] sm:$0xf] %vm625_vm7, %v554_v30  ;;  %911 = vrot.lane.b32.xlu2 %v833_v24, %s5517_s24  ;;  %v4831_v30 = vld [vmem:[%s8167_s0 + $0x34] sm:$0xf] }
  0xa1   :  { %v570_v39 = vpop.permute.xlu2 %569 }
  0xa2   :  { %646 = vst.msk [vmem:[#allocation2 + $0xa0] sm:$0xf] %vm625_vm7, %v570_v39  ;;  %v4841_v39 = vld [vmem:[%s8167_s0 + $0x70] sm:$0xf] }
  0xa3   :  { %921 = vrot.lane.b32.xlu1 %v851_v26, %s5517_s24  ;;  %v4835_v26 = vld [vmem:[%s8167_s0 + $0x4c] sm:$0xf] }
  0xa4   :  { %919 = vrot.lane.b32.xlu0 %v847_v32, %s5517_s24  ;;  %v4838_v32 = vld [vmem:[%s8167_s0 + $0x60] sm:$0xf] }
  0xa5   :  { %v562_v38 = vpop.permute.xlu1 %561 }
  0xa6   :  { %642 = vst.msk [vmem:[#allocation2 + $0x80] sm:$0xf] %vm625_vm7, %v562_v38  ;;  %v560_v34 = vpop.permute.xlu0 %559  ;;  %v4837_v38 = vld [vmem:[%s8167_s0 + $0x58] sm:$0xf] }
  0xa7   :  { %641 = vst.msk [vmem:[#allocation2 + $0x78] sm:$0xf] %vm625_vm7, %v560_v34  ;;  %917 = vrot.lane.b32.xlu2 %v844_v45, %s5517_s24  ;;  %v4845_v34 = vld [vmem:[%s8167_s0 + $0x88] sm:$0xf] }
  0xa9   :  { %v576_v54 = vpop.permute.xlu2 %575 }
  0xaa   :  { %649 = vst.msk [vmem:[#allocation2 + $0xb8] sm:$0xf] %vm625_vm7, %v576_v54  ;;  %v1253_v54 = vshll.u32 %v4857_v51, 16 }
  0xab   :  { %927 = vrot.lane.b32.xlu1 %v861_v43, %s5517_s24  ;;  %v4840_v43 = vld [vmem:[%s8167_s0 + $0x6c] sm:$0xf] }
  0xac   :  { %925 = vrot.lane.b32.xlu0 %v858_v48, %s5517_s24  ;;  %v4848_v48 = vld [vmem:[%s8167_s0 + $0x9c] sm:$0xf]  ;;  %v6400_v1 = vrot.slane %v1253_v54, 5 }
  0xad   :  { %v568_v53 = vpop.permute.xlu1 %567 }
  0xae   :  { %645 = vst.msk [vmem:[#allocation2 + $0x98] sm:$0xf] %vm625_vm7, %v568_v53  ;;  %v566_v60 = vpop.permute.xlu0 %565 }
  0xaf   :  { %644 = vst.msk [vmem:[#allocation2 + $0x90] sm:$0xf] %vm625_vm7, %v566_v60  ;;  %923 = vrot.lane.b32.xlu2 %v854_v62, %s5517_s24  ;;  %v4846_v60 = vld [vmem:[%s8167_s0 + $0x90] sm:$0xf]  ;;  %v1247_v62 = vshll.u32 %v4856_v56, 16 }
  0xb1   :  { %v582_v3 = vpop.permute.xlu2 %581 }
  0xb2   :  { %652 = vst.msk [vmem:[#allocation2 + $0xd0] sm:$0xf] %vm625_vm7, %v582_v3  ;;  %v4862_v3 = vld [vmem:[%s8167_s0 + $0x24] sm:$0xf] }
  0xb3   :  { %1066 = vrot.lane.b32.xlu1 %v4824_v61, %s5518_s10  ;;  %v1244_v61 = vshrl.u32 %v4856_v56, 16  ;;  %v4871_v56 = vld [vmem:[%s8167_s0 + $0x48] sm:$0xf] }
  0xb4   :  { %931 = vrot.lane.b32.xlu0 %v868_v0, %s5517_s24  ;;  %v4858_v0 = vld [vmem:[%s8167_s0 + $0x14] sm:$0x1] }
  0xb5   :  { %v574_v2 = vpop.permute.xlu1 %573 }
  0xb6   :  { %648 = vst.msk [vmem:[#allocation2 + $0xb0] sm:$0xf] %vm625_vm7, %v574_v2  ;;  %v572_v4 = vpop.permute.xlu0 %571  ;;  %v1259_v2 = vrot.slane %v1257_v55, 4 }
  0xb7   :  { %647 = vst.msk [vmem:[#allocation2 + $0xa8] sm:$0xf] %vm625_vm7, %v572_v4  ;;  %929 = vrot.lane.b32.xlu2 %v865_v6, %s5517_s24  ;;  %v1263_v6 = vshll.u32 %v4858_v0, 16 }
  0xb9   :  { %v588_v10 = vpop.permute.xlu2 %587 }
  0xba   :  { %655 = vst.msk [vmem:[#allocation2 + $0xe8] sm:$0xf] %vm625_vm7, %v588_v10  ;;  %v1260_v10 = vor.u32 %v1259_v2, %v6400_v1 }
  0xbb   :  { %1072 = vrot.lane.b32.xlu1 %v4827_v5, %s5518_s10 }
  0xbc   :  { %1070 = vrot.lane.b32.xlu0 %v4826_v8, %s5518_s10  ;;  %v1246_v8 = vrot.slane %v1244_v61, 4 }
  0xbd   :  { %v580_v9 = vpop.permute.xlu1 %579 }
  0xbe   :  { %651 = vst.msk [vmem:[#allocation2 + $0xc8] sm:$0xf] %vm625_vm7, %v580_v9  ;;  %v578_v12 = vpop.permute.xlu0 %577  ;;  %v1249_v9 = vrot.slane %v1247_v62, 5 }
  0xbf   :  { %650 = vst.msk [vmem:[#allocation2 + $0xc0] sm:$0xf] %vm625_vm7, %v578_v12  ;;  %1068 = vrot.lane.b32.xlu2 %v4825_v14, %s5518_s10  ;;  %v1292_v12 = vshrl.u32 %v4862_v3, 16  ;;  %v4860_v14 = vld [vmem:[%s8167_s0 + $0x1c] sm:$0xf] }
  0xc1   :  { %v870_v18 = vpop.permute.xlu2 %869 }
  0xc2   :  { %966 = vst.msk [vmem:[#allocation2] sm:$0xf] %vm965_vm8, %v870_v18  ;;  %v4849_v18 = vld [vmem:[%s8167_s0 + $0xa0] sm:$0xf] }
  0xc3   :  { %1078 = vrot.lane.b32.xlu1 %v4830_v13, %s5518_s10  ;;  %v1295_v13 = vshll.u32 %v4862_v3, 16 }
  0xc4   :  { %1076 = vrot.lane.b32.xlu0 %v4829_v16, %s5518_s10 }
  0xc5   :  { %v586_v17 = vpop.permute.xlu1 %585 }
  0xc6   :  { %654 = vst.msk [vmem:[#allocation2 + $0xe0] sm:$0xf] %vm625_vm7, %v586_v17  ;;  %v584_v19 = vpop.permute.xlu0 %583  ;;  %v4854_v17 = vld [vmem:[%s8167_s0 + $0xc0] sm:$0xf] }
  0xc7   :  { %653 = vst.msk [vmem:[#allocation2 + $0xd8] sm:$0xf] %vm625_vm7, %v584_v19  ;;  %1074 = vrot.lane.b32.xlu2 %v4828_v21, %s5518_s10  ;;  %v4853_v19 = vld [vmem:[%s8167_s0 + $0xb8] sm:$0xf]  ;;  %v1277_v21 = vshll.u32 %v4860_v14, 16 }
  0xc9   :  { %v876_v25 = vpop.permute.xlu2 %875 }
  0xca   :  { %969 = vst.msk [vmem:[#allocation2 + $0x18] sm:$0xf] %vm965_vm8, %v876_v25  ;;  %v1265_v25 = vrot.slane %v1263_v6, 5 }
  0xcb   :  { %1084 = vrot.lane.b32.xlu1 %v4833_v7, %s5518_s10  ;;  %v1250_v7 = vor.u32 %v1249_v9, %v1246_v8 }
  0xcc   :  { %1082 = vrot.lane.b32.xlu0 %v4832_v22, %s5518_s10  ;;  %v1281_v22 = vshrl.u32 %v4860_v14, 16 }
  0xcd   :  { %v592_v23 = vpop.permute.xlu1 %591 }
  0xce   :  { %657 = vst.msk [vmem:[#allocation2 + $0xf8] sm:$0xf] %vm625_vm7, %v592_v23  ;;  %v590_v27 = vpop.permute.xlu0 %589  ;;  %v1261_v23 = vrot.slane %v1260_v10, 4  ;;  %v4855_v10 = vld [vmem:[%s8167_s0 + $0xc4] sm:$0xf] }
  0xcf   :  { %656 = vst.msk [vmem:[#allocation2 + $0xf0] sm:$0xf] %vm625_vm7, %v590_v27  ;;  %1080 = vrot.lane.b32.xlu2 %v4831_v30, %s5518_s10  ;;  %v1294_v27 = vrot.slane %v1292_v12, 4  ;;  %v4866_v30 = vld [vmem:[%s8167_s0 + $0x34] sm:$0xf]  ;;  %vm4688_vm7 = vcmask 1040384  }
  0xd1   :  { %v882_v31 = vpop.permute.xlu2 %881 }
  0xd2   :  { %972 = vst.msk [vmem:[#allocation2 + $0x30] sm:$0xf] %vm965_vm8, %v882_v31 }
  0xd3   :  { %1090 = vrot.lane.b32.xlu1 %v4836_v29, %s5518_s10  ;;  %v1297_v29 = vrot.slane %v1295_v13, 5 }
  0xd4   :  { %1088 = vrot.lane.b32.xlu0 %v4835_v26, %s5518_s10  ;;  %v6430_v26 = vld [vmem:[%s8167_s0 + $0x28] sm:$0xf] }
  0xd5   :  { %v874_v15 = vpop.permute.xlu1 %873  ;;  %v1305_v2 = vshrl.u32 %v6430_v26, 16 }
  0xd6   :  { %968 = vst.msk [vmem:[#allocation2 + $0x10] sm:$0xf] %vm965_vm8, %v874_v15  ;;  %v872_v24 = vpop.permute.xlu0 %871 }
  0xd7   :  { %967 = vst.msk [vmem:[#allocation2 + $0x8] sm:$0xf] %vm965_vm8, %v872_v24  ;;  %1086 = vrot.lane.b32.xlu2 %v4834_v28, %s5518_s10  ;;  %v4865_v24 = vld [vmem:[%s8167_s0 + $0x30] sm:$0xf]  ;;  %v6440_v28 = vrot.slane %v1277_v21, 5 }
  0xd8   :  { %v4875_v21 = vld [vmem:[%s8167_s0 + $0x58] sm:$0xf] }
  0xd9   :  { %v888_v35 = vpop.permute.xlu2 %887 }
  0xda   :  { %975 = vst.msk [vmem:[#allocation2 + $0x48] sm:$0xf] %vm965_vm8, %v888_v35  ;;  %v1329_v35 = vshrl.u32 %v4866_v30, 16 }
  0xdb   :  { %1096 = vrot.lane.b32.xlu1 %v4839_v11, %s5518_s10  ;;  %v4859_v11 = vld [vmem:[%s8167_s0 + $0x18] sm:$0xf] }
  0xdc   :  { %1094 = vrot.lane.b32.xlu0 %v4838_v32, %s5518_s10  ;;  %v1283_v32 = vrot.slane %v1281_v22, 4  ;;  %v1307_v22 = vrot.slane %v1305_v2, 4 }
  0xdd   :  { %v880_v33 = vpop.permute.xlu1 %879 }
  0xde   :  { %971 = vst.msk [vmem:[#allocation2 + $0x28] sm:$0xf] %vm965_vm8, %v880_v33  ;;  %v878_v36 = vpop.permute.xlu0 %877  ;;  %v1325_v33 = vshll.u32 %v4866_v30, 16 }
  0xdf   :  { %970 = vst.msk [vmem:[#allocation2 + $0x20] sm:$0xf] %vm965_vm8, %v878_v36  ;;  %1092 = vrot.lane.b32.xlu2 %v4837_v38, %s5518_s10  ;;  %v1266_v36 = vsel %vm5566_vm2, %v1261_v23, %v1265_v25  ;;  %v1298_v38 = vor.u32 %v1297_v29, %v1294_v27  ;;  %v6494_v25 = vld [vmem:[%s8167_s0 + $0x4c] sm:$0xf] }
  0xe0   :  { %v4864_v29 = vld [vmem:[%s8167_s0 + $0x2c] sm:$0x1] }
  0xe1   :  { %v894_v41 = vpop.permute.xlu2 %893  ;;  %v1299_v51 = vrot.slane %v1298_v38, 4 }
  0xe2   :  { %978 = vst.msk [vmem:[#allocation2 + $0x60] sm:$0xf] %vm965_vm8, %v894_v41 }
  0xe3   :  { %1102 = vrot.lane.b32.xlu1 %v4842_v37, %s5518_s10  ;;  %v1251_v37 = vrot.slane %v1250_v7, 4 }
  0xe4   :  { %1100 = vrot.lane.b32.xlu0 %v4841_v39, %s5518_s10  ;;  %v1301_v39 = vshll.u32 %v6430_v26, 16 }
  0xe5   :  { %v886_v40 = vpop.permute.xlu1 %885 }
  0xe6   :  { %974 = vst.msk [vmem:[#allocation2 + $0x40] sm:$0xf] %vm965_vm8, %v886_v40  ;;  %v884_v42 = vpop.permute.xlu0 %883  ;;  %v4861_v40 = vld [vmem:[%s8167_s0 + $0x20] sm:$0x1] }
  0xe7   :  { %973 = vst.msk [vmem:[#allocation2 + $0x38] sm:$0xf] %vm965_vm8, %v884_v42  ;;  %1098 = vrot.lane.b32.xlu2 %v4840_v43, %s5518_s10  ;;  %v4852_v42 = vld [vmem:[%s8167_s0 + $0xb4] sm:$0xf]  ;;  %v1319_v43 = vshll.u32 %v4865_v24, 16 }
  0xe9   :  { %v900_v46 = vpop.permute.xlu2 %899  ;;  %v1321_v55 = vrot.slane %v1319_v43, 5 }
  0xea   :  { %981 = vst.msk [vmem:[#allocation2 + $0x78] sm:$0xf] %vm965_vm8, %v900_v46  ;;  %v1284_v46 = vor.u32 %v1283_v32, %v6440_v28  ;;  %v1397_v32 = vshll.u32 %v4875_v21, 16 }
  0xeb   :  { %1108 = vrot.lane.b32.xlu1 %v4845_v34, %s5518_s10  ;;  %v1316_v34 = vshrl.u32 %v4865_v24, 16 }
  0xec   :  { %1106 = vrot.lane.b32.xlu0 %v4844_v44, %s5518_s10  ;;  %v1268_v44 = vshrl.u32 %v4859_v11, 16  ;;  %v1285_v62 = vrot.slane %v1284_v46, 4 }
  0xed   :  { %v892_v45 = vpop.permute.xlu1 %891  ;;  %v1318_v54 = vrot.slane %v1316_v34, 4 }
  0xee   :  { %977 = vst.msk [vmem:[#allocation2 + $0x58] sm:$0xf] %vm965_vm8, %v892_v45  ;;  %v890_v47 = vpop.permute.xlu0 %889  ;;  %v1271_v45 = vshll.u32 %v4859_v11, 16  ;;  %v4868_v11 = vld [vmem:[%s8167_s0 + $0x3c] sm:$0xf] }
  0xef   :  { %976 = vst.msk [vmem:[#allocation2 + $0x50] sm:$0xf] %vm965_vm8, %v890_v47  ;;  %1104 = vrot.lane.b32.xlu2 %v4843_v49, %s5518_s10  ;;  %v1287_v47 = vshll.u32 %v4861_v40, 16  ;;  %v1331_v49 = vrot.slane %v1329_v35, 4  ;;  %v1322_v9 = vor.u32 %v1321_v55, %v1318_v54  ;;  %v4874_v35 = vld [vmem:[%s8167_s0 + $0x54] sm:$0xf] }
  0xf0   :  { %v1340_v34 = vshrl.u32 %v4868_v11, 16  ;;  %v1343_v43 = vshll.u32 %v4868_v11, 16  ;;  %v6570_v11 = vld [vmem:[%s8167_s0 + $0x70] sm:$0xf] }
  0xf1   :  { %v906_v53 = vpop.permute.xlu2 %905  ;;  %v1323_v23 = vrot.slane %v1322_v9, 4 }
  0xf2   :  { %984 = vst.msk [vmem:[#allocation2 + $0x90] sm:$0xf] %vm965_vm8, %v906_v53  ;;  %v4867_v53 = vld [vmem:[%s8167_s0 + $0x38] sm:$0x1] }
  0xf3   :  { %1114 = vrot.lane.b32.xlu1 %v4848_v48, %s5518_s10  ;;  %v6454_v48 = vrot.slane %v1325_v33, 5  ;;  %v1335_v3 = vshll.u32 %v4867_v53, 16  ;;  %v1401_v33 = vshrl.u32 %v4875_v21, 16  ;;  %v5050_v21 = vld [vmem:[%s8167_s0 + $0x20] sm:$0x1] }
  0xf4   :  { %1112 = vrot.lane.b32.xlu0 %v4847_v50, %s5518_s10  ;;  %v1256_v50 = vsel %vm5566_vm2, %v1251_v37, %v6400_v1  ;;  %v4869_v1 = vld [vmem:[%s8167_s0 + $0x40] sm:$0xf]  ;;  %v1373_v37 = vshll.u32 %v6494_v25, 16 }
  0xf5   :  { %v898_v52 = vpop.permute.xlu1 %897  ;;  %v1332_v0 = vor.u32 %v1331_v49, %v6454_v48  ;;  %v1349_v13 = vshll.u32 %v4869_v1, 16  ;;  %v1353_v14 = vshrl.u32 %v4869_v1, 16  ;;  %v1377_v49 = vshrl.u32 %v6494_v25, 16 }
  0xf6   :  { %980 = vst.msk [vmem:[#allocation2 + $0x70] sm:$0xf] %vm965_vm8, %v898_v52  ;;  %v896_v57 = vpop.permute.xlu0 %895  ;;  %v6460_v52 = vrot.slane %v1301_v39, 5  ;;  %v1311_v39 = vshll.u32 %v4864_v29, 16  ;;  %v6529_v53 = vrot.slane %v1373_v37, 5 }
  0xf7   :  { %979 = vst.msk [vmem:[#allocation2 + $0x68] sm:$0xf] %vm965_vm8, %v896_v57  ;;  %1110 = vrot.lane.b32.xlu2 %v4846_v60, %s5518_s10  ;;  %v1270_v57 = vrot.slane %v1268_v44, 4  ;;  %v1355_v24 = vrot.slane %v1353_v14, 4  ;;  %v1328_v44 = vsel %vm5566_vm2, %v1323_v23, %v6454_v48  ;;  %v4880_v48 = vld [vmem:[%s8167_s0 + $0x6c] sm:$0xf] }
  0xf8   :  { %v1304_v8 = vsel %vm5566_vm2, %v1299_v51, %v6460_v52  ;;  %v1308_v38 = vor.u32 %v1307_v22, %v6460_v52  ;;  %v1403_v51 = vrot.slane %v1401_v33, 4  ;;  %v1391_v52 = vshll.u32 %v4874_v35, 16  ;;  %v4873_v33 = vld [vmem:[%s8167_s0 + $0x50] sm:$0x1] }
  0xf9   :  { %v912_v5 = vpop.permute.xlu2 %911  ;;  %v1313_v55 = vrot.slane %v1311_v39, 5  ;;  %v1439_v9 = vshll.u32 %v4880_v48, 16  ;;  %v4877_v39 = vld [vmem:[%s8167_s0 + $0x60] sm:$0xf] }
  0xfa   :  { %987 = vst.msk [vmem:[#allocation2 + $0xa8] sm:$0xf] %vm965_vm8, %v912_v5  ;;  %v1367_v5 = vshll.u32 %v4871_v56, 16  ;;  %v1309_v54 = vrot.slane %v1308_v38, 4 }
  0xfb   :  { %1120 = vrot.lane.b32.xlu1 %v4851_v58, %s5518_s10  ;;  %v1273_v58 = vrot.slane %v1271_v45, 5 }
  0xfc   :  { %1118 = vrot.lane.b32.xlu0 %v4850_v63, %s5518_s10  ;;  %v1289_v63 = vrot.slane %v1287_v47, 5  ;;  %v1369_v7 = vrot.slane %v1367_v5, 5  ;;  %v1388_v47 = vshrl.u32 %v4874_v35, 16  ;;  %v1314_v14 = vsel %vm5566_vm2, %v1309_v54, %v1313_v55 }
  0xfd   :  { %v904_v4 = vpop.permute.xlu1 %903  ;;  %v1274_v12 = vor.u32 %v1273_v58, %v1270_v57  ;;  %v1345_v57 = vrot.slane %v1343_v43, 5  ;;  %v5049_v58 = vld [vmem:[%s8167_s0 + $0x1c] sm:$0xf]  ;;  %v1445_v43 = vshll.u32 %v6570_v11, 16 }
  0xfe   :  { %983 = vst.msk [vmem:[#allocation2 + $0x88] sm:$0xf] %vm965_vm8, %v904_v4  ;;  %v902_v16 = vpop.permute.xlu0 %901  ;;  %v1364_v4 = vshrl.u32 %v4871_v56, 16  ;;  %v1342_v56 = vrot.slane %v1340_v34, 4  ;;  %v1390_v1 = vrot.slane %v1388_v47, 4  ;;  %v2949_v5 = vrot.slane %v5049_v58, 5 }
  0xff   :  { %982 = vst.msk [vmem:[#allocation2 + $0x80] sm:$0xf] %vm965_vm8, %v902_v16  ;;  %1116 = vrot.lane.b32.xlu2 %v4849_v18, %s5518_s10  ;;  %v1290_v16 = vsel %vm5566_vm2, %v1285_v62, %v1289_v63  ;;  %v1337_v18 = vrot.slane %v1335_v3, 5  ;;  %v1275_v27 = vrot.slane %v1274_v12, 4  ;;  %v1393_v3 = vrot.slane %v1391_v52, 5 }
 0x100   :  { %v1412_v52 = vshrl.u32 %v4877_v39, 16 }
 0x101   :  { %v918_v31 = vpop.permute.xlu2 %917  ;;  %v1394_v23 = vor.u32 %v1393_v3, %v1390_v1 }
 0x102   :  { %990 = vst.msk [vmem:[#allocation2 + $0xc0] sm:$0xf] %vm965_vm8, %v918_v31  ;;  %v6502_v31 = vrot.slane %v1349_v13, 5 }
 0x103   :  { %1126 = vrot.lane.b32.xlu1 %v4854_v17, %s5518_s10  ;;  %v1333_v17 = vrot.slane %v1332_v0, 4  ;;  %v4876_v0 = vld [vmem:[%s8167_s0 + $0x5c] sm:$0x1] }
 0x104   :  { %1124 = vrot.lane.b32.xlu0 %v4853_v19, %s5518_s10  ;;  %v1366_v19 = vrot.slane %v1364_v4, 4  ;;  %v1356_v45 = vor.u32 %v1355_v24, %v6502_v31  ;;  %v4878_v4 = vld [vmem:[%s8167_s0 + $0x64] sm:$0xf]  ;;  %v1407_v13 = vshll.u32 %v4876_v0, 16  ;;  %v1449_v0 = vshrl.u32 %v6570_v11, 16 }
 0x105   :  { %v910_v15 = vpop.permute.xlu1 %909 }
 0x106   :  { %986 = vst.msk [vmem:[#allocation2 + $0xa0] sm:$0xf] %vm965_vm8, %v910_v15  ;;  %v908_v41 = vpop.permute.xlu0 %907  ;;  %v4870_v15 = vld [vmem:[%s8167_s0 + $0x44] sm:$0x1]  ;;  %v1409_v24 = vrot.slane %v1407_v13, 5 }
 0x107   :  { %985 = vst.msk [vmem:[#allocation2 + $0x98] sm:$0xf] %vm965_vm8, %v908_v41  ;;  %1122 = vrot.lane.b32.xlu2 %v4852_v42, %s5518_s10  ;;  %v1338_v41 = vsel %vm5566_vm2, %v1333_v17, %v1337_v18  ;;  %v1280_v42 = vsel %vm5566_vm2, %v1275_v27, %v6440_v28  ;;  %v1359_v46 = vshll.u32 %v4870_v15, 16  ;;  %v2951_v27 = vrot.slane %v2949_v5, 4 }
 0x108   :  { %v2952_v15 = vrot.slane %v5050_v21, 5 }
 0x109   :  { %v924_v61 = vpop.permute.xlu2 %923  ;;  %v1361_v62 = vrot.slane %v1359_v46, 5  ;;  %v5468_v46 = vld [vmem:[%s8168_s1 + $0x40] sm:$0xff] }
 0x10a   :  { %993 = vst.msk [vmem:[#allocation2 + $0xd8] sm:$0xf] %vm965_vm8, %v924_v61  ;;  %v1357_v61 = vrot.slane %v1356_v45, 4  ;;  %v1383_v45 = vshll.u32 %v4873_v33, 16  ;;  %3520 = vmatpush.bf16.msra.mxu1 %v5468_v46  ;;  %5477 = vmatpush.bf16.msra.mxu3 %v5468_v46 }
 0x10b   :  { %1629 = vrot.lane.b32.xlu1 %v1266_v36, %s5519_s13  ;;  %v1370_v36 = vor.u32 %v1369_v7, %v1366_v19  ;;  %v1421_v19 = vshll.u32 %v4878_v4, 16  ;;  %v1425_v7 = vshrl.u32 %v4878_v4, 16 }
 0x10c   :  { %1627 = vrot.lane.b32.xlu0 %v1256_v50, %s5519_s13  ;;  %v6526_v50 = vrot.slane %v1397_v32, 5  ;;  %v1362_v18 = vsel %vm5566_vm2, %v1357_v61, %v1361_v62  ;;  %v1385_v58 = vrot.slane %v1383_v45, 5  ;;  %v1414_v61 = vrot.slane %v1412_v52, 4  ;;  %v5052_v62 = vld [vmem:[%s8167_s0 + $0x28] sm:$0xf] }
 0x10d   :  { %v916_v60 = vpop.permute.xlu1 %915  ;;  %v1371_v28 = vrot.slane %v1370_v36, 4  ;;  %v6575_v37 = vrot.slane %v1421_v19, 5  ;;  %v1427_v38 = vrot.slane %v1425_v7, 4  ;;  %v5053_v7 = vld [vmem:[%s8167_s0 + $0x2c] sm:$0x1] }
 0x10e   :  { %989 = vst.msk [vmem:[#allocation2 + $0xb8] sm:$0xf] %vm965_vm8, %v916_v60  ;;  %v914_v6 = vpop.permute.xlu0 %913  ;;  %v1404_v2 = vor.u32 %v1403_v51, %v6526_v50 }
 0x10f   :  { %988 = vst.msk [vmem:[#allocation2 + $0xb0] sm:$0xf] %vm965_vm8, %v914_v6  ;;  %1128 = vrot.lane.b32.xlu2 %v4855_v10, %s5518_s10  ;;  %v1376_v6 = vsel %vm5566_vm2, %v1371_v28, %v6529_v53  ;;  %v5048_v10 = vld [vmem:[%s8167_s0 + $0x18] sm:$0xe]  ;;  %v1415_v28 = vshll.u32 %v4877_v39, 16 }
 0x110   :  { %v5096_v17 = vrot.slane %v5048_v10, 9  ;;  %v1405_v22 = vrot.slane %v1404_v2, 4  ;;  %v4882_v39 = vld [vmem:[%s8167_s0 + $0x74] sm:$0x1] }
 0x111   :  { %v930_v26 = vpop.permute.xlu2 %929  ;;  %v1455_v46 = vshll.u32 %v4882_v39, 16 }
 0x112   :  { %996 = vst.msk [vmem:[#allocation2 + $0xf0] sm:$0xf] %vm965_vm8, %v930_v26  ;;  %v2950_v25 = vsel %vm5856_vm5, %v5096_v17, %v2949_v5  ;;  %v1379_v26 = vrot.slane %v1377_v49, 4  ;;  %v1410_v49 = vsel %vm5566_vm2, %v1405_v22, %v1409_v24  ;;  %v4930_v17 = vld [vmem:[%s8167_s0 + $0x74] sm:$0x1] }
 0x113   :  { %1635 = vrot.lane.b32.xlu1 %v1304_v8, %s5519_s13  ;;  %v1436_v8 = vshrl.u32 %v4880_v48, 16  ;;  %3091 = vst.msk [vmem:[#allocation2 + $0x4] sm:$0xf] %vm61_vm6, %v2950_v25  ;;  %v6607_v48 = vld [vmem:[%s8167_s0 + $0x70] sm:$0xf] }
 0x114   :  { %1633 = vrot.lane.b32.xlu0 %v1290_v16, %s5519_s13  ;;  %v1346_v16 = vor.u32 %v1345_v57, %v1342_v56  ;;  %v6610_v56 = vrot.slane %v1445_v43, 5  ;;  %v1910_v4 = vrot.slane %v6607_v48, 5  ;;  %v4928_v25 = vld [vmem:[%s8167_s0 + $0x6c] sm:$0xe] }
 0x115   :  { %v922_v30 = vpop.permute.xlu1 %921  ;;  %v1438_v29 = vrot.slane %v1436_v8, 4  ;;  %v5051_v8 = vld [vmem:[%s8167_s0 + $0x24] sm:$0xe] }
 0x116   :  { %992 = vst.msk [vmem:[#allocation2 + $0xd0] sm:$0xf] %vm965_vm8, %v922_v30  ;;  %v920_v40 = vpop.permute.xlu0 %919  ;;  %v1441_v30 = vrot.slane %v1439_v9, 5  ;;  %v1347_v32 = vrot.slane %v1346_v16, 4  ;;  %v2956_v9 = vrot.slane %v5052_v62, 5  ;;  %v5097_v21 = vrot.slane %v5051_v8, 9 }
 0x117   :  { %991 = vst.msk [vmem:[#allocation2 + $0xc8] sm:$0xf] %vm965_vm8, %v920_v40  ;;  %1631 = vrot.lane.b32.xlu2 %v1280_v42, %s5519_s13  ;;  %v2953_v40 = vsel %vm5856_vm5, %v2951_v27, %v2952_v15  ;;  %v4879_v42 = vld [vmem:[%s8167_s0 + $0x68] sm:$0x1]  ;;  %v6652_v15 = vld [vmem:[%s8167_s0 + $0x7c] sm:$0xf] }
 0x118   :  { %v1442_v34 = vor.u32 %v1441_v30, %v1438_v29  ;;  %v1352_v51 = vsel %vm5566_vm2, %v1347_v32, %v6502_v31  ;;  %3092 = vst.msk [vmem:[#allocation2 + $0xc] sm:$0xf] %vm61_vm6, %v2953_v40  ;;  %v1431_v54 = vshll.u32 %v4879_v42, 16  ;;  %v2958_v22 = vrot.slane %v2956_v9, 4  ;;  %v5056_v62 = vld [vmem:[%s8167_s0 + $0x38] sm:$0x1] }
 0x119   :  { %v1069_v63 = vpop.permute.xlu2 %1068  ;;  %v2957_v27 = vsel %vm5856_vm5, %v5097_v21, %v2956_v9  ;;  %v1912_v30 = vrot.slane %v1910_v4, 4  ;;  %v2540_v42 = vshll.u32 %v6652_v15, 16 }
 0x11a   :  { %1164 = vst.msk [vmem:[#allocation2 + $0x8] sm:$0xf] %vm1162_vm9, %v1069_v63  ;;  %v1443_v31 = vrot.slane %v1442_v34, 4  ;;  %v1433_v2 = vrot.slane %v1431_v54, 5  ;;  %v5428_v5 = vld [vmem:[#allocation2 + $0x4] sm:$0xf] }
 0x11b   :  { %1641 = vrot.lane.b32.xlu1 %v1338_v41, %s5519_s13  ;;  %v1395_v41 = vrot.slane %v1394_v23, 4  ;;  %v2959_v23 = vrot.slane %v5053_v7, 5  ;;  %3093 = vst.msk [vmem:[#allocation2 + $0x14] sm:$0xf] %vm61_vm6, %v2957_v27  ;;  %v1457_v54 = vrot.slane %v1455_v46, 5 }
 0x11c   :  { %1639 = vrot.lane.b32.xlu0 %v1328_v44, %s5519_s13  ;;  %v1380_v44 = vor.u32 %v1379_v26, %v6529_v53  ;;  %v1428_v53 = vor.u32 %v1427_v38, %v6575_v37  ;;  %v1448_v10 = vsel %vm5566_vm2, %v1443_v31, %v6610_v56  ;;  %v1913_v26 = vrot.slane %v4930_v17, 5  ;;  %v4884_v17 = vld [vmem:[%s8167_s0 + $0x7c] sm:$0xf]  ;;  %v4885_v46 = vld [vmem:[%s8167_s0 + $0x80] sm:$0x1] }
 0x11d   :  { %v928_v60 = vpop.permute.xlu1 %927  ;;  %v1400_v55 = vsel %vm5566_vm2, %v1395_v41, %v6526_v50  ;;  %v1417_v50 = vrot.slane %v1415_v28, 5  ;;  %v2960_v24 = vsel %vm5856_vm5, %v2958_v22, %v2959_v23  ;;  %v4960_v41 = vrot.slane %v4928_v25, 9  ;;  %v6730_v7 = vld [vmem:[%s8167_s0 + $0x1c] sm:$0xf]  ;;  %v5026_v25 = vld [vmem:[%s8167_s0 + $0x80] sm:$0x1] }
 0x11e   :  { %995 = vst.msk [vmem:[#allocation2 + $0xe8] sm:$0xf] %vm965_vm8, %v928_v60  ;;  %v926_v12 = vpop.permute.xlu0 %925  ;;  %v1381_v57 = vrot.slane %v1380_v44, 4  ;;  %v5024_v60 = vld [vmem:[%s8167_s0 + $0x78] sm:$0xf]  ;;  %v1429_v1 = vrot.slane %v1428_v53, 4  ;;  %v1914_v40 = vsel %vm5856_vm5, %v1912_v30, %v1913_v26 }
 0x11f   :  { %994 = vst.msk [vmem:[#allocation2 + $0xe0] sm:$0xf] %vm965_vm8, %v926_v12  ;;  %1637 = vrot.lane.b32.xlu2 %v1314_v14, %s5519_s13  ;;  %v2534_v13 = vshll.u32 %v5024_v60, 16  ;;  %v5116_v14 = vld [vmem:[#allocation2 + $0x8] sm:$0xf0]  ;;  %v6679_v28 = vrot.slane %v2540_v42, 5 }
 0x120   :  { %v1386_v12 = vsel %vm5566_vm2, %v1381_v57, %v1385_v58  ;;  %v5119_v19 = vor.u32 %v5428_v5, %v5116_v14  ;;  %v1434_v29 = vsel %vm5566_vm2, %v1429_v1, %v1433_v2  ;;  %3094 = vst.msk [vmem:[#allocation2 + $0x1c] sm:$0xf] %vm61_vm6, %v2960_v24  ;;  %v4906_v57 = vld [vmem:[%s8167_s0 + $0x14] sm:$0x1]  ;;  %v2966_v2 = vrot.slane %v5056_v62, 5 }
 0x121   :  { %v1075_v36 = vpop.permute.xlu2 %1074  ;;  %v2536_v32 = vrot.slane %v2534_v13, 5  ;;  %v2544_v5 = vshrl.u32 %v6652_v15, 16  ;;  %v1857_v13 = vrot.slane %v4906_v57, 5  ;;  %v1469_v27 = vshll.u32 %v4884_v17, 16  ;;  %v4883_v30 = vld [vmem:[%s8167_s0 + $0x78] sm:$0xf] }
 0x122   :  { %1167 = vst.msk [vmem:[#allocation2 + $0x20] sm:$0xf] %vm1162_vm9, %v1075_v36  ;;  %5276 = vmatmul.msk.bf16.vlgmr.msra.gmra.mxu1 %vm3375_vm10, %v5119_v19  ;;  %v4904_v19 = vld [vmem:[%s8167_s0 + $0xc] sm:$0xe]  ;;  %v2348_v24 = vshll.u32 %v6730_v7, 16  ;;  %v1463_v39 = vshll.u32 %v4883_v30, 16 }
 0x123   :  { %1647 = vrot.lane.b32.xlu1 %v1376_v6, %s5519_s13  ;;  %v2531_v6 = vshrl.u32 %v5024_v60, 16  ;;  %v2546_v21 = vrot.slane %v2544_v5, 4  ;;  %v4952_v26 = vrot.slane %v4904_v19, 9  ;;  %v1479_v57 = vshll.u32 %v4885_v46, 16 }
 0x124   :  { %1645 = vrot.lane.b32.xlu0 %v1362_v18, %s5519_s13  ;;  %v1418_v18 = vor.u32 %v1417_v50, %v1414_v61  ;;  %v5054_v50 = vld [vmem:[%s8167_s0 + $0x30] sm:$0xe] }
 0x125   :  { %v1067_v35 = vpop.permute.xlu1 %1066  ;;  %v2533_v11 = vrot.slane %v2531_v6, 4 }
 0x126   :  { %1163 = vst.msk [vmem:[#allocation2] sm:$0xf] %vm1162_vm9, %v1067_v35  ;;  %v932_v47 = vpop.permute.xlu0 %931  ;;  %v1419_v33 = vrot.slane %v1418_v18, 4  ;;  %v1451_v35 = vrot.slane %v1449_v0, 4  ;;  %v5098_v0 = vrot.slane %v5054_v50, 9 }
 0x127   :  { %997 = vst.msk [vmem:[#allocation2 + $0xf8] sm:$0xf] %vm965_vm8, %v932_v47  ;;  %1643 = vrot.lane.b32.xlu2 %v1352_v51, %s5519_s13  ;;  %v2537_v43 = vor.u32 %v2536_v32, %v2533_v11  ;;  %v5000_v47 = vld [vmem:[%s8167_s0 + $0x18] sm:$0xf]  ;;  %v5430_v51 = vld [vmem:[#allocation2 + $0x14] sm:$0xf] }
 0x128   :  { %v1424_v44 = vsel %vm5566_vm2, %v1419_v33, %v6575_v37  ;;  %v1452_v45 = vor.u32 %v1451_v35, %v6610_v56  ;;  %v5124_v52 = vld [vmem:[#allocation2 + $0x18] sm:$0xf0]  ;;  %v6687_v56 = vld [vmem:[%s8167_s0 + $0x10] sm:$0xf]  ;;  %v2339_v58 = vshrl.u32 %v5000_v47, 16  ;;  %v2547_v35 = vor.u32 %v2546_v21, %v6679_v28 }
 0x129   :  { %v1081_v3 = vpop.permute.xlu2 %1080  ;;  %v2538_v37 = vrot.slane %v2537_v43, 4  ;;  %v5127_v61 = vor.u32 %v5430_v51, %v5124_v52  ;;  %v1854_v6 = vrot.slane %v6687_v56, 5  ;;  %v4984_v33 = vld [vmem:[%s8167_s0 + $0x78] sm:$0xf]  ;;  %v6754_v43 = vrot.slane %v2348_v24, 5 }
 0x12a   :  { %1170 = vst.msk [vmem:[#allocation2 + $0x38] sm:$0xf] %vm1162_vm9, %v1081_v3  ;;  %v1453_v53 = vrot.slane %v1452_v45, 4  ;;  %v2341_v14 = vrot.slane %v2339_v58, 4  ;;  %v5058_v51 = vld [vmem:[%s8167_s0 + $0x40] sm:$0xf] }
 0x12b   :  { %1653 = vrot.lane.b32.xlu1 %v1410_v49, %s5519_s13  ;;  %v1911_v49 = vsel %vm5856_vm5, %v4960_v41, %v1910_v4  ;;  %v2543_v4 = vsel %vm5566_vm2, %v2538_v37, %v6679_v28  ;;  %v1856_v18 = vrot.slane %v1854_v6, 4  ;;  %v1855_v42 = vsel %vm5856_vm5, %v4952_v26, %v1854_v6  ;;  %v5059_v56 = vld [vmem:[%s8167_s0 + $0x44] sm:$0x1] }
 0x12c   :  { %1651 = vrot.lane.b32.xlu0 %v1400_v55, %s5519_s13  ;;  %v5055_v55 = vld [vmem:[%s8167_s0 + $0x34] sm:$0xf]  ;;  %v1458_v8 = vsel %vm5566_vm2, %v1453_v53, %v1457_v54  ;;  %v1465_v53 = vrot.slane %v1463_v39, 5  ;;  %v2970_v54 = vrot.slane %v5058_v51, 5  ;;  %v1481_v6 = vrot.slane %v1479_v57, 5 }
 0x12d   :  { %v1073_v63 = vpop.permute.xlu1 %1072  ;;  %v2963_v60 = vrot.slane %v5055_v55, 5  ;;  %v1858_v32 = vsel %vm5856_vm5, %v1856_v18, %v1857_v13  ;;  %v5002_v13 = vld [vmem:[%s8167_s0 + $0x20] sm:$0x1]  ;;  %v5027_v18 = vld [vmem:[%s8167_s0 + $0x84] sm:$0xf] }
 0x12e   :  { %1166 = vst.msk [vmem:[#allocation2 + $0x18] sm:$0xf] %vm1162_vm9, %v1073_v63  ;;  %v1071_v16 = vpop.permute.xlu0 %1070  ;;  %v2342_v63 = vshll.u32 %v5000_v47, 16  ;;  %v2548_v47 = vrot.slane %v2547_v35, 4  ;;  %v2555_v26 = vshrl.u32 %v5027_v18, 16 }
 0x12f   :  { %1165 = vst.msk [vmem:[#allocation2 + $0x10] sm:$0xf] %vm1162_vm9, %v1071_v16  ;;  %1649 = vrot.lane.b32.xlu2 %v1386_v12, %s5519_s13  ;;  %v2965_v1 = vrot.slane %v2963_v60, 4  ;;  %v2964_v9 = vsel %vm5856_vm5, %v5098_v0, %v2963_v60  ;;  %v4985_v12 = vld [vmem:[%s8167_s0 + $0x7c] sm:$0xf]  ;;  %v2972_v60 = vrot.slane %v2970_v54, 4 }
 0x130   :  { %3095 = vst.msk [vmem:[#allocation2 + $0x24] sm:$0xf] %vm61_vm6, %v2964_v9  ;;  %v2344_v16 = vrot.slane %v2342_v63, 5  ;;  %v2352_v63 = vshrl.u32 %v6730_v7, 16  ;;  %v4968_v7 = vld [vmem:[%s8167_s0 + $0x18] sm:$0xf] }
 0x131   :  { %v1087_v38 = vpop.permute.xlu2 %1086  ;;  %v4986_v51 = vld [vmem:[%s8167_s0 + $0x84] sm:$0xf]  ;;  %vm4689_vm8 = vsmask.f32 256 }
 0x132   :  { %1173 = vst.msk [vmem:[#allocation2 + $0x50] sm:$0xf] %vm1162_vm9, %v1087_v38  ;;  %5277 = vmatmul.msk.bf16.gmra.mxu1 %vm3375_vm10, %v5127_v61  ;;  %v2345_v15 = vor.u32 %v2344_v16, %v2341_v14  ;;  %v1460_v38 = vshrl.u32 %v4883_v30, 16  ;;  %v2973_v61 = vrot.slane %v5059_v56, 5 }
 0x133   :  { %1659 = vrot.lane.b32.xlu1 %v1448_v10, %s5519_s13  ;;  %v2967_v10 = vsel %vm5856_vm5, %v2965_v1, %v2966_v2 }
 0x134   :  { %1657 = vrot.lane.b32.xlu0 %v1434_v29, %s5519_s13  ;;  %3096 = vst.msk [vmem:[#allocation2 + $0x2c] sm:$0xf] %vm61_vm6, %v2967_v10  ;;  %v1473_v29 = vshrl.u32 %v4884_v17, 16  ;;  %v1462_v28 = vrot.slane %v1460_v38, 4  ;;  %v2974_v2 = vsel %vm5856_vm5, %v2972_v60, %v2973_v61  ;;  %v6806_v17 = vld [vmem:[%s8167_s0 + $0x7c] sm:$0xf] }
 0x135   :  { %v1079_v36 = vpop.permute.xlu1 %1078  ;;  %3098 = vst.msk [vmem:[#allocation2 + $0x3c] sm:$0xf] %vm61_vm6, %v2974_v2  ;;  %v5061_v38 = vld [vmem:[%s8167_s0 + $0x4c] sm:$0xf]  ;;  %v6870_v2 = vld [vmem:[%s8167_s0 + $0x1c] sm:$0xf] }
 0x136   :  { %1169 = vst.msk [vmem:[#allocation2 + $0x30] sm:$0xf] %vm1162_vm9, %v1079_v36  ;;  %v1077_v34 = vpop.permute.xlu0 %1076  ;;  %v2550_v36 = vshll.u32 %v5026_v25, 16  ;;  %v1475_v41 = vrot.slane %v1473_v29, 4  ;;  %v2358_v25 = vshll.u32 %v5002_v13, 16  ;;  %v1917_v29 = vrot.slane %v6806_v17, 5 }
 0x137   :  { %1168 = vst.msk [vmem:[#allocation2 + $0x28] sm:$0xf] %vm1162_vm9, %v1077_v34  ;;  %1655 = vrot.lane.b32.xlu2 %v1424_v44, %s5519_s13  ;;  %v2346_v34 = vrot.slane %v2345_v15, 4  ;;  %v5432_v44 = vld [vmem:[#allocation2 + $0x24] sm:$0xf]  ;;  %v2558_v15 = vshll.u32 %v5027_v18, 16 }
 0x138   :  { %v4909_v13 = vld [vmem:[%s8167_s0 + $0x20] sm:$0x1] }
 0x139   :  { %v1093_v31 = vpop.permute.xlu2 %1092  ;;  %v2351_v62 = vsel %vm5566_vm2, %v2346_v34, %v6754_v43  ;;  %v1919_v34 = vrot.slane %v1917_v29, 4  ;;  %v2560_v46 = vrot.slane %v2558_v15, 5 }
 0x13a   :  { %1176 = vst.msk [vmem:[#allocation2 + $0x68] sm:$0xf] %vm1162_vm9, %v1093_v31  ;;  %v5057_v31 = vld [vmem:[%s8167_s0 + $0x3c] sm:$0xe] }
 0x13b   :  { %1998 = vrot.lane.b32.xlu1 %v1914_v40, %s5520_s23  ;;  %v6749_v40 = vrot.slane %v1469_v27, 5  ;;  %v5132_v45 = vld [vmem:[#allocation2 + $0x28] sm:$0xf0]  ;;  %v5099_v58 = vrot.slane %v5057_v31, 9  ;;  %v4933_v27 = vld [vmem:[%s8167_s0 + $0x80] sm:$0x1] }
 0x13c   :  { %1996 = vrot.lane.b32.xlu0 %v1911_v49, %s5520_s23  ;;  %v2552_v49 = vrot.slane %v2550_v36, 5  ;;  %v2360_v36 = vrot.slane %v2358_v25, 5 }
 0x13d   :  { %v1085_v48 = vpop.permute.xlu1 %1084  ;;  %v1476_v55 = vor.u32 %v1475_v41, %v6749_v40  ;;  %v2971_v1 = vsel %vm5856_vm5, %v5099_v58, %v2970_v54 }
 0x13e   :  { %1172 = vst.msk [vmem:[#allocation2 + $0x48] sm:$0xf] %vm1162_vm9, %v1085_v48  ;;  %v1083_v3 = vpop.permute.xlu0 %1082  ;;  %v5135_v48 = vor.u32 %v5432_v44, %v5132_v45  ;;  %v2553_v0 = vsel %vm5566_vm2, %v2548_v47, %v2552_v49  ;;  %v2557_v45 = vrot.slane %v2555_v26, 4  ;;  %v5060_v47 = vld [vmem:[%s8167_s0 + $0x48] sm:$0xe] }
 0x13f   :  { %1171 = vst.msk [vmem:[#allocation2 + $0x40] sm:$0xf] %vm1162_vm9, %v1083_v3  ;;  %1661 = vrot.lane.b32.xlu2 %v1458_v8, %s5519_s13  ;;  %v1466_v3 = vor.u32 %v1465_v53, %v1462_v28  ;;  %v1477_v5 = vrot.slane %v1476_v55, 4  ;;  %v2354_v8 = vrot.slane %v2352_v63, 4  ;;  %v5062_v53 = vld [vmem:[%s8167_s0 + $0x50] sm:$0x1] }
 0x140   :  { %3097 = vst.msk [vmem:[#allocation2 + $0x34] sm:$0xf] %vm61_vm6, %v2971_v1  ;;  %v5100_v54 = vrot.slane %v5060_v47, 9  ;;  %v4931_v55 = vld [vmem:[%s8167_s0 + $0x78] sm:$0xe]  ;;  %v2561_v57 = vor.u32 %v2560_v46, %v2557_v45  ;;  %v2980_v58 = vrot.slane %v5062_v53, 5 }
 0x141   :  { %v1099_v23 = vpop.permute.xlu2 %1098  ;;  %v1467_v14 = vrot.slane %v1466_v3, 4  ;;  %v1482_v16 = vsel %vm5566_vm2, %v1477_v5, %v1481_v6 }
 0x142   :  { %1179 = vst.msk [vmem:[#allocation2 + $0x80] sm:$0xf] %vm1162_vm9, %v1099_v23  ;;  %5278 = vmatmul.msk.bf16.gmra.mxu1 %vm3375_vm10, %v5135_v48  ;;  %v2355_v23 = vor.u32 %v2354_v8, %v6754_v43  ;;  %v1920_v43 = vrot.slane %v4933_v27, 5  ;;  %v2562_v3 = vrot.slane %v2561_v57, 4  ;;  %v5005_v27 = vld [vmem:[%s8167_s0 + $0x2c] sm:$0x1] }
 0x143   :  { %2754 = vrot.lane.b32.xlu1 %v2543_v4, %s5521_s9  ;;  %v4969_v4 = vld [vmem:[%s8167_s0 + $0x1c] sm:$0xf]  ;;  %v1472_v30 = vsel %vm5566_vm2, %v1467_v14, %v6749_v40  ;;  %v5029_v40 = vld [vmem:[%s8167_s0 + $0x8c] sm:$0x1] }
 0x144   :  { %2195 = vrot.lane.b32.xlu0 %v4985_v12, %s5522_s19  ;;  %v5028_v12 = vld [vmem:[%s8167_s0 + $0x88] sm:$0xf]  ;;  %v2356_v35 = vrot.slane %v2355_v23, 4  ;;  %v1921_v56 = vsel %vm5856_vm5, %v1919_v34, %v1920_v43  ;;  %v1864_v23 = vrot.slane %v4909_v13, 5  ;;  %v5031_v13 = vld [vmem:[%s8167_s0 + $0x94] sm:$0xf] }
 0x145   :  { %v1091_v22 = vpop.permute.xlu1 %1090  ;;  %v2564_v21 = vshll.u32 %v5028_v12, 16 }
 0x146   :  { %1175 = vst.msk [vmem:[#allocation2 + $0x60] sm:$0xf] %vm1162_vm9, %v1091_v22  ;;  %v1089_v11 = vpop.permute.xlu0 %1088  ;;  %v2568_v22 = vshrl.u32 %v5028_v12, 16  ;;  %v2361_v28 = vsel %vm5566_vm2, %v2356_v35, %v2360_v36  ;;  %v1861_v12 = vrot.slane %v6870_v2, 5  ;;  %v2382_v36 = vshll.u32 %v5005_v27, 16  ;;  %v5467_v27 = vld [vmem:[%s8168_s1 + $0x38] sm:$0xff] }
 0x147   :  { %1174 = vst.msk [vmem:[#allocation2 + $0x58] sm:$0xf] %vm1162_vm9, %v1089_v11  ;;  %2193 = vrot.lane.b32.xlu2 %v4984_v33, %s5522_s19  ;;  %v5434_v24 = vld [vmem:[#allocation2 + $0x34] sm:$0xf]  ;;  %v5140_v11 = vld [vmem:[#allocation2 + $0x38] sm:$0xf0]  ;;  %5469 = vmatpush.bf16.msra.mxu2 %v5467_v27 }
 0x148   :  { %v2570_v33 = vrot.slane %v2568_v22, 4  ;;  %v5143_v44 = vor.u32 %v5434_v24, %v5140_v11  ;;  %v1863_v22 = vrot.slane %v1861_v12, 4  ;;  %v4887_v24 = vld [vmem:[%s8167_s0 + $0x88] sm:$0xf]  ;;  %3424 = vmatpush.bf16.msra.mxu0 %v5467_v27  ;;  %v5071_v27 = vld [vmem:[%s8167_s0 + $0x74] sm:$0x1] }
 0x149   :  { %v1105_v37 = vpop.permute.xlu2 %1104  ;;  %v1493_v43 = vshll.u32 %v4887_v24, 16  ;;  %v1497_v45 = vshrl.u32 %v4887_v24, 16 }
 0x14a   :  { %1182 = vst.msk [vmem:[#allocation2 + $0x98] sm:$0xf] %vm1162_vm9, %v1105_v37  ;;  %v2574_v37 = vshll.u32 %v5029_v40, 16  ;;  %v4907_v40 = vld [vmem:[%s8167_s0 + $0x18] sm:$0xe] }
 0x14b   :  { %1966 = vrot.lane.b32.xlu1 %v1858_v32, %s5520_s23  ;;  %v6825_v32 = vrot.slane %v2564_v21, 5 }
 0x14c   :  { %1964 = vrot.lane.b32.xlu0 %v1855_v42, %s5520_s23  ;;  %v2977_v42 = vrot.slane %v5061_v38, 5  ;;  %v2576_v61 = vrot.slane %v2574_v37, 5  ;;  %v4987_v38 = vld [vmem:[%s8167_s0 + $0x88] sm:$0xf]  ;;  %v4953_v37 = vrot.slane %v4907_v40, 9 }
 0x14d   :  { %v1097_v52 = vpop.permute.xlu1 %1096  ;;  %v2567_v17 = vsel %vm5566_vm2, %v2562_v3, %v6825_v32  ;;  %v4989_v40 = vld [vmem:[%s8167_s0 + $0x94] sm:$0xf] }
 0x14e   :  { %1178 = vst.msk [vmem:[#allocation2 + $0x78] sm:$0xf] %vm1162_vm9, %v1097_v52  ;;  %v1095_v50 = vpop.permute.xlu0 %1094  ;;  %v2571_v52 = vor.u32 %v2570_v33, %v6825_v32  ;;  %v2979_v48 = vrot.slane %v2977_v42, 4  ;;  %v2978_v31 = vsel %vm5856_vm5, %v5100_v54, %v2977_v42  ;;  %v1865_v42 = vsel %vm5856_vm5, %v1863_v22, %v1864_v23  ;;  %v4886_v54 = vld [vmem:[%s8167_s0 + $0x84] sm:$0xf] }
 0x14f   :  { %1177 = vst.msk [vmem:[#allocation2 + $0x70] sm:$0xf] %vm1162_vm9, %v1095_v50  ;;  %2756 = vrot.lane.b32.xlu2 %v2553_v0, %s5521_s9  ;;  %v4961_v50 = vrot.slane %v4931_v55, 9  ;;  %v5004_v0 = vld [vmem:[%s8167_s0 + $0x28] sm:$0xf]  ;;  %v2588_v23 = vshll.u32 %v5031_v13, 16 }
 0x150   :  { %3099 = vst.msk [vmem:[#allocation2 + $0x44] sm:$0xf] %vm61_vm6, %v2978_v31  ;;  %v2572_v60 = vrot.slane %v2571_v52, 4  ;;  %v2981_v1 = vsel %vm5856_vm5, %v2979_v48, %v2980_v58  ;;  %v2384_v52 = vrot.slane %v2382_v36, 5  ;;  %v6937_v31 = vrot.slane %v1493_v43, 5 }
 0x151   :  { %v1111_v10 = vpop.permute.xlu2 %1110  ;;  %v1918_v8 = vsel %vm5856_vm5, %v4961_v50, %v1917_v29  ;;  %3100 = vst.msk [vmem:[#allocation2 + $0x4c] sm:$0xf] %vm61_vm6, %v2981_v1  ;;  %v1862_v50 = vsel %vm5856_vm5, %v4953_v37, %v1861_v12  ;;  %v6958_v1 = vld [vmem:[%s8167_s0 + $0x88] sm:$0xf]  ;;  %v5066_v22 = vld [vmem:[%s8167_s0 + $0x60] sm:$0xe] }
 0x152   :  { %1185 = vst.msk [vmem:[#allocation2 + $0xb0] sm:$0xf] %vm1162_vm9, %v1111_v10  ;;  %5279 = vmatmul.msk.bf16.gmra.mxu1 %vm3375_vm10, %v5143_v44  ;;  %v2577_v6 = vsel %vm5566_vm2, %v2572_v60, %v2576_v61  ;;  %v2376_v10 = vshrl.u32 %v5004_v0, 16  ;;  %v5065_v44 = vld [vmem:[%s8167_s0 + $0x5c] sm:$0x1] }
 0x153   :  { %2722 = vrot.lane.b32.xlu1 %v2351_v62, %s5521_s9  ;;  %v4888_v61 = vld [vmem:[%s8167_s0 + $0x8c] sm:$0x1] }
 0x154   :  { %2163 = vrot.lane.b32.xlu0 %v4969_v4, %s5522_s19  ;;  %v5003_v4 = vld [vmem:[%s8167_s0 + $0x24] sm:$0xf] }
 0x155   :  { %v1103_v9 = vpop.permute.xlu1 %1102  ;;  %v2363_v14 = vshrl.u32 %v5003_v4, 16 }
 0x156   :  { %1181 = vst.msk [vmem:[#allocation2 + $0x90] sm:$0xf] %vm1162_vm9, %v1103_v9  ;;  %v1101_v19 = vpop.permute.xlu0 %1100  ;;  %v2372_v9 = vshll.u32 %v5004_v0, 16  ;;  %v4934_v0 = vld [vmem:[%s8167_s0 + $0x84] sm:$0xe] }
 0x157   :  { %1180 = vst.msk [vmem:[#allocation2 + $0x88] sm:$0xf] %vm1162_vm9, %v1101_v19  ;;  %2161 = vrot.lane.b32.xlu2 %v4968_v7, %s5522_s19  ;;  %v2378_v19 = vrot.slane %v2376_v10, 4  ;;  %v5064_v7 = vld [vmem:[%s8167_s0 + $0x58] sm:$0xf]  ;;  %v2365_v26 = vrot.slane %v2363_v14, 4 }
 0x158   :  { %v6891_v18 = vrot.slane %v2372_v9, 5  ;;  %v5436_v29 = vld [vmem:[#allocation2 + $0x44] sm:$0xf]  ;;  %v5148_v11 = vld [vmem:[#allocation2 + $0x48] sm:$0xf0]  ;;  %v2984_v32 = vrot.slane %v5064_v7, 5 }
 0x159   :  { %v1117_v41 = vpop.permute.xlu2 %1116  ;;  %v4971_v7 = vld [vmem:[%s8167_s0 + $0x28] sm:$0xf] }
 0x15a   :  { %1188 = vst.msk [vmem:[#allocation2 + $0xc8] sm:$0xf] %vm1162_vm9, %v1117_v41  ;;  %v2379_v35 = vor.u32 %v2378_v19, %v6891_v18  ;;  %v5063_v41 = vld [vmem:[%s8167_s0 + $0x54] sm:$0xe]  ;;  %v2986_v47 = vrot.slane %v2984_v32, 4 }
 0x15b   :  { %1665 = vrot.lane.b32.xlu1 %v1482_v16, %s5519_s13  ;;  %v2366_v16 = vshll.u32 %v5003_v4, 16  ;;  %v5101_v46 = vrot.slane %v5063_v41, 9  ;;  %v1503_v4 = vshll.u32 %v4888_v61, 16 }
 0x15c   :  { %1663 = vrot.lane.b32.xlu0 %v1472_v30, %s5519_s13  ;;  %v4970_v30 = vld [vmem:[%s8167_s0 + $0x24] sm:$0xf] }
 0x15d   :  { %v1109_v39 = vpop.permute.xlu1 %1108  ;;  %v2368_v15 = vrot.slane %v2366_v16, 5  ;;  %v2985_v55 = vsel %vm5856_vm5, %v5101_v46, %v2984_v32  ;;  %v1505_v16 = vrot.slane %v1503_v4, 5  ;;  %v5102_v32 = vrot.slane %v5066_v22, 9  ;;  %v5466_v46 = vld [vmem:[%s8168_s1 + $0x30] sm:$0xff] }
 0x15e   :  { %1184 = vst.msk [vmem:[#allocation2 + $0xa8] sm:$0xf] %vm1162_vm9, %v1109_v39  ;;  %v1107_v49 = vpop.permute.xlu0 %1106  ;;  %v5151_v39 = vor.u32 %v5436_v29, %v5148_v11  ;;  %v2592_v29 = vshrl.u32 %v5031_v13, 16  ;;  %5470 = vmatpush.bf16.msra.mxu2 %v5466_v46  ;;  %3425 = vmatpush.bf16.msra.mxu0 %v5466_v46 }
 0x15f   :  { %1183 = vst.msk [vmem:[#allocation2 + $0xa0] sm:$0xf] %vm1162_vm9, %v1107_v49  ;;  %2724 = vrot.lane.b32.xlu2 %v2361_v28, %s5521_s9  ;;  %v2369_v34 = vor.u32 %v2368_v15, %v2365_v26  ;;  %v2987_v49 = vrot.slane %v5065_v44, 5  ;;  %v5067_v26 = vld [vmem:[%s8167_s0 + $0x64] sm:$0xf] }
 0x160   :  { %3101 = vst.msk [vmem:[#allocation2 + $0x54] sm:$0xf] %vm61_vm6, %v2985_v55  ;;  %v5068_v15 = vld [vmem:[%s8167_s0 + $0x68] sm:$0x1] }
 0x161   :  { %v1123_v63 = vpop.permute.xlu2 %1122  ;;  %v2370_v48 = vrot.slane %v2369_v34, 4  ;;  %v2988_v57 = vsel %vm5856_vm5, %v2986_v47, %v2987_v49  ;;  %v2994_v41 = vrot.slane %v5068_v15, 5  ;;  %v2594_v34 = vrot.slane %v2592_v29, 4  ;;  %v7024_v49 = vld [vmem:[%s8167_s0 + $0x28] sm:$0xf] }
 0x162   :  { %1191 = vst.msk [vmem:[#allocation2 + $0xe0] sm:$0xf] %vm1162_vm9, %v1123_v63  ;;  %5280 = vmatmul.msk.bf16.gmra.mxu1 %vm3375_vm10, %v5151_v39  ;;  %v1487_v63 = vshll.u32 %v4886_v54, 16  ;;  %v5030_v39 = vld [vmem:[%s8167_s0 + $0x90] sm:$0xf] }
 0x163   :  { %2197 = vrot.lane.b32.xlu1 %v4986_v51, %s5522_s19  ;;  %v2380_v51 = vrot.slane %v2379_v35, 4  ;;  %3102 = vst.msk [vmem:[#allocation2 + $0x5c] sm:$0xf] %vm61_vm6, %v2988_v57  ;;  %v2375_v2 = vsel %vm5566_vm2, %v2370_v48, %v6891_v18  ;;  %v2582_v37 = vshll.u32 %v5030_v39, 16  ;;  %v1868_v57 = vrot.slane %v7024_v49, 5 }
 0x164   :  { %2002 = vrot.lane.b32.xlu0 %v1921_v56, %s5520_s23  ;;  %v1499_v56 = vrot.slane %v1497_v45, 4  ;;  %v1489_v9 = vrot.slane %v1487_v63, 5  ;;  %v4910_v45 = vld [vmem:[%s8167_s0 + $0x24] sm:$0xe]  ;;  %v7087_v29 = vld [vmem:[%s8167_s0 + $0x94] sm:$0xf] }
 0x165   :  { %v1115_v62 = vpop.permute.xlu1 %1114  ;;  %v2385_v60 = vsel %vm5566_vm2, %v2380_v51, %v2384_v52  ;;  %v2579_v52 = vshrl.u32 %v5030_v39, 16  ;;  %v2584_v63 = vrot.slane %v2582_v37, 5  ;;  %v4912_v37 = vld [vmem:[%s8167_s0 + $0x2c] sm:$0x1]  ;;  %v5073_v49 = vld [vmem:[%s8167_s0 + $0x7c] sm:$0xf] }
 0x166   :  { %1187 = vst.msk [vmem:[#allocation2 + $0xc0] sm:$0xf] %vm1162_vm9, %v1115_v62  ;;  %v1113_v5 = vpop.permute.xlu0 %1112  ;;  %v1484_v62 = vshrl.u32 %v4886_v54, 16  ;;  %v1500_v3 = vor.u32 %v1499_v56, %v6937_v31  ;;  %v5465_v54 = vld [vmem:[%s8168_s1 + $0x28] sm:$0xff]  ;;  %v4954_v56 = vrot.slane %v4910_v45, 9  ;;  %v5462_v45 = vld [vmem:[%s8168_s1 + $0x10] sm:$0xff] }
 0x167   :  { %1186 = vst.msk [vmem:[#allocation2 + $0xb8] sm:$0xf] %vm1162_vm9, %v1113_v5  ;;  %2000 = vrot.lane.b32.xlu2 %v1918_v8, %s5520_s23  ;;  %v4962_v5 = vrot.slane %v4934_v0, 9  ;;  %5471 = vmatpush.bf16.msra.mxu2 %v5465_v54 }
 0x168   :  { %v1486_v8 = vrot.slane %v1484_v62, 4  ;;  %v1501_v14 = vrot.slane %v1500_v3, 4  ;;  %v2581_v62 = vrot.slane %v2579_v52, 4  ;;  %v5070_v3 = vld [vmem:[%s8167_s0 + $0x70] sm:$0xf]  ;;  %3426 = vmatpush.bf16.msra.mxu0 %v5465_v54 }
 0x169   :  { %v1129_v25 = vpop.permute.xlu2 %1128  ;;  %v7124_v54 = vld [vmem:[%s8167_s0 + $0x94] sm:$0xf] }
 0x16a   :  { %1194 = vst.msk [vmem:[#allocation2 + $0xf8] sm:$0xf] %vm1162_vm9, %v1129_v25  ;;  %v5156_v25 = vld [vmem:[#allocation2 + $0x58] sm:$0xf0]  ;;  %v1506_v24 = vsel %vm5566_vm2, %v1501_v14, %v1505_v16 }
 0x16b   :  { %2760 = vrot.lane.b32.xlu1 %v2577_v6, %s5521_s9  ;;  %v1924_v6 = vrot.slane %v6958_v1, 5 }
 0x16c   :  { %2758 = vrot.lane.b32.xlu0 %v2567_v17, %s5521_s9  ;;  %v5438_v17 = vld [vmem:[#allocation2 + $0x54] sm:$0xf] }
 0x16d   :  { %v1121_v21 = vpop.permute.xlu1 %1120  ;;  %v1925_v19 = vsel %vm5856_vm5, %v4962_v5, %v1924_v6 }
 0x16e   :  { %1190 = vst.msk [vmem:[#allocation2 + $0xd8] sm:$0xf] %vm1162_vm9, %v1121_v21  ;;  %v1119_v33 = vpop.permute.xlu0 %1118  ;;  %v1490_v21 = vor.u32 %v1489_v9, %v1486_v8  ;;  %v1869_v8 = vsel %vm5856_vm5, %v4954_v56, %v1868_v57 }
 0x16f   :  { %1189 = vst.msk [vmem:[#allocation2 + $0xd0] sm:$0xf] %vm1162_vm9, %v1119_v33  ;;  %2199 = vrot.lane.b32.xlu2 %v4987_v38, %s5522_s19  ;;  %v2991_v33 = vrot.slane %v5067_v26, 5  ;;  %v6999_v38 = vrot.slane %v2588_v23, 5  ;;  %v5463_v23 = vld [vmem:[%s8168_s1 + $0x18] sm:$0xff] }
 0x170   :  { %v1491_v11 = vrot.slane %v1490_v21, 4 }
 0x171   :  { %v1632_v53 = vpop.permute.xlu2 %1631  ;;  %v2992_v43 = vsel %vm5856_vm5, %v5102_v32, %v2991_v33  ;;  %v2993_v44 = vrot.slane %v2991_v33, 4  ;;  %v2595_v55 = vor.u32 %v2594_v34, %v6999_v38 }
 0x172   :  { %1726 = vst.msk [vmem:[#allocation2 + $0x10] sm:$0xf] %vm8171_vm11, %v1632_v53  ;;  %v1496_v51 = vsel %vm5566_vm2, %v1491_v11, %v6937_v31  ;;  %v4936_v53 = vld [vmem:[%s8167_s0 + $0x8c] sm:$0x1]  ;;  %v4988_v31 = vld [vmem:[%s8167_s0 + $0x90] sm:$0xf] }
 0x173   :  { %2165 = vrot.lane.b32.xlu1 %v4970_v30, %s5522_s19  ;;  %v5159_v30 = vor.u32 %v5438_v17, %v5156_v25  ;;  %3103 = vst.msk [vmem:[#allocation2 + $0x64] sm:$0xf] %vm61_vm6, %v2992_v43  ;;  %v1927_v61 = vrot.slane %v4936_v53, 5  ;;  %v2596_v1 = vrot.slane %v2595_v55, 4  ;;  %v2585_v17 = vor.u32 %v2584_v63, %v2581_v62  ;;  %v5069_v25 = vld [vmem:[%s8167_s0 + $0x6c] sm:$0xe] }
 0x174   :  { %1970 = vrot.lane.b32.xlu0 %v1865_v42, %s5520_s23  ;;  %v5032_v42 = vld [vmem:[%s8167_s0 + $0x98] sm:$0x1]  ;;  %v5103_v26 = vrot.slane %v5069_v25, 9  ;;  %v1517_v43 = vshll.u32 %v7087_v29, 16  ;;  %v1521_v55 = vshrl.u32 %v7087_v29, 16 }
 0x175   :  { %v1127_v28 = vpop.permute.xlu1 %1126  ;;  %5281 = vmatmul.msk.bf16.gmra.mxu1 %vm3375_vm10, %v5159_v30  ;;  %v2598_v48 = vshll.u32 %v5032_v42, 16  ;;  %v5008_v11 = vld [vmem:[%s8167_s0 + $0x38] sm:$0x1]  ;;  %v4973_v42 = vld [vmem:[%s8167_s0 + $0x34] sm:$0xf] }
 0x176   :  { %1193 = vst.msk [vmem:[#allocation2 + $0xf0] sm:$0xf] %vm1162_vm9, %v1127_v28  ;;  %v1125_v58 = vpop.permute.xlu0 %1124  ;;  %v2995_v28 = vsel %vm5856_vm5, %v2993_v44, %v2994_v41  ;;  %v5006_v41 = vld [vmem:[%s8167_s0 + $0x30] sm:$0xf]  ;;  %v2406_v44 = vshll.u32 %v5008_v11, 16 }
 0x177   :  { %1192 = vst.msk [vmem:[#allocation2 + $0xe8] sm:$0xf] %vm1162_vm9, %v1125_v58  ;;  %1968 = vrot.lane.b32.xlu2 %v1862_v50, %s5520_s23  ;;  %v4889_v58 = vld [vmem:[%s8167_s0 + $0x90] sm:$0xf]  ;;  %v5007_v50 = vld [vmem:[%s8167_s0 + $0x34] sm:$0xf] }
 0x178   :  { %3104 = vst.msk [vmem:[#allocation2 + $0x6c] sm:$0xf] %vm61_vm6, %v2995_v28  ;;  %v2600_v4 = vrot.slane %v2598_v48, 5  ;;  %v1508_v5 = vshrl.u32 %v4889_v58, 16  ;;  %v2396_v9 = vshll.u32 %v5007_v50, 16  ;;  %v2400_v16 = vshrl.u32 %v5007_v50, 16 }
 0x179   :  { %v1638_v12 = vpop.permute.xlu2 %1637  ;;  %v2387_v28 = vshrl.u32 %v5006_v41, 16  ;;  %v2390_v53 = vshll.u32 %v5006_v41, 16  ;;  %v5461_v48 = vld [vmem:[%s8168_s1 + $0x8] sm:$0xff]  ;;  %v2408_v62 = vrot.slane %v2406_v44, 5  ;;  %v4937_v29 = vld [vmem:[%s8167_s0 + $0x90] sm:$0xe] }
 0x17a   :  { %1729 = vst.msk [vmem:[#allocation2 + $0x28] sm:$0xf] %vm8171_vm11, %v1638_v12  ;;  %v5464_v12 = vld [vmem:[%s8168_s1 + $0x20] sm:$0xff]  ;;  %v1510_v21 = vrot.slane %v1508_v5, 4  ;;  %v7092_v32 = vrot.slane %v2396_v9, 5  ;;  %v2402_v33 = vrot.slane %v2400_v16, 4 }
 0x17b   :  { %2728 = vrot.lane.b32.xlu1 %v2385_v60, %s5521_s9  ;;  %v1926_v60 = vrot.slane %v1924_v6, 4  ;;  %v1511_v6 = vshll.u32 %v4889_v58, 16  ;;  %5472 = vmatpush.bf16.msra.mxu2 %v5464_v12  ;;  %v7138_v58 = vrot.slane %v1517_v43, 5  ;;  %v2389_v63 = vrot.slane %v2387_v28, 4  ;;  %v4891_v41 = vld [vmem:[%s8167_s0 + $0x98] sm:$0x1] }
 0x17c   :  { %2726 = vrot.lane.b32.xlu0 %v2375_v2, %s5521_s9  ;;  %3427 = vmatpush.bf16.msra.mxu0 %v5464_v12  ;;  %vm4699_vm9 = vcmask 1044480  }
 0x17d   :  { %v1630_v10 = vpop.permute.xlu1 %1629  ;;  %v1928_v14 = vsel %vm5856_vm5, %v1926_v60, %v1927_v61  ;;  %v1513_v30 = vrot.slane %v1511_v6, 5  ;;  %v1870_v60 = vrot.slane %v1868_v57, 4  ;;  %v1871_v61 = vrot.slane %v4912_v37, 5  ;;  %v5072_v57 = vld [vmem:[%s8167_s0 + $0x78] sm:$0xe] }
 0x17e   :  { %1725 = vst.msk [vmem:[#allocation2 + $0x8] sm:$0xf] %vm8171_vm11, %v1630_v10  ;;  %v1628_v18 = vpop.permute.xlu0 %1627  ;;  %v5440_v10 = vld [vmem:[#allocation2 + $0x64] sm:$0xf]  ;;  %v5074_v6 = vld [vmem:[%s8167_s0 + $0x80] sm:$0x1] }
 0x17f   :  { %1724 = vst.msk [vmem:[#allocation2] sm:$0xf] %vm8171_vm11, %v1628_v18  ;;  %2167 = vrot.lane.b32.xlu2 %v4971_v7, %s5522_s19  ;;  %v2998_v18 = vrot.slane %v5070_v3, 5  ;;  %v2601_v7 = vsel %vm5566_vm2, %v2596_v1, %v2600_v4  ;;  %5473 = vmatpush.bf16.msra.mxu2 %v5463_v23  ;;  %v1514_v34 = vor.u32 %v1513_v30, %v1510_v21  ;;  %v4939_v1 = vld [vmem:[%s8167_s0 + $0x98] sm:$0x1]  ;;  %v1931_v4 = vrot.slane %v7124_v54, 5 }
 0x180   :  { %3428 = vmatpush.bf16.msra.mxu0 %v5463_v23  ;;  %v1872_v9 = vsel %vm5856_vm5, %v1870_v60, %v1871_v61  ;;  %v1934_v21 = vrot.slane %v4939_v1, 5  ;;  %v5009_v54 = vld [vmem:[%s8167_s0 + $0x3c] sm:$0xf] }
 0x181   :  { %v1644_v36 = vpop.permute.xlu2 %1643  ;;  %v3000_v15 = vrot.slane %v2998_v18, 4  ;;  %v1515_v56 = vrot.slane %v1514_v34, 4  ;;  %v2414_v60 = vshll.u32 %v5009_v54, 16 }
 0x182   :  { %1732 = vst.msk [vmem:[#allocation2 + $0x40] sm:$0xf] %vm8171_vm11, %v1644_v36 }
 0x183   :  { %2004 = vrot.lane.b32.xlu1 %v1925_v19, %s5520_s23  ;;  %v5164_v19 = vld [vmem:[#allocation2 + $0x68] sm:$0xf0]  ;;  %5474 = vmatpush.bf16.msra.mxu2 %v5462_v45 }
 0x184   :  { %1669 = vrot.lane.b32.xlu0 %v1506_v24, %s5519_s13  ;;  %v5167_v22 = vor.u32 %v5440_v10, %v5164_v19  ;;  %v3001_v24 = vrot.slane %v5071_v27, 5  ;;  %3429 = vmatpush.bf16.msra.mxu0 %v5462_v45  ;;  %v3008_v19 = vrot.slane %v5074_v6, 5  ;;  %v7232_v6 = vld [vmem:[%s8167_s0 + $0x40] sm:$0xf] }
 0x185   :  { %v1636_v35 = vpop.permute.xlu1 %1635 }
 0x186   :  { %1728 = vst.msk [vmem:[#allocation2 + $0x20] sm:$0xf] %vm8171_vm11, %v1636_v35  ;;  %v1634_v47 = vpop.permute.xlu0 %1633  ;;  %v2586_v35 = vrot.slane %v2585_v17, 4  ;;  %5282 = vmatmul.msk.bf16.gmra.mxu1 %vm3375_vm10, %v5167_v22  ;;  %v3002_v46 = vsel %vm5856_vm5, %v3000_v15, %v3001_v24  ;;  %v5104_v17 = vrot.slane %v5072_v57, 9  ;;  %v1933_v15 = vrot.slane %v1931_v4, 4 }
 0x187   :  { %1727 = vst.msk [vmem:[#allocation2 + $0x18] sm:$0xf] %vm8171_vm11, %v1634_v47  ;;  %1667 = vrot.lane.b32.xlu2 %v1496_v51, %s5519_s13  ;;  %v2403_v51 = vor.u32 %v2402_v33, %v7092_v32  ;;  %5475 = vmatpush.bf16.msra.mxu2 %v5461_v48  ;;  %v5034_v24 = vld [vmem:[%s8167_s0 + $0xa0] sm:$0xf]  ;;  %v1523_v33 = vrot.slane %v1521_v55, 4 }
 0x188   :  { %v2591_v52 = vsel %vm5566_vm2, %v2586_v35, %v6999_v38  ;;  %v5033_v38 = vld [vmem:[%s8167_s0 + $0x9c] sm:$0xf]  ;;  %3106 = vst.msk [vmem:[#allocation2 + $0x7c] sm:$0xf] %vm61_vm6, %v3002_v46  ;;  %3430 = vmatpush.bf16.msra.mxu0 %v5461_v48  ;;  %v2612_v34 = vshll.u32 %v5034_v24, 16  ;;  %v1935_v44 = vsel %vm5856_vm5, %v1933_v15, %v1934_v21 }
 0x189   :  { %v1650_v2 = vpop.permute.xlu2 %1649  ;;  %v2404_v50 = vrot.slane %v2403_v51, 4  ;;  %v2603_v5 = vshrl.u32 %v5033_v38, 16  ;;  %v2606_v10 = vshll.u32 %v5033_v38, 16  ;;  %v1524_v46 = vor.u32 %v1523_v33, %v7138_v58 }
 0x18a   :  { %1735 = vst.msk [vmem:[#allocation2 + $0x58] sm:$0xf] %vm8171_vm11, %v1650_v2  ;;  %v7200_v37 = vrot.slane %v2612_v34, 5  ;;  %v5076_v34 = vld [vmem:[%s8167_s0 + $0x88] sm:$0xf] }
 0x18b   :  { %2203 = vrot.lane.b32.xlu1 %v4989_v40, %s5522_s19  ;;  %v2999_v40 = vsel %vm5856_vm5, %v5103_v26, %v2998_v18  ;;  %v3005_v18 = vrot.slane %v5073_v49, 5  ;;  %v2409_v27 = vsel %vm5566_vm2, %v2404_v50, %v2408_v62  ;;  %v2605_v30 = vrot.slane %v2603_v5, 4 }
 0x18c   :  { %2201 = vrot.lane.b32.xlu0 %v4988_v31, %s5522_s19  ;;  %3105 = vst.msk [vmem:[#allocation2 + $0x74] sm:$0xf] %vm61_vm6, %v2999_v40  ;;  %v4972_v31 = vld [vmem:[%s8167_s0 + $0x30] sm:$0xf]  ;;  %v2608_v26 = vrot.slane %v2606_v10, 5  ;;  %v4963_v40 = vrot.slane %v4937_v29, 9 }
 0x18d   :  { %v1642_v0 = vpop.permute.xlu1 %1641  ;;  %v3006_v23 = vsel %vm5856_vm5, %v5104_v17, %v3005_v18  ;;  %v3007_v25 = vrot.slane %v3005_v18, 4  ;;  %v1525_v28 = vrot.slane %v1524_v46, 4  ;;  %v2616_v62 = vshrl.u32 %v5034_v24, 16 }
 0x18e   :  { %1731 = vst.msk [vmem:[#allocation2 + $0x38] sm:$0xf] %vm8171_vm11, %v1642_v0  ;;  %v1640_v13 = vpop.permute.xlu0 %1639  ;;  %v2392_v0 = vrot.slane %v2390_v53, 5  ;;  %v1932_v51 = vsel %vm5856_vm5, %v4963_v40, %v1931_v4  ;;  %v4913_v4 = vld [vmem:[%s8167_s0 + $0x30] sm:$0xe]  ;;  %v2416_v49 = vrot.slane %v2414_v60, 5 }
 0x18f   :  { %1730 = vst.msk [vmem:[#allocation2 + $0x30] sm:$0xf] %vm8171_vm11, %v1640_v13  ;;  %2006 = vrot.lane.b32.xlu2 %v1928_v14, %s5520_s23  ;;  %v5460_v13 = vld [vmem:[%s8168_s1] sm:$0xff]  ;;  %v3009_v35 = vsel %vm5856_vm5, %v3007_v25, %v3008_v19  ;;  %v2420_v17 = vshll.u32 %v7232_v6, 16  ;;  %v2424_v40 = vshrl.u32 %v7232_v6, 16  ;;  %v3012_v46 = vrot.slane %v5076_v34, 5 }
 0x190   :  { %v2393_v16 = vor.u32 %v2392_v0, %v2389_v63  ;;  %5476 = vmatpush.bf16.msra.mxu2 %v5460_v13  ;;  %3431 = vmatpush.bf16.msra.mxu0 %v5460_v13  ;;  %3107 = vst.msk [vmem:[#allocation2 + $0x84] sm:$0xf] %vm61_vm6, %v3006_v23  ;;  %v5035_v13 = vld [vmem:[%s8167_s0 + $0xa4] sm:$0x1]  ;;  %v4990_v23 = vld [vmem:[%s8167_s0 + $0x9c] sm:$0xf] }
 0x191   :  { %v1656_v39 = vpop.permute.xlu2 %1655  ;;  %3108 = vst.msk [vmem:[#allocation2 + $0x8c] sm:$0xf] %vm61_vm6, %v3009_v35  ;;  %v7258_v24 = vrot.slane %v2420_v17, 5 }
 0x192   :  { %1738 = vst.msk [vmem:[#allocation2 + $0x70] sm:$0xf] %vm8171_vm11, %v1656_v39  ;;  %v2394_v11 = vrot.slane %v2393_v16, 4 }
 0x193   :  { %1972 = vrot.lane.b32.xlu1 %v1869_v8, %s5520_s23  ;;  %v1520_v8 = vsel %vm5566_vm2, %v1515_v56, %v7138_v58  ;;  %v5442_v12 = vld [vmem:[#allocation2 + $0x74] sm:$0xf]  ;;  %v2411_v58 = vshrl.u32 %v5009_v54, 16 }
 0x194   :  { %2764 = vrot.lane.b32.xlu0 %v2601_v7, %s5521_s9  ;;  %v5172_v7 = vld [vmem:[#allocation2 + $0x78] sm:$0xf0]  ;;  %v2399_v45 = vsel %vm5566_vm2, %v2394_v11, %v7092_v32  ;;  %v4914_v32 = vld [vmem:[%s8167_s0 + $0x34] sm:$0xf]  ;;  %v4894_v11 = vld [vmem:[%s8167_s0 + $0xa4] sm:$0x1] }
 0x195   :  { %v1648_v36 = vpop.permute.xlu1 %1647  ;;  %v5175_v22 = vor.u32 %v5442_v12, %v5172_v7  ;;  %v1875_v56 = vrot.slane %v4914_v32, 5  ;;  %v2413_v5 = vrot.slane %v2411_v58, 4  ;;  %v4892_v7 = vld [vmem:[%s8167_s0 + $0x9c] sm:$0xf]  ;;  %v5077_v32 = vld [vmem:[%s8167_s0 + $0x8c] sm:$0x1] }
 0x196   :  { %1734 = vst.msk [vmem:[#allocation2 + $0x50] sm:$0xf] %vm8171_vm11, %v1648_v36  ;;  %v1646_v47 = vpop.permute.xlu0 %1645 }
 0x197   :  { %1733 = vst.msk [vmem:[#allocation2 + $0x48] sm:$0xf] %vm8171_vm11, %v1646_v47  ;;  %2762 = vrot.lane.b32.xlu2 %v2591_v52, %s5521_s9  ;;  %5283 = vmatmul.msk.bf16.gmra.mxu1 %vm3375_vm10, %v5175_v22  ;;  %v1527_v47 = vshll.u32 %v4891_v41, 16  ;;  %v5444_v48 = vld [vmem:[#allocation2 + $0x84] sm:$0xf]  ;;  %v1877_v1 = vrot.slane %v1875_v56, 4  ;;  %v2417_v16 = vor.u32 %v2416_v49, %v2413_v5 }
 0x198   :  { %v7310_v49 = vld [vmem:[%s8167_s0 + $0xa0] sm:$0xf] }
 0x199   :  { %v1662_v3 = vpop.permute.xlu2 %1661  ;;  %v1529_v53 = vrot.slane %v1527_v47, 5  ;;  %v2418_v15 = vrot.slane %v2417_v16, 4  ;;  %v1938_v16 = vrot.slane %v7310_v49, 5 }
 0x19a   :  { %1741 = vst.msk [vmem:[#allocation2 + $0x88] sm:$0xf] %vm8171_vm11, %v1662_v3  ;;  %v4991_v3 = vld [vmem:[%s8167_s0 + $0xa0] sm:$0xf] }
 0x19b   :  { %2171 = vrot.lane.b32.xlu1 %v4973_v42, %s5522_s19  ;;  %v2609_v42 = vor.u32 %v2608_v26, %v2605_v30  ;;  %v1530_v63 = vsel %vm5566_vm2, %v1525_v28, %v1529_v53  ;;  %v1532_v30 = vshrl.u32 %v4892_v7, 16  ;;  %v1535_v26 = vshll.u32 %v4892_v7, 16 }
 0x19c   :  { %2169 = vrot.lane.b32.xlu0 %v4972_v31, %s5522_s19  ;;  %v5180_v31 = vld [vmem:[#allocation2 + $0x88] sm:$0xf0] }
 0x19d   :  { %v1654_v2 = vpop.permute.xlu1 %1653  ;;  %v2610_v52 = vrot.slane %v2609_v42, 4  ;;  %v5183_v0 = vor.u32 %v5444_v48, %v5180_v31 }
 0x19e   :  { %1737 = vst.msk [vmem:[#allocation2 + $0x68] sm:$0xf] %vm8171_vm11, %v1654_v2  ;;  %v1652_v14 = vpop.permute.xlu0 %1651  ;;  %v4915_v2 = vld [vmem:[%s8167_s0 + $0x38] sm:$0x1] }
 0x19f   :  { %1736 = vst.msk [vmem:[#allocation2 + $0x60] sm:$0xf] %vm8171_vm11, %v1652_v14  ;;  %1974 = vrot.lane.b32.xlu2 %v1872_v9, %s5520_s23  ;;  %v2615_v50 = vsel %vm5566_vm2, %v2610_v52, %v7200_v37  ;;  %v1878_v57 = vrot.slane %v4915_v2, 5  ;;  %v2618_v9 = vrot.slane %v2616_v62, 4  ;;  %v4955_v14 = vrot.slane %v4913_v4, 9  ;;  %v7296_v62 = vpop.f32.mrf.mxu1 }
 0x1a0   :  { %v2426_v2 = vrot.slane %v2424_v40, 4  ;;  %v5011_v4 = vld [vmem:[%s8167_s0 + $0x44] sm:$0x1] }
 0x1a1   :  { %v2194_v39 = vpop.permute.xlu2 %2193  ;;  %v1879_v22 = vsel %vm5856_vm5, %v1877_v1, %v1878_v57  ;;  %v2619_v25 = vor.u32 %v2618_v9, %v7200_v37  ;;  %v1876_v29 = vsel %vm5856_vm5, %v4955_v14, %v1875_v56  ;;  %v5075_v37 = vld [vmem:[%s8167_s0 + $0x84] sm:$0xe]  ;;  %v2430_v14 = vshll.u32 %v5011_v4, 16  ;;  %v4918_v4 = vld [vmem:[%s8167_s0 + $0x44] sm:$0x1] }
 0x1a2   :  { %v5105_v54 = vrot.slane %v5075_v37, 9 }
 0x1a3   :  { %1671 = vrot.lane.b32.xlu1 %v1520_v8, %s5519_s13  ;;  %v4893_v8 = vld [vmem:[%s8167_s0 + $0xa0] sm:$0xf] }
 0x1a4   :  { %2732 = vrot.lane.b32.xlu0 %v2409_v27, %s5521_s9  ;;  %v1541_v18 = vshll.u32 %v4893_v8, 16  ;;  %v1545_v19 = vshrl.u32 %v4893_v8, 16  ;;  %v2622_v27 = vshll.u32 %v5035_v13, 16  ;;  %v3013_v58 = vsel %vm5856_vm5, %v5105_v54, %v3012_v46 }
 0x1a5   :  { %v1660_v36 = vpop.permute.xlu1 %1659  ;;  %3109 = vst.msk [vmem:[#allocation2 + $0x94] sm:$0xf] %vm61_vm6, %v3013_v58  ;;  %v2427_v13 = vor.u32 %v2426_v2, %v7258_v24 }
 0x1a6   :  { %1740 = vst.msk [vmem:[#allocation2 + $0x80] sm:$0xf] %vm8171_vm11, %v1660_v36  ;;  %v1658_v43 = vpop.permute.xlu0 %1657  ;;  %v7264_v33 = vrot.slane %v1541_v18, 5  ;;  %v1547_v35 = vrot.slane %v1545_v19, 4  ;;  %v2620_v36 = vrot.slane %v2619_v25, 4 }
 0x1a7   :  { %1739 = vst.msk [vmem:[#allocation2 + $0x78] sm:$0xf] %vm8171_vm11, %v1658_v43  ;;  %2730 = vrot.lane.b32.xlu2 %v2399_v45, %s5521_s9  ;;  %5284 = vmatmul.msk.bf16.gmra.mxu1 %vm3375_vm10, %v5183_v0  ;;  %v1551_v43 = vshll.u32 %v4894_v11, 16  ;;  %v1537_v45 = vrot.slane %v1535_v26, 5  ;;  %v5037_v0 = vld [vmem:[%s8167_s0 + $0xac] sm:$0xf]  ;;  %v7339_v11 = vpop.f32.mrf.mxu1 }
 0x1a8   :  { %v1548_v52 = vor.u32 %v1547_v35, %v7264_v33  ;;  %v2636_v57 = vshll.u32 %v5037_v0, 16  ;;  %v2640_v6 = vshrl.u32 %v5037_v0, 16  ;;  %v4942_v18 = vld [vmem:[%s8167_s0 + $0xa4] sm:$0x1] }
 0x1a9   :  { %v2757_v38 = vpop.permute.xlu2 %2756  ;;  %v1941_v35 = vrot.slane %v4942_v18, 5 }
 0x1aa   :  { %v7332_v7 = vrot.slane %v2636_v57, 5 }
 0x1ab   :  { %2010 = vrot.lane.b32.xlu1 %v1935_v44, %s5520_s23  ;;  %v1534_v44 = vrot.slane %v1532_v30, 4  ;;  %v2432_v30 = vrot.slane %v2430_v14, 5  ;;  %v1885_v14 = vrot.slane %v4918_v4, 5 }
 0x1ac   :  { %2008 = vrot.lane.b32.xlu0 %v1932_v51, %s5520_s23  ;;  %v2423_v51 = vsel %vm5566_vm2, %v2418_v15, %v7258_v24  ;;  %v5446_v19 = vld [vmem:[#allocation2 + $0x94] sm:$0xf] }
 0x1ad   :  { %v1999_v55 = vpop.permute.xlu1 %1998  ;;  %v1538_v56 = vor.u32 %v1537_v45, %v1534_v44 }
 0x1ae   :  { %2078 = vst.msk [vmem:[#allocation2 + $0x88] sm:$0xf] %vm2060_vm12, %v1999_v55  ;;  %v1997_v61 = vpop.permute.xlu0 %1996  ;;  %v3014_v55 = vrot.slane %v3012_v46, 4  ;;  %v4940_v46 = vld [vmem:[%s8167_s0 + $0x9c] sm:$0xe] }
 0x1af   :  { %2077 = vst.msk [vmem:[#allocation2 + $0x80] sm:$0xf] %vm2060_vm12, %v1997_v61  ;;  %1673 = vrot.lane.b32.xlu2 %v1530_v63, %s5519_s13  ;;  %v4975_v61 = vld [vmem:[%s8167_s0 + $0x40] sm:$0xf]  ;;  %v1553_v63 = vrot.slane %v1551_v43, 5  ;;  %v1539_v5 = vrot.slane %v1538_v56, 4 }
 0x1b0   :  { %2274 = vst.msk [vmem:[#allocation2 + $0x80] sm:$0xf] %vm2257_vm13, %v2194_v39  ;;  %v2624_v39 = vrot.slane %v2622_v27, 5  ;;  %v5038_v27 = vld [vmem:[%s8167_s0 + $0xb0] sm:$0x1] }
 0x1b1   :  { %v2162_v12 = vpop.permute.xlu2 %2161  ;;  %v1544_v17 = vsel %vm5566_vm2, %v1539_v5, %v7264_v33  ;;  %v1940_v33 = vrot.slane %v1938_v16, 4  ;;  %v4992_v43 = vld [vmem:[%s8167_s0 + $0xa8] sm:$0xf] }
 0x1b2   :  { %v2625_v53 = vsel %vm5566_vm2, %v2620_v36, %v2624_v39 }
 0x1b3   :  { %2766 = vrot.lane.b32.xlu1 %v2615_v50, %s5521_s9  ;;  %v1549_v50 = vrot.slane %v1548_v52, 4 }
 0x1b4   :  { %2207 = vrot.lane.b32.xlu0 %v4991_v3, %s5522_s19 }
 0x1b5   :  { %v2755_v10 = vpop.permute.xlu1 %2754  ;;  %v1554_v9 = vsel %vm5566_vm2, %v1549_v50, %v1553_v63 }
 0x1b6   :  { %2835 = vst.msk [vmem:[#allocation2 + $0x80] sm:$0xf] %vm2818_vm14, %v2755_v10  ;;  %v2196_v21 = vpop.permute.xlu0 %2195  ;;  %v4974_v10 = vld [vmem:[%s8167_s0 + $0x3c] sm:$0xf] }
 0x1b7   :  { %2275 = vst.msk [vmem:[#allocation2 + $0x88] sm:$0xf] %vm2257_vm13, %v2196_v21  ;;  %2205 = vrot.lane.b32.xlu2 %v4990_v23, %s5522_s19  ;;  %v2642_v21 = vrot.slane %v2640_v6, 4 }
 0x1b8   :  { %2836 = vst.msk [vmem:[#allocation2 + $0x88] sm:$0xf] %vm2818_vm14, %v2757_v38  ;;  %v3015_v38 = vrot.slane %v5077_v32, 5 }
 0x1b9   :  { %v2725_v42 = vpop.permute.xlu2 %2724  ;;  %v2643_v39 = vor.u32 %v2642_v21, %v7332_v7  ;;  %v4993_v21 = vld [vmem:[%s8167_s0 + $0xac] sm:$0xf] }
 0x1ba   :  { %v3016_v60 = vsel %vm5856_vm5, %v3014_v55, %v3015_v38  ;;  %v5012_v38 = vld [vmem:[%s8167_s0 + $0x48] sm:$0xf] }
 0x1bb   :  { %1978 = vrot.lane.b32.xlu1 %v1879_v22, %s5520_s23  ;;  %3110 = vst.msk [vmem:[#allocation2 + $0x9c] sm:$0xf] %vm61_vm6, %v3016_v60  ;;  %v2644_v52 = vrot.slane %v2643_v39, 4  ;;  %v7368_v60 = vpop.f32.mrf.mxu1  ;;  %v2435_v0 = vshrl.u32 %v5012_v38, 16  ;;  %v2438_v2 = vshll.u32 %v5012_v38, 16 }
 0x1bc   :  { %1976 = vrot.lane.b32.xlu0 %v1876_v29, %s5520_s23  ;;  %v2428_v29 = vrot.slane %v2427_v13, 4  ;;  %v4895_v39 = vld [vmem:[%s8167_s0 + $0xa8] sm:$0xf] }
 0x1bd   :  { %v1967_v41 = vpop.permute.xlu1 %1966  ;;  %v5178_v47 = vld [vmem:[#allocation2 + $0x80] sm:$0xf]  ;;  %v2437_v57 = vrot.slane %v2435_v0, 4  ;;  %v2440_v6 = vrot.slane %v2438_v2, 5  ;;  %v1556_v38 = vshrl.u32 %v4895_v39, 16 }
 0x1be   :  { %2062 = vst.msk [vmem:[#allocation2 + $0x8] sm:$0xf] %vm2060_vm12, %v1967_v41  ;;  %v1965_v28 = vpop.permute.xlu0 %1964  ;;  %v2646_v41 = vshll.u32 %v5038_v27, 16  ;;  %v2433_v44 = vsel %vm5566_vm2, %v2428_v29, %v2432_v30  ;;  %v4916_v27 = vld [vmem:[%s8167_s0 + $0x3c] sm:$0xe] }
 0x1bf   :  { %2061 = vst.msk [vmem:[#allocation2] sm:$0xf] %vm2060_vm12, %v1965_v28  ;;  %v5445_v48 = vld [vmem:[#allocation2 + $0x84] sm:$0xf0]  ;;  %2768 = vrot.lane.b32.xlu2 %v2625_v53, %s5521_s9  ;;  %v4964_v28 = vrot.slane %v4940_v46, 9  ;;  %v1558_v4 = vrot.slane %v1556_v38, 4 }
 0x1c0   :  { %2258 = vst.msk [vmem:[#allocation2] sm:$0xf] %vm2257_vm13, %v2162_v12  ;;  %v5179_v31 = vor.u32 %v5445_v48, %v5178_v47  ;;  %v5036_v12 = vld [vmem:[%s8167_s0 + $0xa8] sm:$0xf]  ;;  %v2648_v37 = vrot.slane %v2646_v41, 5 }
 0x1c1   :  { %v2001_v1 = vpop.permute.xlu2 %2000  ;;  %v2627_v22 = vshrl.u32 %v5036_v12, 16  ;;  %v2630_v23 = vshll.u32 %v5036_v12, 16  ;;  %v5013_v53 = vld [vmem:[%s8167_s0 + $0x4c] sm:$0xf]  ;;  %v1939_v50 = vsel %vm5856_vm5, %v4964_v28, %v1938_v16  ;;  %v5079_v41 = vld [vmem:[%s8167_s0 + $0x94] sm:$0xf] }
 0x1c2   :  { %3472 = vmatmul.bf16.vlgmr.msra.gmra.mxu2 %v5179_v31  ;;  %v5188_v25 = vld [vmem:[#allocation2 + $0x98] sm:$0xf0]  ;;  %v2649_v48 = vsel %vm5566_vm2, %v2644_v52, %v2648_v37  ;;  %v2444_v56 = vshll.u32 %v5013_v53, 16  ;;  %v2448_v63 = vshrl.u32 %v5013_v53, 16  ;;  %v4896_v12 = vld [vmem:[%s8167_s0 + $0xac] sm:$0xf] }
 0x1c3   :  { %2734 = vrot.lane.b32.xlu1 %v2423_v51, %s5521_s9  ;;  %v5191_v26 = vor.u32 %v5446_v19, %v5188_v25  ;;  %v2629_v40 = vrot.slane %v2627_v22, 4  ;;  %v1942_v51 = vsel %vm5856_vm5, %v1940_v33, %v1941_v35  ;;  %v1565_v22 = vshll.u32 %v4896_v12, 16  ;;  %v5080_v46 = vld [vmem:[%s8167_s0 + $0x98] sm:$0x1] }
 0x1c4   :  { %2175 = vrot.lane.b32.xlu0 %v4975_v61, %s5522_s19  ;;  %v7373_v61 = vld [vmem:[%s8167_s0 + $0x40] sm:$0xf]  ;;  %v7388_v5 = vrot.slane %v2444_v56, 5  ;;  %v2450_v49 = vrot.slane %v2448_v63, 4  ;;  %v1569_v25 = vshrl.u32 %v4896_v12, 16  ;;  %v3022_v28 = vrot.slane %v5080_v46, 5 }
 0x1c5   :  { %v2723_v3 = vpop.permute.xlu1 %2722  ;;  %5285 = vmatmul.msk.bf16.vlgmr.msra.gmra.mxu3 %vm3375_vm10, %v5191_v26  ;;  %v7415_v35 = vrot.slane %v1565_v22, 5  ;;  %v4945_v46 = vld [vmem:[%s8167_s0 + $0xb0] sm:$0x1] }
 0x1c6   :  { %2819 = vst.msk [vmem:[#allocation2] sm:$0xf] %vm2818_vm14, %v2723_v3  ;;  %v2164_v8 = vpop.permute.xlu0 %2163  ;;  %v2451_v18 = vor.u32 %v2450_v49, %v7388_v5 }
 0x1c7   :  { %2259 = vst.msk [vmem:[#allocation2 + $0x8] sm:$0xf] %vm2257_vm13, %v2164_v8  ;;  %2173 = vrot.lane.b32.xlu2 %v4974_v10, %s5522_s19  ;;  %v5014_v10 = vld [vmem:[%s8167_s0 + $0x50] sm:$0x1] }
 0x1c8   :  { %2820 = vst.msk [vmem:[#allocation2 + $0x8] sm:$0xf] %vm2818_vm14, %v2725_v42  ;;  %v2632_v42 = vrot.slane %v2630_v23, 5  ;;  %v2454_v19 = vshll.u32 %v5014_v10, 16  ;;  %v7406_v23 = vpop.f32.mrf.mxu1  ;;  %v2452_v30 = vrot.slane %v2451_v18, 4 }
 0x1c9   :  { %v2200_v24 = vpop.permute.xlu2 %2199  ;;  %v4977_v10 = vld [vmem:[%s8167_s0 + $0x4c] sm:$0xf] }
 0x1ca   :  { %v2633_v32 = vor.u32 %v2632_v42, %v2629_v40  ;;  %v2456_v26 = vrot.slane %v2454_v19, 5  ;;  %v4897_v42 = vld [vmem:[%s8167_s0 + $0xb0] sm:$0x1] }
 0x1cb   :  { %1677 = vrot.lane.b32.xlu1 %v1554_v9, %s5519_s13 }
 0x1cc   :  { %1675 = vrot.lane.b32.xlu0 %v1544_v17, %s5519_s13  ;;  %v2634_v31 = vrot.slane %v2633_v32, 4  ;;  %v4976_v17 = vld [vmem:[%s8167_s0 + $0x48] sm:$0xf]  ;;  %v2457_v52 = vsel %vm5566_vm2, %v2452_v30, %v2456_v26  ;;  %v5039_v26 = vld [vmem:[%s8167_s0 + $0xb4] sm:$0xf] }
 0x1cd   :  { %v1666_v15 = vpop.permute.xlu1 %1665  ;;  %v5114_v36 = vld [vmem:[#allocation2] sm:$0xf] }
 0x1ce   :  { %1743 = vst.msk [vmem:[#allocation2 + $0x98] sm:$0xf] %vm8171_vm11, %v1666_v15  ;;  %v1664_v34 = vpop.permute.xlu0 %1663  ;;  %v2639_v3 = vsel %vm5566_vm2, %v2634_v31, %v7332_v7  ;;  %v2441_v7 = vor.u32 %v2440_v6, %v2437_v57 }
 0x1cf   :  { %1742 = vst.msk [vmem:[#allocation2 + $0x90] sm:$0xf] %vm8171_vm11, %v1664_v34  ;;  %v5429_v45 = vld [vmem:[#allocation2 + $0x4] sm:$0xf0]  ;;  %2736 = vrot.lane.b32.xlu2 %v2433_v44, %s5521_s9  ;;  %v1571_v34 = vrot.slane %v1569_v25, 4 }
 0x1d0   :  { %2079 = vst.msk [vmem:[#allocation2 + $0x90] sm:$0xf] %vm2060_vm12, %v2001_v1  ;;  %v5115_v47 = vor.u32 %v5429_v45, %v5114_v36  ;;  %v1882_v1 = vrot.slane %v7373_v61, 5  ;;  %v2442_v15 = vrot.slane %v2441_v7, 4  ;;  %v4956_v36 = vrot.slane %v4916_v27, 9  ;;  %v7459_v63 = vpop.f32.mrf.mxu1 }
 0x1d1   :  { %v1969_v55 = vpop.permute.xlu2 %1968  ;;  %v4943_v44 = vld [vmem:[%s8167_s0 + $0xa8] sm:$0xe]  ;;  %v5078_v45 = vld [vmem:[%s8167_s0 + $0x90] sm:$0xe]  ;;  %v1572_v61 = vor.u32 %v1571_v34, %v7415_v35  ;;  %v2651_v34 = vshrl.u32 %v5039_v26, 16 }
 0x1d2   :  { %3432 = vmatmul.bf16.vlgmr.msra.gmra.mxu0 %v5115_v47  ;;  %2063 = vst.msk [vmem:[#allocation2 + $0x10] sm:$0xf] %vm2060_vm12, %v1969_v55  ;;  %v1884_v13 = vrot.slane %v1882_v1, 4  ;;  %v5106_v37 = vrot.slane %v5078_v45, 9  ;;  %v1883_v55 = vsel %vm5856_vm5, %v4956_v36, %v1882_v1  ;;  %v4965_v0 = vrot.slane %v4943_v44, 9 }
 0x1d3   :  { %2209 = vrot.lane.b32.xlu1 %v4992_v43, %s5522_s19  ;;  %v3019_v43 = vrot.slane %v5079_v41, 5  ;;  %v1573_v57 = vrot.slane %v1572_v61, 4  ;;  %v4995_v36 = vld [vmem:[%s8167_s0 + $0xb8] sm:$0xf] }
 0x1d4   :  { %2014 = vrot.lane.b32.xlu0 %v1942_v51, %s5520_s23  ;;  %v1886_v29 = vsel %vm5856_vm5, %v1884_v13, %v1885_v14 }
 0x1d5   :  { %v2198_v54 = vpop.permute.xlu1 %2197  ;;  %v3021_v32 = vrot.slane %v3019_v43, 4  ;;  %v3020_v31 = vsel %vm5856_vm5, %v5106_v37, %v3019_v43  ;;  %v2654_v43 = vshll.u32 %v5039_v26, 16 }
 0x1d6   :  { %2276 = vst.msk [vmem:[#allocation2 + $0x90] sm:$0xf] %vm2257_vm13, %v2198_v54  ;;  %v2003_v58 = vpop.permute.xlu0 %2002  ;;  %v7444_v54 = vld [vmem:[%s8167_s0 + $0xac] sm:$0xf] }
 0x1d7   :  { %2080 = vst.msk [vmem:[#allocation2 + $0x98] sm:$0xf] %vm2060_vm12, %v2003_v58  ;;  %2012 = vrot.lane.b32.xlu2 %v1939_v50, %s5520_s23  ;;  %v3023_v56 = vsel %vm5856_vm5, %v3021_v32, %v3022_v28  ;;  %v2447_v58 = vsel %vm5566_vm2, %v2442_v15, %v7388_v5  ;;  %v1575_v50 = vshll.u32 %v4897_v42, 16  ;;  %v1945_v2 = vrot.slane %v7444_v54, 5  ;;  %v5040_v5 = vld [vmem:[%s8167_s0 + $0xb8] sm:$0xf] }
 0x1d8   :  { %2277 = vst.msk [vmem:[#allocation2 + $0x98] sm:$0xf] %vm2257_vm13, %v2200_v24  ;;  %v2660_v12 = vshll.u32 %v5040_v5, 16  ;;  %v2664_v13 = vshrl.u32 %v5040_v5, 16  ;;  %v5041_v15 = vld [vmem:[%s8167_s0 + $0xbc] sm:$0x1] }
 0x1d9   :  { %v2168_v9 = vpop.permute.xlu2 %2167  ;;  %3111 = vst.msk [vmem:[#allocation2 + $0xa4] sm:$0xf] %vm61_vm6, %v3020_v31  ;;  %v1577_v6 = vrot.slane %v1575_v50, 5  ;;  %v2670_v45 = vshll.u32 %v5041_v15, 16  ;;  %v1947_v28 = vrot.slane %v1945_v2, 4  ;;  %v2653_v54 = vrot.slane %v2651_v34, 4 }
 0x1da   :  { %3112 = vst.msk [vmem:[#allocation2 + $0xac] sm:$0xf] %vm61_vm6, %v3023_v56  ;;  %v7479_v22 = vrot.slane %v2660_v12, 5  ;;  %v2666_v25 = vrot.slane %v2664_v13, 4  ;;  %v4979_v12 = vld [vmem:[%s8167_s0 + $0x58] sm:$0xf] }
 0x1db   :  { %2772 = vrot.lane.b32.xlu1 %v2649_v48, %s5521_s9  ;;  %v1559_v48 = vshll.u32 %v4895_v39, 16  ;;  %v4919_v39 = vld [vmem:[%s8167_s0 + $0x48] sm:$0xe]  ;;  %v5015_v13 = vld [vmem:[%s8167_s0 + $0x54] sm:$0xf] }
 0x1dc   :  { %2770 = vrot.lane.b32.xlu0 %v2639_v3, %s5521_s9  ;;  %v2667_v44 = vor.u32 %v2666_v25, %v7479_v22  ;;  %v4921_v25 = vld [vmem:[%s8167_s0 + $0x50] sm:$0x1]  ;;  %v2459_v15 = vshrl.u32 %v5015_v13, 16 }
 0x1dd   :  { %v2761_v8 = vpop.permute.xlu1 %2760  ;;  %v1561_v49 = vrot.slane %v1559_v48, 5  ;;  %v2672_v48 = vrot.slane %v2670_v45, 5  ;;  %v1892_v45 = vrot.slane %v4921_v25, 5 }
 0x1de   :  { %2838 = vst.msk [vmem:[#allocation2 + $0x98] sm:$0xf] %vm2818_vm14, %v2761_v8  ;;  %v2759_v16 = vpop.permute.xlu0 %2758  ;;  %v2668_v38 = vrot.slane %v2667_v44, 4  ;;  %v7587_v44 = vld [vmem:[%s8167_s0 + $0xb8] sm:$0xf] }
 0x1df   :  { %2837 = vst.msk [vmem:[#allocation2 + $0x90] sm:$0xf] %vm2818_vm14, %v2759_v16  ;;  %2211 = vrot.lane.b32.xlu2 %v4993_v21, %s5522_s19  ;;  %v1562_v14 = vor.u32 %v1561_v49, %v1558_v4 }
 0x1e0   :  { %v5448_v16 = vld [vmem:[#allocation2 + $0xa4] sm:$0xf] }
 0x1e1   :  { %v1668_v33 = vpop.permute.xlu2 %1667  ;;  %v5196_v18 = vld [vmem:[#allocation2 + $0xa8] sm:$0xf0]  ;;  %v1563_v27 = vrot.slane %v1562_v14, 4  ;;  %v5082_v14 = vld [vmem:[%s8167_s0 + $0xa0] sm:$0xf] }
 0x1e2   :  { %1744 = vst.msk [vmem:[#allocation2 + $0xa0] sm:$0xf] %vm8171_vm11, %v1668_v33  ;;  %v5199_v19 = vor.u32 %v5448_v16, %v5196_v18  ;;  %v5017_v18 = vld [vmem:[%s8167_s0 + $0x5c] sm:$0x1] }
 0x1e3   :  { %2177 = vrot.lane.b32.xlu1 %v4976_v17, %s5522_s19  ;;  %v1578_v17 = vsel %vm5566_vm2, %v1573_v57, %v1577_v6  ;;  %v1568_v42 = vsel %vm5566_vm2, %v1563_v27, %v7415_v35  ;;  %v7542_v6 = vld [vmem:[%s8167_s0 + $0xb8] sm:$0xf]  ;;  %v5081_v27 = vld [vmem:[%s8167_s0 + $0x9c] sm:$0xe] }
 0x1e4   :  { %1982 = vrot.lane.b32.xlu0 %v1886_v29, %s5520_s23  ;;  %v7481_v29 = vpop.f32.mrf.mxu1  ;;  %5286 = vmatmul.msk.bf16.gmra.mxu3 %vm3375_vm10, %v5199_v19 }
 0x1e5   :  { %v2166_v24 = vpop.permute.xlu1 %2165  ;;  %v5447_v40 = vld [vmem:[#allocation2 + $0x94] sm:$0xf0] }
 0x1e6   :  { %2260 = vst.msk [vmem:[#allocation2 + $0x10] sm:$0xf] %vm2257_vm13, %v2166_v24  ;;  %v1971_v47 = vpop.permute.xlu0 %1970  ;;  %v5186_v51 = vld [vmem:[#allocation2 + $0x90] sm:$0xf] }
 0x1e7   :  { %2064 = vst.msk [vmem:[#allocation2 + $0x18] sm:$0xf] %vm2060_vm12, %v1971_v47  ;;  %v5187_v53 = vor.u32 %v5447_v40, %v5186_v51  ;;  %1980 = vrot.lane.b32.xlu2 %v1883_v55, %s5520_s23  ;;  %v7502_v40 = vld [vmem:[%s8167_s0 + $0x4c] sm:$0xf]  ;;  %v4994_v47 = vld [vmem:[%s8167_s0 + $0xb4] sm:$0xf] }
 0x1e8   :  { %2261 = vst.msk [vmem:[#allocation2 + $0x18] sm:$0xf] %vm2257_vm13, %v2168_v9  ;;  %v1946_v9 = vsel %vm5856_vm5, %v4965_v0, %v1945_v2  ;;  %v4957_v51 = vrot.slane %v4919_v39, 9  ;;  %v1889_v35 = vrot.slane %v7502_v40, 5  ;;  %v2656_v55 = vrot.slane %v2654_v43, 5 }
 0x1e9   :  { %3477 = vmatmul.bf16.gmra.mxu2 %v5187_v53  ;;  %v2007_v1 = vpop.permute.xlu2 %2006  ;;  %v1948_v53 = vrot.slane %v4945_v46, 5  ;;  %v5016_v0 = vld [vmem:[%s8167_s0 + $0x58] sm:$0xf]  ;;  %v4978_v39 = vld [vmem:[%s8167_s0 + $0x54] sm:$0xf] }
 0x1ea   :  { %v1890_v50 = vsel %vm5856_vm5, %v4957_v51, %v1889_v35  ;;  %v2468_v5 = vshll.u32 %v5016_v0, 16  ;;  %v2472_v57 = vshrl.u32 %v5016_v0, 16  ;;  %v1891_v43 = vrot.slane %v1889_v35, 4  ;;  %v5042_v35 = vld [vmem:[%s8167_s0 + $0xc0] sm:$0xf] }
 0x1eb   :  { %2740 = vrot.lane.b32.xlu1 %v2457_v52, %s5521_s9  ;;  %v4898_v52 = vld [vmem:[%s8167_s0 + $0xb4] sm:$0xf]  ;;  %v1949_v2 = vsel %vm5856_vm5, %v1947_v28, %v1948_v53 }
 0x1ec   :  { %2738 = vrot.lane.b32.xlu0 %v2447_v58, %s5521_s9  ;;  %v1580_v31 = vshrl.u32 %v4898_v52, 16  ;;  %v1583_v56 = vshll.u32 %v4898_v52, 16  ;;  %v7524_v58 = vpop.f32.mrf.mxu1  ;;  %v7559_v19 = vrot.slane %v2468_v5, 5 }
 0x1ed   :  { %v2729_v3 = vpop.permute.xlu1 %2728 }
 0x1ee   :  { %2822 = vst.msk [vmem:[#allocation2 + $0x18] sm:$0xf] %vm2818_vm14, %v2729_v3  ;;  %v2727_v8 = vpop.permute.xlu0 %2726  ;;  %v2657_v3 = vor.u32 %v2656_v55, %v2653_v54  ;;  %v1582_v4 = vrot.slane %v1580_v31, 4  ;;  %v1585_v49 = vrot.slane %v1583_v56, 5  ;;  %v1952_v56 = vrot.slane %v7587_v44, 5 }
 0x1ef   :  { %2821 = vst.msk [vmem:[#allocation2 + $0x10] sm:$0xf] %vm2818_vm14, %v2727_v8  ;;  %2179 = vrot.lane.b32.xlu2 %v4977_v10, %s5522_s19  ;;  %v5018_v44 = vld [vmem:[%s8167_s0 + $0x60] sm:$0xf] }
 0x1f0   :  { %v2658_v10 = vrot.slane %v2657_v3, 4  ;;  %v1586_v16 = vor.u32 %v1585_v49, %v1582_v4  ;;  %v1593_v3 = vshrl.u32 %v7542_v6, 16  ;;  %v1893_v4 = vsel %vm5856_vm5, %v1891_v43, %v1892_v45 }
 0x1f1   :  { %v2763_v21 = vpop.permute.xlu2 %2762 }
 0x1f2   :  { %v2663_v26 = vsel %vm5566_vm2, %v2658_v10, %v7479_v22  ;;  %v1587_v40 = vrot.slane %v1586_v16, 4  ;;  %v5083_v22 = vld [vmem:[%s8167_s0 + $0xa4] sm:$0x1]  ;;  %v4946_v10 = vld [vmem:[%s8167_s0 + $0xb4] sm:$0xe] }
 0x1f3   :  { %2016 = vrot.lane.b32.xlu1 %v1946_v9, %s5520_s23  ;;  %v3029_v51 = vrot.slane %v5083_v22, 5  ;;  %v5043_v16 = vld [vmem:[%s8167_s0 + $0xc4] sm:$0xf] }
 0x1f4   :  { %1681 = vrot.lane.b32.xlu0 %v1578_v17, %s5519_s13  ;;  %v1589_v17 = vshll.u32 %v7542_v6, 16  ;;  %v1954_v6 = vrot.slane %v1952_v56, 4 }
 0x1f5   :  { %v2005_v7 = vpop.permute.xlu1 %2004  ;;  %v5431_v30 = vld [vmem:[#allocation2 + $0x14] sm:$0xf0] }
 0x1f6   :  { %2081 = vst.msk [vmem:[#allocation2 + $0xa0] sm:$0xf] %vm2060_vm12, %v2005_v7  ;;  %v1670_v24 = vpop.permute.xlu0 %1669  ;;  %v5122_v33 = vld [vmem:[#allocation2 + $0x10] sm:$0xf]  ;;  %v2474_v7 = vrot.slane %v2472_v57, 4 }
 0x1f7   :  { %1745 = vst.msk [vmem:[#allocation2 + $0xa8] sm:$0xf] %vm8171_vm11, %v1670_v24  ;;  %v5123_v41 = vor.u32 %v5431_v30, %v5122_v33  ;;  %1679 = vrot.lane.b32.xlu2 %v1568_v42, %s5519_s13  ;;  %v3026_v30 = vrot.slane %v5082_v14, 5  ;;  %v2462_v24 = vshll.u32 %v5015_v13, 16  ;;  %v5107_v33 = vrot.slane %v5081_v27, 9 }
 0x1f8   :  { %2082 = vst.msk [vmem:[#allocation2 + $0xa8] sm:$0xf] %vm2060_vm12, %v2007_v1  ;;  %v2673_v1 = vsel %vm5566_vm2, %v2668_v38, %v2672_v48  ;;  %v7577_v42 = vrot.slane %v1589_v17, 5  ;;  %v2475_v34 = vor.u32 %v2474_v7, %v7559_v19  ;;  %v4900_v7 = vld [vmem:[%s8167_s0 + $0xbc] sm:$0x1] }
 0x1f9   :  { %3437 = vmatmul.bf16.gmra.mxu0 %v5123_v41  ;;  %v1975_v32 = vpop.permute.xlu2 %1974  ;;  %v2478_v41 = vshll.u32 %v5017_v18, 16  ;;  %v3027_v46 = vsel %vm5856_vm5, %v5107_v33, %v3026_v30  ;;  %v2464_v28 = vrot.slane %v2462_v24, 5  ;;  %v1595_v18 = vrot.slane %v1593_v3, 4  ;;  %v4922_v3 = vld [vmem:[%s8167_s0 + $0x54] sm:$0xe] }
 0x1fa   :  { %2066 = vst.msk [vmem:[#allocation2 + $0x28] sm:$0xf] %vm2060_vm12, %v1975_v32  ;;  %v2461_v32 = vrot.slane %v2459_v15, 4  ;;  %v1592_v54 = vsel %vm5566_vm2, %v1587_v40, %v7577_v42  ;;  %v2476_v55 = vrot.slane %v2475_v34, 4 }
 0x1fb   :  { %2215 = vrot.lane.b32.xlu1 %v4995_v36, %s5522_s19  ;;  %v7571_v36 = vpop.f32.mrf.mxu1  ;;  %3113 = vst.msk [vmem:[#allocation2 + $0xb4] sm:$0xf] %vm61_vm6, %v3027_v46  ;;  %v2480_v38 = vrot.slane %v2478_v41, 5  ;;  %v1596_v33 = vor.u32 %v1595_v18, %v7577_v42  ;;  %v4923_v42 = vld [vmem:[%s8167_s0 + $0x58] sm:$0xf] }
 0x1fc   :  { %2213 = vrot.lane.b32.xlu0 %v4994_v47, %s5522_s19  ;;  %v3028_v47 = vrot.slane %v3026_v30, 4  ;;  %v2465_v49 = vor.u32 %v2464_v28, %v2461_v32 }
 0x1fd   :  { %v2204_v37 = vpop.permute.xlu1 %2203  ;;  %v2481_v5 = vsel %vm5566_vm2, %v2476_v55, %v2480_v38  ;;  %v1597_v46 = vrot.slane %v1596_v33, 4  ;;  %v2688_v38 = vshrl.u32 %v5043_v16, 16 }
 0x1fe   :  { %2279 = vst.msk [vmem:[#allocation2 + $0xa8] sm:$0xf] %vm2257_vm13, %v2204_v37  ;;  %v2202_v61 = vpop.permute.xlu0 %2201  ;;  %v3030_v0 = vsel %vm5856_vm5, %v3028_v47, %v3029_v51  ;;  %v2466_v17 = vrot.slane %v2465_v49, 4 }
 0x1ff   :  { %2278 = vst.msk [vmem:[#allocation2 + $0xa0] sm:$0xf] %vm2257_vm13, %v2202_v61  ;;  %2018 = vrot.lane.b32.xlu2 %v1949_v2, %s5520_s23  ;;  %v2675_v61 = vshrl.u32 %v5042_v35, 16 }
 0x200   :  { %2839 = vst.msk [vmem:[#allocation2 + $0xa0] sm:$0xf] %vm2818_vm14, %v2763_v21  ;;  %v2471_v24 = vsel %vm5566_vm2, %v2466_v17, %v7559_v19 }
 0x201   :  { %v2731_v9 = vpop.permute.xlu2 %2730  ;;  %3114 = vst.msk [vmem:[#allocation2 + $0xbc] sm:$0xf] %vm61_vm6, %v3030_v0 }
 0x202   :  { %v5450_v15 = vld [vmem:[#allocation2 + $0xb4] sm:$0xf] }
 0x203   :  { %1984 = vrot.lane.b32.xlu1 %v1890_v50, %s5520_s23  ;;  %v2678_v50 = vshll.u32 %v5042_v35, 16  ;;  %v7616_v57 = vpop.f32.mrf.mxu1  ;;  %v2486_v35 = vshll.u32 %v5018_v44, 16 }
 0x204   :  { %2776 = vrot.lane.b32.xlu0 %v2673_v1, %s5521_s9  ;;  %v4948_v1 = vld [vmem:[%s8167_s0 + $0xbc] sm:$0x1] }
 0x205   :  { %v1973_v8 = vpop.permute.xlu1 %1972 }
 0x206   :  { %2065 = vst.msk [vmem:[#allocation2 + $0x20] sm:$0xf] %vm2060_vm12, %v1973_v8  ;;  %v2765_v21 = vpop.permute.xlu0 %2764  ;;  %v1955_v8 = vrot.slane %v4948_v1, 5  ;;  %v7675_v1 = vld [vmem:[%s8167_s0 + $0x64] sm:$0xf] }
 0x207   :  { %2840 = vst.msk [vmem:[#allocation2 + $0xa8] sm:$0xf] %vm2818_vm14, %v2765_v21  ;;  %2774 = vrot.lane.b32.xlu2 %v2663_v26, %s5521_s9  ;;  %v5194_v53 = vld [vmem:[#allocation2 + $0xa0] sm:$0xf]  ;;  %v4966_v21 = vrot.slane %v4946_v10, 9  ;;  %v2684_v26 = vshll.u32 %v5043_v16, 16 }
 0x208   :  { %v1956_v27 = vsel %vm5856_vm5, %v1954_v6, %v1955_v8  ;;  %v5204_v41 = vld [vmem:[#allocation2 + $0xb8] sm:$0xf0]  ;;  %v2690_v6 = vrot.slane %v2688_v38, 4  ;;  %v5044_v8 = vld [vmem:[%s8167_s0 + $0xc8] sm:$0x1]  ;;  %v4958_v10 = vrot.slane %v4922_v3, 9 }
 0x209   :  { %v1674_v37 = vpop.permute.xlu2 %1673  ;;  %v1953_v40 = vsel %vm5856_vm5, %v4966_v21, %v1952_v56  ;;  %v5207_v34 = vor.u32 %v5450_v15, %v5204_v41  ;;  %v7640_v22 = vrot.slane %v2684_v26, 5  ;;  %v4997_v56 = vld [vmem:[%s8167_s0 + $0xc4] sm:$0xf]  ;;  %v4996_v21 = vld [vmem:[%s8167_s0 + $0xc0] sm:$0xf] }
 0x20a   :  { %1747 = vst.msk [vmem:[#allocation2 + $0xb8] sm:$0xf] %vm8171_vm11, %v1674_v37  ;;  %v2483_v37 = vshrl.u32 %v5018_v44, 16  ;;  %v4981_v3 = vld [vmem:[%s8167_s0 + $0x64] sm:$0xf] }
 0x20b   :  { %2183 = vrot.lane.b32.xlu1 %v4979_v12, %s5522_s19  ;;  %v2677_v12 = vrot.slane %v2675_v61, 4  ;;  %5287 = vmatmul.msk.bf16.gmra.mxu3 %vm3375_vm10, %v5207_v34  ;;  %v7650_v51 = vpop.f32.mrf.mxu1 }
 0x20c   :  { %2181 = vrot.lane.b32.xlu0 %v4978_v39, %s5522_s19  ;;  %v1599_v39 = vshll.u32 %v4900_v7, 16  ;;  %v2485_v61 = vrot.slane %v2483_v37, 4 }
 0x20d   :  { %v2172_v52 = vpop.permute.xlu1 %2171 }
 0x20e   :  { %2263 = vst.msk [vmem:[#allocation2 + $0x28] sm:$0xf] %vm2257_vm13, %v2172_v52  ;;  %v2170_v48 = vpop.permute.xlu0 %2169  ;;  %v5449_v31 = vld [vmem:[#allocation2 + $0xa4] sm:$0xf0]  ;;  %v1601_v47 = vrot.slane %v1599_v39, 5 }
 0x20f   :  { %2262 = vst.msk [vmem:[#allocation2 + $0x20] sm:$0xf] %vm2257_vm13, %v2170_v48  ;;  %v5195_v2 = vor.u32 %v5449_v31, %v5194_v53  ;;  %1986 = vrot.lane.b32.xlu2 %v1893_v4, %s5520_s23  ;;  %v4924_v48 = vld [vmem:[%s8167_s0 + $0x5c] sm:$0x1]  ;;  %v4903_v39 = vld [vmem:[%s8167_s0 + $0xc8] sm:$0x1] }
 0x210   :  { %2823 = vst.msk [vmem:[#allocation2 + $0x20] sm:$0xf] %vm2818_vm14, %v2731_v9  ;;  %v2680_v9 = vrot.slane %v2678_v50, 5  ;;  %v1602_v31 = vsel %vm5566_vm2, %v1597_v46, %v1601_v47  ;;  %v2488_v50 = vrot.slane %v2486_v35, 5  ;;  %v5084_v35 = vld [vmem:[%s8167_s0 + $0xa8] sm:$0xe] }
 0x211   :  { %3482 = vmatmul.bf16.gmra.mxu2 %v5195_v2  ;;  %v2206_v14 = vpop.permute.xlu2 %2205  ;;  %v1899_v2 = vrot.slane %v4924_v48, 5 }
 0x212   :  { %v2681_v30 = vor.u32 %v2680_v9, %v2677_v12  ;;  %v2489_v12 = vor.u32 %v2488_v50, %v2485_v61  ;;  %v2492_v9 = vshll.u32 %v7675_v1, 16 }
 0x213   :  { %1683 = vrot.lane.b32.xlu1 %v1592_v54, %s5519_s13  ;;  %v1896_v54 = vrot.slane %v4923_v42, 5 }
 0x214   :  { %2744 = vrot.lane.b32.xlu0 %v2481_v5, %s5521_s9  ;;  %v2682_v43 = vrot.slane %v2681_v30, 4  ;;  %v4902_v5 = vld [vmem:[%s8167_s0 + $0xc4] sm:$0xf]  ;;  %v7702_v33 = vrot.slane %v2492_v9, 5 }
 0x215   :  { %v1672_v13 = vpop.permute.xlu1 %1671  ;;  %v1898_v0 = vrot.slane %v1896_v54, 4  ;;  %v1613_v18 = vshll.u32 %v4902_v5, 16  ;;  %v1617_v7 = vshrl.u32 %v4902_v5, 16  ;;  %v1897_v15 = vsel %vm5856_vm5, %v4958_v10, %v1896_v54 }
 0x216   :  { %1746 = vst.msk [vmem:[#allocation2 + $0xb0] sm:$0xf] %vm8171_vm11, %v1672_v13  ;;  %v2733_v25 = vpop.permute.xlu0 %2732  ;;  %v2687_v53 = vsel %vm5566_vm2, %v2682_v43, %v7640_v22  ;;  %v4901_v13 = vld [vmem:[%s8167_s0 + $0xc0] sm:$0xf]  ;;  %v5108_v54 = vrot.slane %v5084_v35, 9 }
 0x217   :  { %2824 = vst.msk [vmem:[#allocation2 + $0x28] sm:$0xf] %vm2818_vm14, %v2733_v25  ;;  %2742 = vrot.lane.b32.xlu2 %v2471_v24, %s5521_s9  ;;  %v5130_v52 = vld [vmem:[#allocation2 + $0x20] sm:$0xf]  ;;  %v1900_v17 = vsel %vm5856_vm5, %v1898_v0, %v1899_v2  ;;  %v2691_v25 = vor.u32 %v2690_v6, %v7640_v22  ;;  %v1604_v30 = vshrl.u32 %v4901_v13, 16  ;;  %v1607_v26 = vshll.u32 %v4901_v13, 16 }
 0x218   :  { %v2490_v24 = vrot.slane %v2489_v12, 4  ;;  %v7708_v41 = vrot.slane %v1613_v18, 5  ;;  %v5020_v12 = vld [vmem:[%s8167_s0 + $0x68] sm:$0x1] }
 0x219   :  { %v2769_v45 = vpop.permute.xlu2 %2768  ;;  %v2692_v22 = vrot.slane %v2691_v25, 4  ;;  %v1606_v42 = vrot.slane %v1604_v30, 4  ;;  %v1609_v46 = vrot.slane %v1607_v26, 5  ;;  %v4980_v25 = vld [vmem:[%s8167_s0 + $0x60] sm:$0xf]  ;;  %v2502_v30 = vshll.u32 %v5020_v12, 16 }
 0x21a   :  { %v2495_v37 = vsel %vm5566_vm2, %v2490_v24, %v7702_v33 }
 0x21b   :  { %2022 = vrot.lane.b32.xlu1 %v1956_v27, %s5520_s23  ;;  %v2694_v27 = vshll.u32 %v5044_v8, 16  ;;  %v5046_v8 = vld [vmem:[%s8167_s0 + $0xd0] sm:$0xf] }
 0x21c   :  { %2020 = vrot.lane.b32.xlu0 %v1953_v40, %s5520_s23  ;;  %v1619_v40 = vrot.slane %v1617_v7, 4  ;;  %v2708_v18 = vshll.u32 %v5046_v8, 16  ;;  %v2712_v7 = vshrl.u32 %v5046_v8, 16 }
 0x21d   :  { %v2011_v19 = vpop.permute.xlu1 %2010  ;;  %v2696_v44 = vrot.slane %v2694_v27, 5 }
 0x21e   :  { %2084 = vst.msk [vmem:[#allocation2 + $0xb8] sm:$0xf] %vm2060_vm12, %v2011_v19  ;;  %v2009_v32 = vpop.permute.xlu0 %2008  ;;  %v5433_v28 = vld [vmem:[#allocation2 + $0x24] sm:$0xf0]  ;;  %v5085_v19 = vld [vmem:[%s8167_s0 + $0xac] sm:$0xf] }
 0x21f   :  { %2083 = vst.msk [vmem:[#allocation2 + $0xb0] sm:$0xf] %vm2060_vm12, %v2009_v32  ;;  %v5131_v55 = vor.u32 %v5433_v28, %v5130_v52  ;;  %1685 = vrot.lane.b32.xlu2 %v1602_v31, %s5519_s13  ;;  %v3033_v47 = vrot.slane %v5085_v19, 5  ;;  %v5086_v32 = vld [vmem:[%s8167_s0 + $0xb0] sm:$0x1]  ;;  %v2496_v31 = vshrl.u32 %v7675_v1, 16  ;;  %v1610_v1 = vor.u32 %v1609_v46, %v1606_v42 }
 0x220   :  { %2280 = vst.msk [vmem:[#allocation2 + $0xb0] sm:$0xf] %vm2257_vm13, %v2206_v14  ;;  %v7689_v14 = vpop.f32.mrf.mxu1  ;;  %v3036_v38 = vrot.slane %v5086_v32, 5 }
 0x221   :  { %3442 = vmatmul.bf16.gmra.mxu0 %v5131_v55  ;;  %v2174_v49 = vpop.permute.xlu2 %2173  ;;  %v3035_v55 = vrot.slane %v3033_v47, 4  ;;  %v3034_v0 = vsel %vm5856_vm5, %v5108_v54, %v3033_v47  ;;  %v2498_v10 = vrot.slane %v2496_v31, 4  ;;  %v1611_v9 = vrot.slane %v1610_v1, 4  ;;  %v4998_v54 = vld [vmem:[%s8167_s0 + $0xcc] sm:$0xf] }
 0x222   :  { %3115 = vst.msk [vmem:[#allocation2 + $0xc4] sm:$0xf] %vm61_vm6, %v3034_v0  ;;  %v2504_v47 = vrot.slane %v2502_v30, 5 }
 0x223   :  { %2778 = vrot.lane.b32.xlu1 %v2687_v53, %s5521_s9  ;;  %v1620_v53 = vor.u32 %v1619_v40, %v7708_v41  ;;  %v3037_v2 = vsel %vm5856_vm5, %v3035_v55, %v3036_v38  ;;  %v2499_v27 = vor.u32 %v2498_v10, %v7702_v33  ;;  %v4951_v33 = vld [vmem:[%s8167_s0 + $0xc8] sm:$0x1] }
 0x224   :  { %2219 = vrot.lane.b32.xlu0 %v4997_v56, %s5522_s19  ;;  %v2697_v56 = vsel %vm5566_vm2, %v2692_v22, %v2696_v44  ;;  %3116 = vst.msk [vmem:[#allocation2 + $0xcc] sm:$0xf] %vm61_vm6, %v3037_v2  ;;  %v2714_v44 = vrot.slane %v2712_v7, 4  ;;  %v1962_v35 = vrot.slane %v4951_v33, 5 }
 0x225   :  { %v2767_v4 = vpop.permute.xlu1 %2766  ;;  %v2500_v46 = vrot.slane %v2499_v27, 4 }
 0x226   :  { %2841 = vst.msk [vmem:[#allocation2 + $0xb0] sm:$0xf] %vm2818_vm14, %v2767_v4  ;;  %v2208_v16 = vpop.permute.xlu0 %2207  ;;  %v1621_v4 = vrot.slane %v1620_v53, 4 }
 0x227   :  { %2281 = vst.msk [vmem:[#allocation2 + $0xb8] sm:$0xf] %vm2257_vm13, %v2208_v16  ;;  %2217 = vrot.lane.b32.xlu2 %v4996_v21, %s5522_s19  ;;  %v5045_v21 = vld [vmem:[%s8167_s0 + $0xcc] sm:$0xf]  ;;  %v2505_v31 = vsel %vm5566_vm2, %v2500_v46, %v2504_v47 }
 0x228   :  { %2842 = vst.msk [vmem:[#allocation2 + $0xb8] sm:$0xf] %vm2818_vm14, %v2769_v45  ;;  %v1623_v45 = vshll.u32 %v4903_v39, 16  ;;  %v7729_v61 = vpop.f32.mrf.mxu1  ;;  %v2699_v39 = vshrl.u32 %v5045_v21, 16  ;;  %v2702_v40 = vshll.u32 %v5045_v21, 16 }
 0x229   :  { %v2737_v43 = vpop.permute.xlu2 %2736  ;;  %v5452_v26 = vld [vmem:[#allocation2 + $0xc4] sm:$0xf] }
 0x22a   :  { %v1625_v5 = vrot.slane %v1623_v45, 5  ;;  %v2701_v32 = vrot.slane %v2699_v39, 4 }
 0x22b   :  { %1990 = vrot.lane.b32.xlu1 %v1900_v17, %s5520_s23  ;;  %v7756_v17 = vld [vmem:[%s8167_s0 + $0xc4] sm:$0xf] }
 0x22c   :  { %1988 = vrot.lane.b32.xlu0 %v1897_v15, %s5520_s23  ;;  %v1626_v16 = vsel %vm5566_vm2, %v1621_v4, %v1625_v5  ;;  %v1616_v15 = vsel %vm5566_vm2, %v1611_v9, %v7708_v41  ;;  %v1959_v24 = vrot.slane %v7756_v17, 5  ;;  %v5047_v41 = vld [vmem:[%s8167_s0 + $0xd4] sm:$0x1] }
 0x22d   :  { %v1979_v34 = vpop.permute.xlu1 %1978  ;;  %v5202_v52 = vld [vmem:[#allocation2 + $0xb0] sm:$0xf]  ;;  %v2718_v38 = vshll.u32 %v5047_v41, 16  ;;  %v4982_v41 = vld [vmem:[%s8167_s0 + $0x6c] sm:$0xf] }
 0x22e   :  { %2068 = vst.msk [vmem:[#allocation2 + $0x38] sm:$0xf] %vm2060_vm12, %v1979_v34  ;;  %v1977_v28 = vpop.permute.xlu0 %1976  ;;  %v5212_v34 = vld [vmem:[#allocation2 + $0xc8] sm:$0xf0] }
 0x22f   :  { %2067 = vst.msk [vmem:[#allocation2 + $0x30] sm:$0xf] %vm2060_vm12, %v1977_v28  ;;  %v5451_v48 = vld [vmem:[#allocation2 + $0xb4] sm:$0xf0]  ;;  %2780 = vrot.lane.b32.xlu2 %v2697_v56, %s5521_s9  ;;  %v5215_v19 = vor.u32 %v5452_v26, %v5212_v34  ;;  %v2704_v28 = vrot.slane %v2702_v40, 5  ;;  %v2720_v1 = vrot.slane %v2718_v38, 5 }
 0x230   :  { %2264 = vst.msk [vmem:[#allocation2 + $0x30] sm:$0xf] %vm2257_vm13, %v2174_v49  ;;  %v5203_v50 = vor.u32 %v5451_v48, %v5202_v52  ;;  %v7772_v22 = vpop.f32.mrf.mxu1  ;;  %v4927_v26 = vld [vmem:[%s8167_s0 + $0x68] sm:$0x1] }
 0x231   :  { %v2013_v6 = vpop.permute.xlu2 %2012  ;;  %5288 = vmatmul.msk.bf16.gmra.mxu3 %vm3375_vm10, %v5215_v19  ;;  %v2705_v2 = vor.u32 %v2704_v28, %v2701_v32 }
 0x232   :  { %3487 = vmatmul.bf16.gmra.mxu2 %v5203_v50  ;;  %v4949_v50 = vld [vmem:[%s8167_s0 + $0xc0] sm:$0xe] }
 0x233   :  { %2746 = vrot.lane.b32.xlu1 %v2495_v37, %s5521_s9  ;;  %v1961_v37 = vrot.slane %v1959_v24, 4  ;;  %v4967_v5 = vrot.slane %v4949_v50, 9  ;;  %v2706_v10 = vrot.slane %v2705_v2, 4 }
 0x234   :  { %2187 = vrot.lane.b32.xlu0 %v4981_v3, %s5522_s19 }
 0x235   :  { %v2735_v49 = vpop.permute.xlu1 %2734  ;;  %v1963_v0 = vsel %vm5856_vm5, %v1961_v37, %v1962_v35  ;;  %v1960_v7 = vsel %vm5856_vm5, %v4967_v5, %v1959_v24  ;;  %v5023_v24 = vld [vmem:[%s8167_s0 + $0x74] sm:$0x1]  ;;  %v4925_v37 = vld [vmem:[%s8167_s0 + $0x60] sm:$0xe] }
 0x236   :  { %2825 = vst.msk [vmem:[#allocation2 + $0x30] sm:$0xf] %vm2818_vm14, %v2735_v49  ;;  %v2176_v13 = vpop.permute.xlu0 %2175  ;;  %v5022_v49 = vld [vmem:[%s8167_s0 + $0x70] sm:$0xf]  ;;  %v2526_v47 = vshll.u32 %v5023_v24, 16 }
 0x237   :  { %2265 = vst.msk [vmem:[#allocation2 + $0x38] sm:$0xf] %vm2257_vm13, %v2176_v13  ;;  %2185 = vrot.lane.b32.xlu2 %v4980_v25, %s5522_s19  ;;  %v4926_v13 = vld [vmem:[%s8167_s0 + $0x64] sm:$0xf]  ;;  %v2520_v17 = vshrl.u32 %v5022_v49, 16 }
 0x238   :  { %2826 = vst.msk [vmem:[#allocation2 + $0x38] sm:$0xf] %vm2818_vm14, %v2737_v43  ;;  %v2710_v43 = vrot.slane %v2708_v18, 5  ;;  %v5021_v18 = vld [vmem:[%s8167_s0 + $0x6c] sm:$0xf]  ;;  %v1903_v25 = vrot.slane %v4926_v13, 5 }
 0x239   :  { %v2212_v42 = vpop.permute.xlu2 %2211  ;;  %v2507_v27 = vshrl.u32 %v5021_v18, 16  ;;  %v2510_v30 = vshll.u32 %v5021_v18, 16  ;;  %v2522_v39 = vrot.slane %v2520_v17, 4  ;;  %v5088_v13 = vld [vmem:[%s8167_s0 + $0xb8] sm:$0xf] }
 0x23a   :  { %v2715_v55 = vor.u32 %v2714_v44, %v2710_v43  ;;  %v2711_v21 = vsel %vm5566_vm2, %v2706_v10, %v2710_v43  ;;  %v1905_v33 = vrot.slane %v1903_v25, 4  ;;  %v1906_v43 = vrot.slane %v4927_v26, 5 }
 0x23b   :  { %1689 = vrot.lane.b32.xlu1 %v1626_v16, %s5519_s13  ;;  %v2516_v16 = vshll.u32 %v5022_v49, 16  ;;  %v2509_v44 = vrot.slane %v2507_v27, 4  ;;  %v2512_v19 = vrot.slane %v2510_v30, 5  ;;  %v5087_v27 = vld [vmem:[%s8167_s0 + $0xb4] sm:$0xe] }
 0x23c   :  { %1687 = vrot.lane.b32.xlu0 %v1616_v15, %s5519_s13  ;;  %v2716_v3 = vrot.slane %v2715_v55, 4  ;;  %v1907_v35 = vsel %vm5856_vm5, %v1905_v33, %v1906_v43  ;;  %v4959_v55 = vrot.slane %v4925_v37, 9  ;;  %v5089_v30 = vld [vmem:[%s8167_s0 + $0xbc] sm:$0x1] }
 0x23d   :  { %v1678_v45 = vpop.permute.xlu1 %1677  ;;  %v5138_v52 = vld [vmem:[#allocation2 + $0x30] sm:$0xf]  ;;  %v2518_v15 = vrot.slane %v2516_v16, 5  ;;  %v2513_v32 = vor.u32 %v2512_v19, %v2509_v44 }
 0x23e   :  { %1749 = vst.msk [vmem:[#allocation2 + $0xc8] sm:$0xf] %vm8171_vm11, %v1678_v45  ;;  %v1676_v53 = vpop.permute.xlu0 %1675  ;;  %v2721_v9 = vsel %vm5566_vm2, %v2716_v3, %v2720_v1  ;;  %v1904_v3 = vsel %vm5856_vm5, %v4959_v55, %v1903_v25 }
 0x23f   :  { %1748 = vst.msk [vmem:[#allocation2 + $0xc0] sm:$0xf] %vm8171_vm11, %v1676_v53  ;;  %v5435_v48 = vld [vmem:[#allocation2 + $0x34] sm:$0xf0]  ;;  %2748 = vrot.lane.b32.xlu2 %v2505_v31, %s5521_s9  ;;  %v2523_v46 = vor.u32 %v2522_v39, %v2518_v15  ;;  %v2528_v53 = vrot.slane %v2526_v47, 5  ;;  %v2514_v31 = vrot.slane %v2513_v32, 4 }
 0x240   :  { %2085 = vst.msk [vmem:[#allocation2 + $0xc0] sm:$0xf] %vm2060_vm12, %v2013_v6  ;;  %v5139_v56 = vor.u32 %v5435_v48, %v5138_v52  ;;  %v7801_v6 = vpop.f32.mrf.mxu1  ;;  %v4999_v52 = vld [vmem:[%s8167_s0 + $0xd0] sm:$0xf] }
 0x241   :  { %v1981_v8 = vpop.permute.xlu2 %1980  ;;  %v2524_v28 = vrot.slane %v2523_v46, 4 }
 0x242   :  { %3447 = vmatmul.bf16.gmra.mxu0 %v5139_v56  ;;  %2069 = vst.msk [vmem:[#allocation2 + $0x40] sm:$0xf] %vm2060_vm12, %v1981_v8 }
 0x243   :  { %2221 = vrot.lane.b32.xlu1 %v4998_v54, %s5522_s19 }
 0x244   :  { %2026 = vrot.lane.b32.xlu0 %v1963_v0, %s5520_s23  ;;  %v2529_v0 = vsel %vm5566_vm2, %v2524_v28, %v2528_v53 }
 0x245   :  { %v2210_v4 = vpop.permute.xlu1 %2209  ;;  %v3473_v5 = vpop.f32.mrf.mxu2 }
 0x246   :  { %2282 = vst.msk [vmem:[#allocation2 + $0xc0] sm:$0xf] %vm2257_vm13, %v2210_v4  ;;  %v2015_v12 = vpop.permute.xlu0 %2014  ;;  %v2519_v4 = vsel %vm5566_vm2, %v2514_v31, %v2518_v15  ;;  %v3474_v26 = vadd.f32 %v7870_v20, %v3473_v5  ;;  %v5109_v15 = vrot.slane %v5087_v27, 9  ;;  %vm4573_vm2 = vcmask 1045509  }
 0x247   :  { %2086 = vst.msk [vmem:[#allocation2 + $0xc8] sm:$0xf] %vm2060_vm12, %v2015_v12  ;;  %2024 = vrot.lane.b32.xlu2 %v1960_v7, %s5520_s23  ;;  %v4983_v12 = vld [vmem:[%s8167_s0 + $0x70] sm:$0xf]  ;;  %v3040_v7 = vrot.slane %v5088_v13, 5 }
 0x248   :  { %2283 = vst.msk [vmem:[#allocation2 + $0xc8] sm:$0xf] %vm2257_vm13, %v2212_v42  ;;  %v7830_v45 = vpop.f32.mrf.mxu1 }
 0x249   :  { %v2180_v34 = vpop.permute.xlu2 %2179  ;;  %v3042_v39 = vrot.slane %v3040_v7, 4  ;;  %v3041_v43 = vsel %vm5856_vm5, %v5109_v15, %v3040_v7 }
 0x24a   :  { %3117 = vst.msk [vmem:[#allocation2 + $0xd4] sm:$0xf] %vm61_vm6, %v3041_v43 }
 0x24b   :  { %2784 = vrot.lane.b32.xlu1 %v2721_v9, %s5521_s9 }
 0x24c   :  { %2782 = vrot.lane.b32.xlu0 %v2711_v21, %s5521_s9 }
 0x24d   :  { %v2773_v40 = vpop.permute.xlu1 %2772  ;;  %v3475_v21 = vpop.f32.mrf.mxu2 }
 0x24e   :  { %2844 = vst.msk [vmem:[#allocation2 + $0xc8] sm:$0xf] %vm2818_vm14, %v2773_v40  ;;  %v2771_v42 = vpop.permute.xlu0 %2770  ;;  %v3043_v40 = vrot.slane %v5089_v30, 5  ;;  %v3476_v46 = vadd.f32 %v7870_v20, %v3475_v21 }
 0x24f   :  { %2843 = vst.msk [vmem:[#allocation2 + $0xc0] sm:$0xf] %vm2818_vm14, %v2771_v42  ;;  %2223 = vrot.lane.b32.xlu2 %v4999_v52, %s5522_s19  ;;  %v3433_v16 = vpop.f32.mrf.mxu0 }
 0x250   :  { %v7854_v1 = vpop.f32.mrf.mxu1  ;;  %v3044_v44 = vsel %vm5856_vm5, %v3042_v39, %v3043_v40  ;;  %v3434_v53 = vadd.f32 %v7870_v20, %v3433_v16 }
 0x251   :  { %v1680_v48 = vpop.permute.xlu2 %1679  ;;  %3118 = vst.msk [vmem:[#allocation2 + $0xdc] sm:$0xf] %vm61_vm6, %v3044_v44 }
 0x252   :  { %1750 = vst.msk [vmem:[#allocation2 + $0xd0] sm:$0xf] %vm8171_vm11, %v1680_v48 }
 0x253   :  { %2189 = vrot.lane.b32.xlu1 %v4982_v41, %s5522_s19  ;;  %v3567_v41 = vpop.f32.mrf.mxu3 }
 0x254   :  { %1994 = vrot.lane.b32.xlu0 %v1907_v35, %s5520_s23 }
 0x255   :  { %v2178_v54 = vpop.permute.xlu1 %2177  ;;  %v5453_v38 = vld [vmem:[#allocation2 + $0xc4] sm:$0xf0] }
 0x256   :  { %2266 = vst.msk [vmem:[#allocation2 + $0x40] sm:$0xf] %vm2257_vm13, %v2178_v54  ;;  %v1983_v56 = vpop.permute.xlu0 %1982  ;;  %v5210_v50 = vld [vmem:[#allocation2 + $0xc0] sm:$0xf] }
 0x257   :  { %2070 = vst.msk [vmem:[#allocation2 + $0x48] sm:$0xf] %vm2060_vm12, %v1983_v56  ;;  %v5211_v2 = vor.u32 %v5453_v38, %v5210_v50  ;;  %1992 = vrot.lane.b32.xlu2 %v1904_v3, %s5520_s23  ;;  %v3435_v32 = vpop.f32.mrf.mxu0  ;;  %v5454_v50 = vld [vmem:[#allocation2 + $0xd4] sm:$0xf] }
 0x258   :  { %2267 = vst.msk [vmem:[#allocation2 + $0x48] sm:$0xf] %vm2257_vm13, %v2180_v34  ;;  %v3562_v9 = vpop.f32.mrf.mxu1  ;;  %v3436_v48 = vadd.f32 %v7870_v20, %v3435_v32 }
 0x259   :  { %3492 = vmatmul.bf16.gmra.mxu2 %v5211_v2  ;;  %v2019_v8 = vpop.permute.xlu2 %2018  ;;  %v3563_v19 = vadd.f32 %v3562_v9, %v3474_v26 }
 0x25a   :  { %v3525_v16 = vadd.f32 %v7339_v11, %v3436_v48 }
 0x25b   :  { %2752 = vrot.lane.b32.xlu1 %v2529_v0, %s5521_s9  ;;  %v3618_v37 = vmax.f32 %v3563_v19, 0.0  ;;  %v5220_v0 = vld [vmem:[#allocation2 + $0xd8] sm:$0xf0]  ;;  %v3569_v27 = vpop.f32.mrf.mxu3 }
 0x25c   :  { %2750 = vrot.lane.b32.xlu0 %v2519_v4, %s5521_s9  ;;  %v3523_v4 = vadd.f32 %v7296_v62, %v3434_v53  ;;  %v5223_v5 = vor.u32 %v5454_v50, %v5220_v0  ;;  %v7909_v43 = vmax.f32 %v3525_v16, 0.0 }
 0x25d   :  { %v2741_v49 = vpop.permute.xlu1 %2740  ;;  %v3714_v31 = vrot.slane %v3618_v37, 2  ;;  %v3715_v2 = vrot.slane %v3618_v37, 4  ;;  %v3716_v3 = vrot.slane %v3618_v37, 6 }
 0x25e   :  { %2828 = vst.msk [vmem:[#allocation2 + $0x48] sm:$0xf] %vm2818_vm14, %v2741_v49  ;;  %v2739_v10 = vpop.permute.xlu0 %2738  ;;  %5289 = vmatmul.msk.bf16.gmra.mxu3 %vm3375_vm10, %v5223_v5  ;;  %v3602_v30 = vmax.f32 %v3523_v4, 0.0 }
 0x25f   :  { %2827 = vst.msk [vmem:[#allocation2 + $0x40] sm:$0xf] %vm2818_vm14, %v2739_v10  ;;  %2191 = vrot.lane.b32.xlu2 %v4983_v12, %s5522_s19 }
 0x260   :  { %v3564_v35 = vpop.f32.mrf.mxu1  ;;  %v3667_v53 = vrot.slane %v3602_v30, 4  ;;  %v3668_v48 = vrot.slane %v3602_v30, 6 }
 0x261   :  { %v2775_v25 = vpop.permute.xlu2 %2774  ;;  %v3565_v38 = vadd.f32 %v3564_v35, %v3476_v46 }
 0x263   :  { %v7901_v13 = vmax.f32 %v3565_v38, 0.0 }
 0x265   :  { %v2017_v17 = vpop.permute.xlu1 %2016  ;;  %v5437_v18 = vld [vmem:[#allocation2 + $0x44] sm:$0xf0] }
 0x266   :  { %2087 = vst.msk [vmem:[#allocation2 + $0xd0] sm:$0xf] %vm2060_vm12, %v2017_v17  ;;  %v1682_v24 = vpop.permute.xlu0 %1681  ;;  %v5146_v34 = vld [vmem:[#allocation2 + $0x40] sm:$0xf] }
 0x267   :  { %1751 = vst.msk [vmem:[#allocation2 + $0xd8] sm:$0xf] %vm8171_vm11, %v1682_v24  ;;  %v5147_v33 = vor.u32 %v5437_v18, %v5146_v34 }
 0x268   :  { %2088 = vst.msk [vmem:[#allocation2 + $0xd8] sm:$0xf] %vm2060_vm12, %v2019_v8 }
 0x269   :  { %3452 = vmatmul.bf16.gmra.mxu0 %v5147_v33  ;;  %v1987_v52 = vpop.permute.xlu2 %1986  ;;  %v3717_v33 = vrot.slane %v7901_v13, 2 }
 0x26a   :  { %2072 = vst.msk [vmem:[#allocation2 + $0x58] sm:$0xf] %vm2060_vm12, %v1987_v52  ;;  %v3718_v52 = vrot.slane %v7901_v13, 4 }
 0x26c   :  { %v3478_v47 = vpop.f32.mrf.mxu2 }
 0x26d   :  { %v2216_v42 = vpop.permute.xlu1 %2215  ;;  %v3479_v28 = vadd.f32 %v7870_v20, %v3478_v47 }
 0x26e   :  { %2285 = vst.msk [vmem:[#allocation2 + $0xd8] sm:$0xf] %vm2257_vm13, %v2216_v42  ;;  %v2214_v54 = vpop.permute.xlu0 %2213 }
 0x26f   :  { %2284 = vst.msk [vmem:[#allocation2 + $0xd0] sm:$0xf] %vm2257_vm13, %v2214_v54  ;;  %v3568_v55 = vadd.f32 %v3567_v41, %v3479_v28  ;;  %v3666_v28 = vrot.slane %v3602_v30, 2 }
 0x270   :  { %2845 = vst.msk [vmem:[#allocation2 + $0xd0] sm:$0xf] %vm2818_vm14, %v2775_v25 }
 0x271   :  { %v3620_v56 = vmax.f32 %v3568_v55, 0.0  ;;  %v2743_v18 = vpop.permute.xlu2 %2742 }
 0x273   :  { %v3720_v49 = vrot.slane %v3620_v56, 2  ;;  %v3721_v8 = vrot.slane %v3620_v56, 4  ;;  %v3722_v10 = vrot.slane %v3620_v56, 6  ;;  %v3890_v12 = vmax.f32 %v3618_v37, %v3620_v56 }
 0x274   :  { %v3480_v17 = vpop.f32.mrf.mxu2  ;;  %v3719_v37 = vrot.slane %v7901_v13, 6 }
 0x275   :  { %v1985_v9 = vpop.permute.xlu1 %1984  ;;  %v3891_v7 = vmax.f32 %v3714_v31, %v3720_v49  ;;  %v3892_v21 = vmax.f32 %v3715_v2, %v3721_v8  ;;  %v3893_v25 = vmax.f32 %v3716_v3, %v3722_v10  ;;  %v5324_v62 = vrot.slane %v3890_v12, 9 }
 0x276   :  { %2071 = vst.msk [vmem:[#allocation2 + $0x50] sm:$0xf] %vm2060_vm12, %v1985_v9  ;;  %v3481_v26 = vadd.f32 %v7870_v20, %v3480_v17  ;;  %v2777_v15 = vpop.permute.xlu0 %2776  ;;  %v3438_v39 = vpop.f32.mrf.mxu0  ;;  %v3669_v31 = vrot.slane %v7909_v43, 2  ;;  %v3670_v2 = vrot.slane %v7909_v43, 4 }
 0x277   :  { %v5325_v40 = vrot.slane %v3891_v7, 9  ;;  %v5326_v24 = vrot.slane %v3892_v21, 9  ;;  %v5327_v34 = vrot.slane %v3893_v25, 9  ;;  %v4210_v11 = vmax.f32 %v3890_v12, %v5324_v62  ;;  %2846 = vst.msk [vmem:[#allocation2 + $0xd8] sm:$0xf] %vm2818_vm14, %v2777_v15 }
 0x278   :  { %v3439_v44 = vadd.f32 %v7870_v20, %v3438_v39  ;;  %v3570_v19 = vadd.f32 %v3569_v27, %v3481_v26  ;;  %v3671_v26 = vrot.slane %v7909_v43, 6 }
 0x279   :  { %v4211_v42 = vmax.f32 %v3891_v7, %v5325_v40  ;;  %v4212_v41 = vmax.f32 %v3892_v21, %v5326_v24  ;;  %v4213_v46 = vmax.f32 %v3893_v25, %v5327_v34  ;;  %v4274_v47 = vpack.c.bf16 %v4210_v11, %v4210_v11  ;;  %v1686_v0 = vpop.permute.xlu2 %1685 }
 0x27a   :  { %v3528_v35 = vadd.f32 %v7368_v60, %v3439_v44  ;;  %v3621_v32 = vmax.f32 %v3570_v19, 0.0  ;;  %1753 = vst.msk [vmem:[#allocation2 + $0xe8] sm:$0xf] %vm8171_vm11, %v1686_v0 }
 0x27b   :  { %v4275_v54 = vpack.c.bf16 %v4211_v42, %v4211_v42  ;;  %v4276_v55 = vpack.c.bf16 %v4212_v41, %v4212_v41  ;;  %v4402_v56 = vunpack.c.l.b16 %v4274_v47  ;;  %v4277_v3 = vpack.c.bf16 %v4213_v46, %v4213_v46 }
 0x27c   :  { %v3604_v50 = vmax.f32 %v3528_v35, 0.0  ;;  %v3723_v10 = vrot.slane %v3621_v32, 2  ;;  %v3724_v17 = vrot.slane %v3621_v32, 4  ;;  %v3725_v7 = vrot.slane %v3621_v32, 6 }
 0x27d   :  { %v2184_v38 = vpop.permute.xlu1 %2183  ;;  %v4403_v4 = vunpack.c.l.b16 %v4275_v54  ;;  %v4404_v5 = vunpack.c.l.b16 %v4276_v55  ;;  %v5388_v21 = vunpack.i.l.s16 %v4402_v56  ;;  %v3894_v39 = vmax.f32 %v7901_v13, %v3621_v32 }
 0x27e   :  { %2269 = vst.msk [vmem:[#allocation2 + $0x58] sm:$0xf] %vm2257_vm13, %v2184_v38  ;;  %v3672_v60 = vrot.slane %v3604_v50, 2  ;;  %v3673_v49 = vrot.slane %v3604_v50, 4  ;;  %v3674_v8 = vrot.slane %v3604_v50, 6  ;;  %v2182_v12 = vpop.permute.xlu0 %2181  ;;  %v3858_v16 = vmax.f32 %v3602_v30, %v3604_v50 }
 0x27f   :  { %v5389_v9 = vunpack.i.l.s16 %v4403_v4  ;;  %2268 = vst.msk [vmem:[#allocation2 + $0x50] sm:$0xf] %vm2257_vm13, %v2182_v12  ;;  %v5390_v15 = vunpack.i.l.s16 %v4404_v5  ;;  %v4405_v40 = vunpack.c.l.b16 %v4277_v3  ;;  %v3895_v11 = vmax.f32 %v3717_v33, %v3723_v10  ;;  %v3440_v12 = vpop.f32.mrf.mxu0 }
 0x280   :  { %v3859_v25 = vmax.f32 %v3666_v28, %v3672_v60  ;;  %v3860_v62 = vmax.f32 %v3667_v53, %v3673_v49  ;;  %v3861_v27 = vmax.f32 %v3668_v48, %v3674_v8  ;;  %2829 = vst.msk [vmem:[#allocation2 + $0x50] sm:$0xf] %vm2818_vm14, %v2743_v18  ;;  %v5292_v34 = vrot.slane %v3858_v16, 9 }
 0x281   :  { %v4621_v24 = vrot.slane %v5389_v9, 6  ;;  %v3896_v44 = vmax.f32 %v3718_v52, %v3724_v17  ;;  %v3897_v19 = vmax.f32 %v3719_v37, %v3725_v7  ;;  %v4620_v41 = vrot.slane %v5388_v21, 7  ;;  %v7924_v18 = vpop.permute.xlu2 %2217  ;;  %v5218_v7 = vld [vmem:[#allocation2 + $0xd0] sm:$0xf]  ;;  %v5455_v21 = vld [vmem:[#allocation2 + $0xd4] sm:$0xf0] }
 0x282   :  { %v5293_v30 = vrot.slane %v3859_v25, 9  ;;  %v5294_v46 = vrot.slane %v3860_v62, 9  ;;  %v5295_v47 = vrot.slane %v3861_v27, 9  ;;  %v4623_v35 = vrot.slane %v5390_v15, 5 }
 0x283   :  { %v5328_v13 = vrot.slane %v3894_v39, 9  ;;  %v5329_v32 = vrot.slane %v3895_v11, 9  ;;  %v5391_v53 = vunpack.i.l.s16 %v4405_v40  ;;  %v4622_v54 = vsel %vm4564_vm15, %v4621_v24, %v4620_v41 }
 0x284   :  { %v4179_v28 = vmax.f32 %v3859_v25, %v5293_v30  ;;  %v5330_v55 = vrot.slane %v3896_v44, 9  ;;  %v4178_v52 = vmax.f32 %v3858_v16, %v5292_v34  ;;  %v5331_v37 = vrot.slane %v3897_v19, 9 }
 0x285   :  { %v1684_v42 = vpop.permute.xlu1 %1683  ;;  %v4214_v38 = vmax.f32 %v3894_v39, %v5328_v13  ;;  %v4215_v48 = vmax.f32 %v3895_v11, %v5329_v32  ;;  %v4180_v56 = vmax.f32 %v3860_v62, %v5294_v46  ;;  %v7928_v50 = vmax.f32 %v3861_v27, %v5295_v47  ;;  %v5090_v62 = vld [vmem:[%s8167_s0 + $0xc0] sm:$0xe]  ;;  %v5092_v13 = vld [vmem:[%s8167_s0 + $0xc8] sm:$0x1] }
 0x286   :  { %1752 = vst.msk [vmem:[#allocation2 + $0xe0] sm:$0xf] %vm8171_vm11, %v1684_v42  ;;  %v2745_v33 = vpop.permute.xlu0 %2744  ;;  %v4216_v0 = vmax.f32 %v3896_v44, %v5330_v55  ;;  %v4624_v3 = vsel %vm4567_vm0, %v4623_v35, %v4622_v54  ;;  %v4243_v4 = vpack.c.bf16 %v4179_v28, %v4179_v28  ;;  %v4625_v49 = vrot.slane %v5391_v53, 4  ;;  %v5091_v42 = vld [vmem:[%s8167_s0 + $0xc4] sm:$0xf] }
 0x287   :  { %2830 = vst.msk [vmem:[#allocation2 + $0x58] sm:$0xf] %vm2818_vm14, %v2745_v33  ;;  %v4278_v5 = vpack.c.bf16 %v4214_v38, %v4214_v38  ;;  %v4279_v60 = vpack.c.bf16 %v4215_v48, %v4215_v48  ;;  %v4217_v8 = vmax.f32 %v3897_v19, %v5331_v37  ;;  %vm4700_vm11 = vsmask.f32 4352  ;;  %v5154_v19 = vld [vmem:[#allocation2 + $0x50] sm:$0xf] }
 0x288   :  { %v4280_v10 = vpack.c.bf16 %v4216_v0, %v4216_v0  ;;  %v4242_v9 = vpack.c.bf16 %v4178_v52, %v4178_v52  ;;  %v4626_v27 = vsel %vm8172_vm1, %v4625_v49, %v4624_v3  ;;  %v4244_v15 = vpack.c.bf16 %v4180_v56, %v4180_v56  ;;  %vm7958_vm1 = vmand %vm4688_vm7, %vm4689_vm8 }
 0x289   :  { %v4406_v16 = vunpack.c.l.b16 %v4278_v5  ;;  %v4407_v17 = vunpack.c.l.b16 %v4279_v60  ;;  %v4245_v39 = vpack.c.bf16 %v7928_v50, %v7928_v50  ;;  %v7938_v24 = vpop.permute.xlu2 %2780  ;;  %v4371_v30 = vunpack.c.l.b16 %v4243_v4 }
 0x28a   :  { %v4408_v40 = vunpack.c.l.b16 %v4280_v10  ;;  %v3441_v44 = vadd.f32 %v7870_v20, %v3440_v12  ;;  %v4281_v41 = vpack.c.bf16 %v4217_v8, %v4217_v8  ;;  %v5219_v47 = vor.u32 %v5455_v21, %v5218_v7 }
 0x28b   :  { %v5392_v34 = vunpack.i.l.s16 %v4406_v16  ;;  %v5393_v11 = vunpack.i.l.s16 %v4407_v17  ;;  %v5110_v32 = vrot.slane %v5090_v62, 9  ;;  %v4370_v53 = vunpack.c.l.b16 %v4242_v9 }
 0x28c   :  { %v5394_v46 = vunpack.i.l.s16 %v4408_v40  ;;  %v3530_v33 = vadd.f32 %v7406_v23, %v3441_v44  ;;  %v4372_v52 = vunpack.c.l.b16 %v4244_v15  ;;  %3497 = vmatmul.bf16.gmra.mxu2 %v5219_v47  ;;  %v3047_v48 = vrot.slane %v5091_v42, 5 }
 0x28d   :  { %v2023_v25 = vpop.permute.xlu1 %2022  ;;  %v4627_v54 = vrot.slane %v5392_v34, 3  ;;  %v4629_v55 = vrot.slane %v5393_v11, 2  ;;  %v5357_v56 = vunpack.i.l.s16 %v4371_v30  ;;  %v3050_v3 = vrot.slane %v5092_v13, 5 }
 0x28e   :  { %2090 = vst.msk [vmem:[#allocation2 + $0xe8] sm:$0xf] %vm2060_vm12, %v2023_v25  ;;  %v2021_v35 = vpop.permute.xlu0 %2020  ;;  %v5439_v28 = vld [vmem:[#allocation2 + $0x54] sm:$0xf0]  ;;  %v4631_v37 = vrot.slane %v5394_v46, 1  ;;  %v3605_v0 = vmax.f32 %v3530_v33, 0.0  ;;  %v4409_v4 = vunpack.c.l.b16 %v4281_v41  ;;  %v3048_v23 = vsel %vm5856_vm5, %v5110_v32, %v3047_v48 }
 0x28f   :  { %2089 = vst.msk [vmem:[#allocation2 + $0xe0] sm:$0xf] %vm2060_vm12, %v2021_v35  ;;  %v5155_v38 = vor.u32 %v5439_v28, %v5154_v19  ;;  %v4628_v50 = vsel %vm4573_vm2, %v4627_v54, %v4626_v27  ;;  %v3049_v60 = vrot.slane %v3047_v48, 4  ;;  %v4373_v16 = vunpack.c.l.b16 %v4245_v39 }
 0x290   :  { %2286 = vst.msk [vmem:[#allocation2 + $0xe0] sm:$0xf] %vm2257_vm13, %v7924_v18  ;;  %v4630_v5 = vsel %vm8173_vm3, %v4629_v55, %v4628_v50  ;;  %v3675_v8 = vrot.slane %v3605_v0, 2  ;;  %v3676_v10 = vrot.slane %v3605_v0, 4  ;;  %v3677_v12 = vrot.slane %v3605_v0, 6  ;;  %vm7965_vm3 = vmand %vm4699_vm9, %vm4700_vm11 }
 0x291   :  { %3457 = vmatmul.bf16.gmra.mxu0 %v5155_v38  ;;  %v4632_v49 = vsel %vm4579_vm4, %v4631_v37, %v4630_v5  ;;  %3119 = vst.msk [vmem:[#allocation2 + $0xe4] sm:$0xf] %vm61_vm6, %v3048_v23  ;;  %v3862_v21 = vmax.f32 %v7909_v43, %v3605_v0  ;;  %v2186_v25 = vpop.permute.xlu2 %2185  ;;  %v3051_v62 = vsel %vm5856_vm5, %v3049_v60, %v3050_v3  ;;  %v5356_v27 = vunpack.i.l.s16 %v4370_v53 }
 0x292   :  { %v5424_v17 = vpack.c.b16 %v4409_v4, %v4632_v49  ;;  %v3863_v15 = vmax.f32 %v3669_v31, %v3675_v8  ;;  %v3864_v39 = vmax.f32 %v3670_v2, %v3676_v10  ;;  %v3865_v40 = vmax.f32 %v3671_v26, %v3677_v12  ;;  %3120 = vst.msk [vmem:[#allocation2 + $0xec] sm:$0xf] %vm61_vm6, %v3051_v62 }
 0x293   :  { %v5358_v30 = vunpack.i.l.s16 %v4372_v52  ;;  %v4563_v34 = vrot.slane %v5357_v56, 6  ;;  %v5296_v44 = vrot.slane %v3862_v21, 9  ;;  %v5359_v47 = vunpack.i.l.s16 %v4373_v16 }
 0x294   :  { %v4695_v11 = vsel %vm7958_vm1, 0, %v5424_v17  ;;  %v5297_v41 = vrot.slane %v3863_v15, 9  ;;  %v5298_v31 = vrot.slane %v3864_v39, 9  ;;  %v5299_v46 = vrot.slane %v3865_v40, 9 }
 0x295   :  { %v2779_v9 = vpop.permute.xlu1 %2778  ;;  %v4706_v42 = vsel %vm7965_vm3, %v4695_v11, 0  ;;  %v4182_v26 = vmax.f32 %v3862_v21, %v5296_v44  ;;  %v4562_v35 = vrot.slane %v5356_v27, 7  ;;  %v4566_v32 = vrot.slane %v5358_v30, 5  ;;  %v3572_v30 = vpop.f32.mrf.mxu3 }
 0x296   :  { %2847 = vst.msk [vmem:[#allocation2 + $0xe0] sm:$0xf] %vm2818_vm14, %v2779_v9  ;;  %v2220_v19 = vpop.permute.xlu0 %2219  ;;  %v4728_v2 = vunpack.c.l.b16 %v4706_v42  ;;  %v4729_v43 = vunpack.c.h.b16 %v4706_v42  ;;  %v4183_v28 = vmax.f32 %v3863_v15, %v5297_v41  ;;  %v4184_v13 = vmax.f32 %v3864_v39, %v5298_v31  ;;  %v3483_v44 = vpop.f32.mrf.mxu2 }
 0x297   :  { %2287 = vst.msk [vmem:[#allocation2 + $0xe8] sm:$0xf] %vm2257_vm13, %v2220_v19  ;;  %v4246_v55 = vpack.c.bf16 %v4182_v26, %v4182_v26  ;;  %v4565_v33 = vsel %vm4564_vm15, %v4563_v34, %v4562_v35  ;;  %v4185_v52 = vmax.f32 %v3865_v40, %v5299_v46  ;;  %v4569_v10 = vrot.slane %v5359_v47, 4 }
 0x298   :  { %2848 = vst.msk [vmem:[#allocation2 + $0xe8] sm:$0xf] %vm2818_vm14, %v7938_v24  ;;  %v4744_v53 = vpack.c.b16 %v4728_v2, %v4728_v2  ;;  %v4745_v54 = vpack.c.b16 %v4729_v43, %v4729_v43  ;;  %v4247_v37 = vpack.c.bf16 %v4183_v28, %v4183_v28  ;;  %v4248_v38 = vpack.c.bf16 %v4184_v13, %v4184_v13  ;;  %v5456_v56 = vld [vmem:[#allocation2 + $0xe4] sm:$0xf]  ;;  %v5094_v13 = vld [vmem:[%s8167_s0 + $0xd0] sm:$0xf] }
 0x299   :  { %v4374_v50 = vunpack.c.l.b16 %v4246_v55  ;;  %v2749_v0 = vpop.permute.xlu2 %2748  ;;  %v5228_v5 = vld [vmem:[#allocation2 + $0xe8] sm:$0xf0]  ;;  %v4568_v23 = vsel %vm4567_vm0, %v4566_v32, %v4565_v33  ;;  %v4249_v12 = vpack.c.bf16 %v4185_v52, %v4185_v52  ;;  %vm8182_vm11 = vcmask 1044484  }
 0x29a   :  { %4779 = vst [vmem:[#allocation3 + $0x28] sm:$0xf] %v4744_v53  ;;  %v4375_v24 = vunpack.c.l.b16 %v4247_v37  ;;  %v4376_v3 = vunpack.c.l.b16 %v4248_v38  ;;  %v5231_v8 = vor.u32 %v5456_v56, %v5228_v5  ;;  %v4571_v27 = vsel %vm8182_vm11, %v4569_v10, %v4568_v23  ;;  %v5093_v38 = vld [vmem:[%s8167_s0 + $0xcc] sm:$0xe] }
 0x29b   :  { %4780 = vst [vmem:[#allocation3 + $0x2c] sm:$0x1] %v4745_v54  ;;  %v5360_v60 = vunpack.i.l.s16 %v4374_v50  ;;  %v4377_v34 = vunpack.c.l.b16 %v4249_v12  ;;  %vm8183_vm7 = vcmask 1046534   ;;  %vm8184_vm8 = vcmask 650752  }
 0x29c   :  { %v5361_v9 = vunpack.i.l.s16 %v4375_v24  ;;  %v5362_v16 = vunpack.i.l.s16 %v4376_v3  ;;  %5290 = vmatmul.msk.bf16.gmra.mxu3 %vm3375_vm10, %v5231_v8  ;;  %v3054_v54 = vrot.slane %v5094_v13, 5  ;;  %v3484_v56 = vadd.f32 %v7870_v20, %v3483_v44  ;;  %vm8185_vm9 = vmmov %vm8184_vm8 }
 0x29d   :  { %v1991_v48 = vpop.permute.xlu1 %1990  ;;  %v5226_v4 = vld [vmem:[#allocation2 + $0xe0] sm:$0xf]  ;;  %v4572_v21 = vrot.slane %v5360_v60, 3  ;;  %v3574_v32 = vpop.f32.mrf.mxu3 }
 0x29e   :  { %2074 = vst.msk [vmem:[#allocation2 + $0x68] sm:$0xf] %vm2060_vm12, %v1991_v48  ;;  %v1989_v49 = vpop.permute.xlu0 %1988  ;;  %v4575_v15 = vrot.slane %v5361_v9, 2  ;;  %v4578_v39 = vrot.slane %v5362_v16, 1  ;;  %v3485_v55 = vpop.f32.mrf.mxu2  ;;  %v5095_v48 = vld [vmem:[%s8167_s0 + $0xd4] sm:$0x1]  ;;  %v3573_v60 = vadd.f32 %v3572_v30, %v3484_v56 }
 0x29f   :  { %2073 = vst.msk [vmem:[#allocation2 + $0x60] sm:$0xf] %vm2060_vm12, %v1989_v49  ;;  %v5457_v17 = vld [vmem:[#allocation2 + $0xe4] sm:$0xf0]  ;;  %v4574_v40 = vsel %vm4573_vm2, %v4572_v21, %v4571_v27  ;;  %v3443_v33 = vpop.f32.mrf.mxu0  ;;  %v3056_v24 = vrot.slane %v3054_v54, 4 }
 0x2a0   :  { %2270 = vst.msk [vmem:[#allocation2 + $0x60] sm:$0xf] %vm2257_vm13, %v2186_v25  ;;  %v5227_v62 = vor.u32 %v5457_v17, %v5226_v4  ;;  %v4577_v11 = vsel %vm8183_vm7, %v4575_v15, %v4574_v40  ;;  %v3057_v4 = vrot.slane %v5095_v48, 5  ;;  %v3622_v17 = vmax.f32 %v3573_v60, 0.0 }
 0x2a1   :  { %v4580_v42 = vsel %vm4579_vm4, %v4578_v39, %v4577_v11  ;;  %v2025_v25 = vpop.permute.xlu2 %2024  ;;  %v3444_v27 = vadd.f32 %v7870_v20, %v3443_v33 }
 0x2a2   :  { %3502 = vmatmul.bf16.gmra.mxu2 %v5227_v62  ;;  %v5420_v41 = vpack.c.b16 %v4377_v34, %v4580_v42  ;;  %v3058_v23 = vsel %vm5856_vm5, %v3056_v24, %v3057_v4  ;;  %v3486_v62 = vadd.f32 %v7870_v20, %v3485_v55  ;;  %v3726_v30 = vrot.slane %v3622_v17, 2 }
 0x2a3   :  { %3122 = vst.msk [vmem:[#allocation2 + $0xfc] sm:$0xf] %vm61_vm6, %v3058_v23  ;;  %v3727_v34 = vrot.slane %v3622_v17, 4  ;;  %v3728_v11 = vrot.slane %v3622_v17, 6 }
 0x2a4   :  { %v4691_v46 = vsel %vm7958_vm1, 0, %v5420_v41 }
 0x2a5   :  { %v2747_v19 = vpop.permute.xlu1 %2746  ;;  %v4702_v2 = vsel %vm7965_vm3, %v4691_v46, 0  ;;  %v3577_v8 = vpop.f32.mrf.mxu3  ;;  %v3533_v46 = vadd.f32 %v7459_v63, %v3444_v27 }
 0x2a6   :  { %2831 = vst.msk [vmem:[#allocation2 + $0x60] sm:$0xf] %vm2818_vm14, %v2747_v19  ;;  %v2188_v31 = vpop.permute.xlu0 %2187  ;;  %v4720_v43 = vunpack.c.l.b16 %v4702_v2  ;;  %v4721_v26 = vunpack.c.h.b16 %v4702_v2  ;;  %v3575_v2 = vadd.f32 %v3574_v32, %v3486_v62 }
 0x2a7   :  { %2271 = vst.msk [vmem:[#allocation2 + $0x68] sm:$0xf] %vm2257_vm13, %v2188_v31  ;;  %v8026_v21 = vpop.f32.mrf.mxu0  ;;  %v3606_v56 = vmax.f32 %v3533_v46, 0.0 }
 0x2a8   :  { %2832 = vst.msk [vmem:[#allocation2 + $0x68] sm:$0xf] %vm2818_vm14, %v2749_v0  ;;  %v4736_v47 = vpack.c.b16 %v4720_v43, %v4720_v43  ;;  %v4737_v35 = vpack.c.b16 %v4721_v26, %v4721_v26  ;;  %v5111_v0 = vrot.slane %v5093_v38, 9  ;;  %v3623_v63 = vmax.f32 %v3575_v2, 0.0 }
 0x2a9   :  { %v2224_v53 = vpop.permute.xlu2 %2223  ;;  %v3446_v2 = vadd.f32 %v7870_v20, %v8026_v21 }
 0x2aa   :  { %4771 = vst [vmem:[#allocation3 + $0x8] sm:$0xf] %v4736_v47  ;;  %v3055_v5 = vsel %vm5856_vm5, %v5111_v0, %v3054_v54  ;;  %v5236_v40 = vld [vmem:[#allocation2 + $0xf8] sm:$0xf0]  ;;  %v3731_v46 = vrot.slane %v3623_v63, 6  ;;  %vm8186_vm5 = vmmov %vm8182_vm11 }
 0x2ab   :  { %4772 = vst [vmem:[#allocation3 + $0xc] sm:$0x1] %v4737_v35 }
 0x2ac   :  { %3121 = vst.msk [vmem:[#allocation2 + $0xf4] sm:$0xf] %vm61_vm6, %v3055_v5  ;;  %vm8187_vm6 = vmmov %vm8183_vm7 }
 0x2ad   :  { %v1690_v28 = vpop.permute.xlu1 %1689  ;;  %v5162_v52 = vld [vmem:[#allocation2 + $0x60] sm:$0xf]  ;;  %vm8192_vm11 = vmmov %vm8187_vm6 }
 0x2ae   :  { %1755 = vst.msk [vmem:[#allocation2 + $0xf8] sm:$0xf] %vm8184_vm8, %v1690_v28  ;;  %v1688_v37 = vpop.permute.xlu0 %1687  ;;  %vm8193_vm7 = vmmov %vm8187_vm6 }
 0x2af   :  { %1754 = vst.msk [vmem:[#allocation2 + $0xf0] sm:$0xf] %vm8185_vm9, %v1688_v37  ;;  %v5441_v50 = vld [vmem:[#allocation2 + $0x64] sm:$0xf0]  ;;  %vm8196_vm8 = vmmov %vm8187_vm6 }
 0x2b0   :  { %v5163_v3 = vor.u32 %v5441_v50, %v5162_v52  ;;  %2091 = vst.msk [vmem:[#allocation2 + $0xf0] sm:$0xf] %vm2060_vm12, %v2025_v25  ;;  %vm8197_vm9 = vmmov %vm8187_vm6 }
 0x2b1   :  { %v1993_v10 = vpop.permute.xlu2 %1992 }
 0x2b2   :  { %3462 = vmatmul.bf16.gmra.mxu0 %v5163_v3  ;;  %2075 = vst.msk [vmem:[#allocation2 + $0x70] sm:$0xf] %vm2060_vm12, %v1993_v10  ;;  %v3730_v10 = vrot.slane %v3623_v63, 4 }
 0x2b3   :  { %v5458_v15 = vld [vmem:[#allocation2 + $0xf4] sm:$0xf] }
 0x2b4   :  { %v5239_v19 = vor.u32 %v5458_v15, %v5236_v40 }
 0x2b5   :  { %v2222_v49 = vpop.permute.xlu1 %2221  ;;  %v3488_v12 = vpop.f32.mrf.mxu2 }
 0x2b6   :  { %2288 = vst.msk [vmem:[#allocation2 + $0xf0] sm:$0xf] %vm2257_vm13, %v2222_v49  ;;  %v3489_v9 = vadd.f32 %v7870_v20, %v3488_v12  ;;  %v2027_v16 = vpop.permute.xlu0 %2026  ;;  %5291 = vmatmul.msk.bf16.gmra.mxu3 %vm3375_vm10, %v5239_v19  ;;  %vm8188_vm10 = vmmov %vm8186_vm5 }
 0x2b7   :  { %2092 = vst.msk [vmem:[#allocation2 + $0xf8] sm:$0xf] %vm2060_vm12, %v2027_v16  ;;  %v3678_v16 = vrot.slane %v3606_v56, 2 }
 0x2b8   :  { %v3578_v59 = vadd.f32 %v3577_v8, %v3489_v9  ;;  %2289 = vst.msk [vmem:[#allocation2 + $0xf8] sm:$0xf] %vm2257_vm13, %v2224_v53  ;;  %v3579_v53 = vpop.f32.mrf.mxu3  ;;  %v3729_v8 = vrot.slane %v3623_v63, 2 }
 0x2b9   :  { %v2192_v9 = vpop.permute.xlu2 %2191 }
 0x2ba   :  { %v3624_v39 = vmax.f32 %v3578_v59, 0.0 }
 0x2bc   :  { %v3732_v42 = vrot.slane %v3624_v39, 2  ;;  %v3733_v25 = vrot.slane %v3624_v39, 4  ;;  %v3734_v41 = vrot.slane %v3624_v39, 6  ;;  %v3898_v31 = vmax.f32 %v3622_v17, %v3624_v39 }
 0x2bd   :  { %v2785_v44 = vpop.permute.xlu1 %2784  ;;  %v3490_v43 = vpop.f32.mrf.mxu2  ;;  %v3679_v17 = vrot.slane %v3606_v56, 4 }
 0x2be   :  { %2850 = vst.msk [vmem:[#allocation2 + $0xf8] sm:$0xf] %vm2818_vm14, %v2785_v44  ;;  %v3899_v26 = vmax.f32 %v3726_v30, %v3732_v42  ;;  %v3900_v47 = vmax.f32 %v3727_v34, %v3733_v25  ;;  %v3901_v35 = vmax.f32 %v3728_v11, %v3734_v41  ;;  %v5332_v28 = vrot.slane %v3898_v31, 9  ;;  %v2783_v13 = vpop.permute.xlu0 %2782 }
 0x2bf   :  { %v3491_v54 = vadd.f32 %v7870_v20, %v3490_v43  ;;  %2849 = vst.msk [vmem:[#allocation2 + $0xf0] sm:$0xf] %vm2818_vm14, %v2783_v13  ;;  %v3448_v55 = vpop.f32.mrf.mxu0 }
 0x2c0   :  { %v5333_v33 = vrot.slane %v3899_v26, 9  ;;  %v5334_v52 = vrot.slane %v3900_v47, 9  ;;  %v5335_v37 = vrot.slane %v3901_v35, 9  ;;  %v4218_v38 = vmax.f32 %v3898_v31, %v5332_v28 }
 0x2c1   :  { %v3449_v32 = vadd.f32 %v7870_v20, %v3448_v55  ;;  %v3580_v48 = vadd.f32 %v3579_v53, %v3491_v54  ;;  %v3680_v31 = vrot.slane %v3606_v56, 6 }
 0x2c2   :  { %v4219_v50 = vmax.f32 %v3899_v26, %v5333_v33  ;;  %v4220_v0 = vmax.f32 %v3900_v47, %v5334_v52  ;;  %v4221_v24 = vmax.f32 %v3901_v35, %v5335_v37  ;;  %v4282_v3 = vpack.c.bf16 %v4218_v38, %v4218_v38 }
 0x2c3   :  { %v3538_v4 = vadd.f32 %v7524_v58, %v3449_v32  ;;  %v3625_v49 = vmax.f32 %v3580_v48, 0.0  ;;  %v3535_v32 = vadd.f32 %v7481_v29, %v3446_v2 }
 0x2c4   :  { %v4283_v23 = vpack.c.bf16 %v4219_v50, %v4219_v50  ;;  %v4284_v60 = vpack.c.bf16 %v4220_v0, %v4220_v0  ;;  %v4285_v59 = vpack.c.bf16 %v4221_v24, %v4221_v24  ;;  %v4410_v15 = vunpack.c.l.b16 %v4282_v3 }
 0x2c5   :  { %v2190_v5 = vpop.permute.xlu1 %2189  ;;  %v3608_v12 = vmax.f32 %v3538_v4, 0.0  ;;  %v3735_v34 = vrot.slane %v3625_v49, 2  ;;  %v3736_v11 = vrot.slane %v3625_v49, 4  ;;  %v3737_v44 = vrot.slane %v3625_v49, 6 }
 0x2c6   :  { %2272 = vst.msk [vmem:[#allocation2 + $0x70] sm:$0xf] %vm2257_vm13, %v2190_v5  ;;  %v4411_v62 = vunpack.c.l.b16 %v4283_v23  ;;  %v1995_v27 = vpop.permute.xlu0 %1994  ;;  %v4412_v39 = vunpack.c.l.b16 %v4284_v60  ;;  %v3902_v43 = vmax.f32 %v3623_v63, %v3625_v49  ;;  %v4413_v26 = vunpack.c.l.b16 %v4285_v59 }
 0x2c7   :  { %v3684_v40 = vrot.slane %v3608_v12, 2  ;;  %v3685_v30 = vrot.slane %v3608_v12, 4  ;;  %2076 = vst.msk [vmem:[#allocation2 + $0x78] sm:$0xf] %vm2060_vm12, %v1995_v27  ;;  %v3686_v58 = vrot.slane %v3608_v12, 6  ;;  %v3866_v42 = vmax.f32 %v3606_v56, %v3608_v12  ;;  %v3450_v27 = vpop.f32.mrf.mxu0  ;;  %vm8189_vm12 = vmmov %vm8187_vm6 }
 0x2c8   :  { %2273 = vst.msk [vmem:[#allocation2 + $0x78] sm:$0xf] %vm2257_vm13, %v2192_v9  ;;  %v5397_v19 = vunpack.i.l.s16 %v4411_v62  ;;  %v5396_v47 = vunpack.i.l.s16 %v4410_v15  ;;  %v5398_v35 = vunpack.i.l.s16 %v4412_v39  ;;  %v3903_v54 = vmax.f32 %v3729_v8, %v3735_v34  ;;  %v5459_v15 = vld [vmem:[#allocation2 + $0xf4] sm:$0xf0]  ;;  %v5234_v34 = vld [vmem:[#allocation2 + $0xf0] sm:$0xf]  ;;  %vm8190_vm13 = vmmov %vm8186_vm5 }
 0x2c9   :  { %v3867_v25 = vmax.f32 %v3678_v16, %v3684_v40  ;;  %v3868_v41 = vmax.f32 %v3679_v17, %v3685_v30  ;;  %v3869_v53 = vmax.f32 %v3680_v31, %v3686_v58  ;;  %v3904_v55 = vmax.f32 %v3730_v10, %v3736_v11 }
 0x2ca   :  { %v3905_v33 = vmax.f32 %v3731_v46, %v3737_v44  ;;  %v4634_v52 = vrot.slane %v5397_v19, 6  ;;  %v5300_v37 = vrot.slane %v3866_v42, 9  ;;  %v5336_v56 = vrot.slane %v3902_v43, 9 }
 0x2cb   :  { %v5301_v28 = vrot.slane %v3867_v25, 9  ;;  %v5302_v38 = vrot.slane %v3868_v41, 9  ;;  %v5337_v21 = vrot.slane %v3903_v54, 9  ;;  %v5399_v50 = vunpack.i.l.s16 %v4413_v26 }
 0x2cc   :  { %v4633_v0 = vrot.slane %v5396_v47, 7  ;;  %v4636_v24 = vrot.slane %v5398_v35, 5  ;;  %v5338_v3 = vrot.slane %v3904_v55, 9  ;;  %v5303_v4 = vrot.slane %v3869_v53, 9 }
 0x2cd   :  { %v2753_v13 = vpop.permute.xlu1 %2752  ;;  %v4187_v48 = vmax.f32 %v3867_v25, %v5301_v28  ;;  %v5339_v5 = vrot.slane %v3905_v33, 9  ;;  %v4222_v23 = vmax.f32 %v3902_v43, %v5336_v56  ;;  %v4223_v60 = vmax.f32 %v3903_v54, %v5337_v21 }
 0x2ce   :  { %2834 = vst.msk [vmem:[#allocation2 + $0x78] sm:$0xf] %vm2818_vm14, %v2753_v13  ;;  %v2751_v63 = vpop.permute.xlu0 %2750  ;;  %v4635_v49 = vsel %vm4564_vm15, %v4634_v52, %v4633_v0  ;;  %v4186_v8 = vmax.f32 %v3866_v42, %v5300_v37  ;;  %v4188_v10 = vmax.f32 %v3868_v41, %v5302_v38  ;;  %v4224_v12 = vmax.f32 %v3904_v55, %v5338_v3 }
 0x2cf   :  { %2833 = vst.msk [vmem:[#allocation2 + $0x70] sm:$0xf] %vm2818_vm14, %v2751_v63  ;;  %v4251_v29 = vpack.c.bf16 %v4187_v48, %v4187_v48  ;;  %v4286_v9 = vpack.c.bf16 %v4222_v23, %v4222_v23  ;;  %v4287_v16 = vpack.c.bf16 %v4223_v60, %v4223_v60  ;;  %v3607_v17 = vmax.f32 %v3535_v32, 0.0  ;;  %vm8191_vm14 = vmmov %vm8186_vm5 }
 0x2d0   :  { %v4225_v59 = vmax.f32 %v3905_v33, %v5339_v5  ;;  %v4288_v62 = vpack.c.bf16 %v4224_v12, %v4224_v12  ;;  %v4637_v39 = vsel %vm4567_vm0, %v4636_v24, %v4635_v49  ;;  %v4638_v40 = vrot.slane %v5399_v50, 4 }
 0x2d1   :  { %v4414_v30 = vunpack.c.l.b16 %v4286_v9  ;;  %v4415_v58 = vunpack.c.l.b16 %v4287_v16  ;;  %v4189_v44 = vmax.f32 %v3869_v53, %v5303_v4  ;;  %v4250_v19 = vpack.c.bf16 %v4186_v8, %v4186_v8 }
 0x2d2   :  { %v4252_v42 = vpack.c.bf16 %v4188_v10, %v4188_v10  ;;  %v4416_v25 = vunpack.c.l.b16 %v4288_v62  ;;  %v4379_v41 = vunpack.c.l.b16 %v4251_v29  ;;  %v3451_v2 = vadd.f32 %v7870_v20, %v3450_v27 }
 0x2d3   :  { %v5400_v31 = vunpack.i.l.s16 %v4414_v30  ;;  %v5401_v46 = vunpack.i.l.s16 %v4415_v58  ;;  %v4289_v26 = vpack.c.bf16 %v4225_v59, %v4225_v59  ;;  %v5235_v35 = vor.u32 %v5459_v15, %v5234_v34 }
 0x2d4   :  { %v5402_v47 = vunpack.i.l.s16 %v4416_v25  ;;  %v3681_v13 = vrot.slane %v3607_v17, 2  ;;  %v3540_v33 = vadd.f32 %v7571_v36, %v3451_v2  ;;  %v3682_v52 = vrot.slane %v3607_v17, 4 }
 0x2d5   :  { %v5443_v11 = vld [vmem:[#allocation2 + $0x74] sm:$0xf0]  ;;  %v4640_v54 = vrot.slane %v5400_v31, 3  ;;  %v4642_v55 = vrot.slane %v5401_v46, 2  ;;  %v4639_v53 = vsel %vm8186_vm5, %v4638_v40, %v4637_v39  ;;  %v4253_v37 = vpack.c.bf16 %v4189_v44, %v4189_v44  ;;  %3507 = vmatmul.bf16.gmra.mxu2 %v5235_v35 }
 0x2d6   :  { %v5170_v43 = vld [vmem:[#allocation2 + $0x70] sm:$0xf]  ;;  %v4644_v38 = vrot.slane %v5402_v47, 1  ;;  %v3683_v32 = vrot.slane %v3607_v17, 6  ;;  %v4378_v48 = vunpack.c.l.b16 %v4250_v19  ;;  %v3609_v56 = vmax.f32 %v3540_v33, 0.0 }
 0x2d7   :  { %v5171_v28 = vor.u32 %v5443_v11, %v5170_v43  ;;  %v4641_v20 = vsel %vm4573_vm2, %v4640_v54, %v4639_v53  ;;  %v4380_v21 = vunpack.c.l.b16 %v4252_v42  ;;  %v5365_v63 = vunpack.i.l.s16 %v4379_v41 }
 0x2d8   :  { %v4417_v50 = vunpack.c.l.b16 %v4289_v26  ;;  %v4643_v0 = vsel %vm8187_vm6, %v4642_v55, %v4641_v20  ;;  %v3687_v36 = vrot.slane %v3609_v56, 2  ;;  %v3688_v3 = vrot.slane %v3609_v56, 4 }
 0x2d9   :  { %3467 = vmatmul.bf16.gmra.mxu0 %v5171_v28  ;;  %v4645_v24 = vsel %vm4579_vm4, %v4644_v38, %v4643_v0  ;;  %v3689_v4 = vrot.slane %v3609_v56, 6  ;;  %v4381_v5 = vunpack.c.l.b16 %v4253_v37  ;;  %v3870_v60 = vmax.f32 %v3607_v17, %v3609_v56 }
 0x2da   :  { %v5425_v23 = vpack.c.b16 %v4417_v50, %v4645_v24  ;;  %v5364_v49 = vunpack.i.l.s16 %v4378_v48  ;;  %v3871_v8 = vmax.f32 %v3681_v13, %v3687_v36  ;;  %v3872_v10 = vmax.f32 %v3682_v52, %v3688_v3 }
 0x2db   :  { %v3873_v12 = vmax.f32 %v3683_v32, %v3689_v4  ;;  %v5366_v29 = vunpack.i.l.s16 %v4380_v21  ;;  %v4582_v9 = vrot.slane %v5365_v63, 6  ;;  %v5304_v59 = vrot.slane %v3870_v60, 9 }
 0x2dc   :  { %v4696_v16 = vsel %vm7958_vm1, 0, %v5425_v23  ;;  %v5305_v27 = vrot.slane %v3871_v8, 9  ;;  %v5306_v15 = vrot.slane %v3872_v10, 9  ;;  %v5367_v17 = vunpack.i.l.s16 %v4381_v5  ;;  %v3493_v23 = vpop.f32.mrf.mxu2 }
 0x2dd   :  { %v4707_v62 = vsel %vm7965_vm3, %v4696_v16, 0  ;;  %v5307_v39 = vrot.slane %v3873_v12, 9  ;;  %v4190_v58 = vmax.f32 %v3870_v60, %v5304_v59  ;;  %v4581_v34 = vrot.slane %v5364_v49, 7  ;;  %v3582_v60 = vpop.f32.mrf.mxu3 }
 0x2de   :  { %v4730_v40 = vunpack.c.l.b16 %v4707_v62  ;;  %v4731_v30 = vunpack.c.h.b16 %v4707_v62  ;;  %v4191_v11 = vmax.f32 %v3871_v8, %v5305_v27  ;;  %v4192_v44 = vmax.f32 %v3872_v10, %v5306_v15  ;;  %v8072_v8 = vld [vmem:[%s8169_s2] ss:$0 sm:$0xff] }
 0x2df   :  { %v4584_v19 = vrot.slane %v5366_v29, 5  ;;  %v4254_v41 = vpack.c.bf16 %v4190_v58, %v4190_v58  ;;  %v4583_v31 = vsel %vm4564_vm15, %v4582_v9, %v4581_v34  ;;  %v4193_v46 = vmax.f32 %v3873_v12, %v5307_v39 }
 0x2e0   :  { %v4746_v42 = vpack.c.b16 %v4730_v40, %v4730_v40  ;;  %v4747_v25 = vpack.c.b16 %v4731_v30, %v4731_v30  ;;  %v4255_v2 = vpack.c.bf16 %v4191_v11, %v4191_v11  ;;  %v4256_v43 = vpack.c.bf16 %v4192_v44, %v4192_v44 }
 0x2e1   :  { %v4382_v26 = vunpack.c.l.b16 %v4254_v41  ;;  %v4585_v28 = vsel %vm4567_vm0, %v4584_v19, %v4583_v31  ;;  %v4586_v54 = vrot.slane %v5367_v17, 4  ;;  %v4257_v55 = vpack.c.bf16 %v4193_v46, %v4193_v46 }
 0x2e2   :  { %4781 = vst [vmem:[#allocation3 + $0x30] sm:$0xf] %v4746_v42  ;;  %v4383_v47 = vunpack.c.l.b16 %v4255_v2  ;;  %v4384_v35 = vunpack.c.l.b16 %v4256_v43  ;;  %v3494_v12 = vadd.f32 %v8072_v8, %v3493_v23 }
 0x2e3   :  { %4782 = vst [vmem:[#allocation3 + $0x34] sm:$0x1] %v4747_v25  ;;  %v5368_v13 = vunpack.i.l.s16 %v4382_v26  ;;  %v4587_v37 = vsel %vm8188_vm10, %v4586_v54, %v4585_v28  ;;  %v4385_v20 = vunpack.c.l.b16 %v4257_v55 }
 0x2e4   :  { %v5369_v33 = vunpack.i.l.s16 %v4383_v47  ;;  %v5370_v52 = vunpack.i.l.s16 %v4384_v35  ;;  %v3495_v29 = vpop.f32.mrf.mxu2  ;;  %v3583_v59 = vadd.f32 %v3582_v60, %v3494_v12 }
 0x2e5   :  { %v4588_v53 = vrot.slane %v5368_v13, 3  ;;  %v3584_v9 = vpop.f32.mrf.mxu3  ;;  %v3496_v15 = vadd.f32 %v8072_v8, %v3495_v29 }
 0x2e6   :  { %v4590_v38 = vrot.slane %v5369_v33, 2  ;;  %v4592_v32 = vrot.slane %v5370_v52, 1  ;;  %v3453_v5 = vpop.f32.mrf.mxu0  ;;  %v3626_v30 = vmax.f32 %v3583_v59, 0.0 }
 0x2e7   :  { %v4589_v48 = vsel %vm4573_vm2, %v4588_v53, %v4587_v37  ;;  %v3454_v10 = vadd.f32 %v8072_v8, %v3453_v5  ;;  %v3585_v25 = vadd.f32 %v3584_v9, %v3496_v15 }
 0x2e8   :  { %v4591_v56 = vsel %vm8189_vm12, %v4590_v38, %v4589_v48  ;;  %v3738_v2 = vrot.slane %v3626_v30, 2  ;;  %v3739_v43 = vrot.slane %v3626_v30, 4  ;;  %v3740_v13 = vrot.slane %v3626_v30, 6 }
 0x2e9   :  { %v4593_v21 = vsel %vm4579_vm4, %v4592_v32, %v4591_v56  ;;  %v3543_v16 = vadd.f32 %v7616_v57, %v3454_v10  ;;  %v8081_v54 = vmax.f32 %v3585_v25, 0.0 }
 0x2ea   :  { %v5421_v63 = vpack.c.b16 %v4385_v20, %v4593_v21 }
 0x2eb   :  { %v3610_v39 = vmax.f32 %v3543_v16, 0.0 }
 0x2ec   :  { %v4692_v50 = vsel %vm7958_vm1, 0, %v5421_v63 }
 0x2ed   :  { %v4703_v0 = vsel %vm7965_vm3, %v4692_v50, 0  ;;  %v3587_v17 = vpop.f32.mrf.mxu3  ;;  %v3690_v44 = vrot.slane %v3610_v39, 2  ;;  %v3691_v19 = vrot.slane %v3610_v39, 4  ;;  %v3692_v42 = vrot.slane %v3610_v39, 6 }
 0x2ee   :  { %v4722_v24 = vunpack.c.l.b16 %v4703_v0  ;;  %v4723_v36 = vunpack.c.h.b16 %v4703_v0  ;;  %v3455_v49 = vpop.f32.mrf.mxu0 }
 0x2ef   :  { %v3456_v55 = vadd.f32 %v8072_v8, %v3455_v49 }
 0x2f0   :  { %v4738_v3 = vpack.c.b16 %v4722_v24, %v4722_v24  ;;  %v4739_v4 = vpack.c.b16 %v4723_v36, %v4723_v36 }
 0x2f1   :  { %v3545_v24 = vadd.f32 %v7650_v51, %v3456_v55  ;;  %v3743_v55 = vrot.slane %v8081_v54, 6 }
 0x2f2   :  { %4773 = vst [vmem:[#allocation3 + $0x10] sm:$0xf] %v4738_v3 }
 0x2f3   :  { %4774 = vst [vmem:[#allocation3 + $0x14] sm:$0x1] %v4739_v4 }
 0x30e   :  { %v3458_v62 = vpop.f32.mrf.mxu0 }
 0x30f   :  { %v3459_v27 = vadd.f32 %v8072_v8, %v3458_v62  ;;  %v3498_v58 = vpop.f32.mrf.mxu2 }
 0x310   :  { %v3499_v34 = vadd.f32 %v8072_v8, %v3498_v58 }
 0x311   :  { %v3548_v40 = vadd.f32 %v7689_v14, %v3459_v27 }
 0x312   :  { %v3588_v57 = vadd.f32 %v3587_v17, %v3499_v34 }
 0x313   :  { %v3612_v11 = vmax.f32 %v3548_v40, 0.0 }
 0x314   :  { %v3628_v47 = vmax.f32 %v3588_v57, 0.0  ;;  %v3611_v57 = vmax.f32 %v3545_v24, 0.0 }
 0x315   :  { %v3696_v41 = vrot.slane %v3612_v11, 2  ;;  %v3697_v31 = vrot.slane %v3612_v11, 4  ;;  %v3698_v46 = vrot.slane %v3612_v11, 6  ;;  %v3874_v26 = vmax.f32 %v3610_v39, %v3612_v11 }
 0x316   :  { %v3744_v52 = vrot.slane %v3628_v47, 2  ;;  %v3745_v53 = vrot.slane %v3628_v47, 4  ;;  %v3746_v37 = vrot.slane %v3628_v47, 6  ;;  %v3906_v38 = vmax.f32 %v3626_v30, %v3628_v47  ;;  %v3460_v39 = vpop.f32.mrf.mxu0 }
 0x317   :  { %v3875_v35 = vmax.f32 %v3690_v44, %v3696_v41  ;;  %v3876_v14 = vmax.f32 %v3691_v19, %v3697_v31  ;;  %v3877_v28 = vmax.f32 %v3692_v42, %v3698_v46  ;;  %v5308_v33 = vrot.slane %v3874_v26, 9  ;;  %v3500_v15 = vpop.f32.mrf.mxu2 }
 0x318   :  { %v3907_v21 = vmax.f32 %v3738_v2, %v3744_v52  ;;  %v3908_v63 = vmax.f32 %v3739_v43, %v3745_v53  ;;  %v3909_v50 = vmax.f32 %v3740_v13, %v3746_v37  ;;  %v5340_v0 = vrot.slane %v3906_v38, 9  ;;  %v3589_v2 = vpop.f32.mrf.mxu3 }
 0x319   :  { %v5309_v32 = vrot.slane %v3875_v35, 9  ;;  %v5310_v48 = vrot.slane %v3876_v14, 9  ;;  %v5311_v20 = vrot.slane %v3877_v28, 9  ;;  %v4194_v56 = vmax.f32 %v3874_v26, %v5308_v33 }
 0x31a   :  { %v5341_v5 = vrot.slane %v3907_v21, 9  ;;  %v5342_v23 = vrot.slane %v3908_v63, 9  ;;  %v5343_v60 = vrot.slane %v3909_v50, 9  ;;  %v4226_v49 = vmax.f32 %v3906_v38, %v5340_v0 }
 0x31b   :  { %v4195_v36 = vmax.f32 %v3875_v35, %v5309_v32  ;;  %v4196_v3 = vmax.f32 %v3876_v14, %v5310_v48  ;;  %v4197_v4 = vmax.f32 %v3877_v28, %v5311_v20  ;;  %v4258_v10 = vpack.c.bf16 %v4194_v56, %v4194_v56 }
 0x31c   :  { %v4227_v16 = vmax.f32 %v3907_v21, %v5341_v5  ;;  %v4228_v59 = vmax.f32 %v3908_v63, %v5342_v23  ;;  %v4229_v62 = vmax.f32 %v3909_v50, %v5343_v60  ;;  %v4290_v27 = vpack.c.bf16 %v4226_v49, %v4226_v49 }
 0x31d   :  { %v4259_v12 = vpack.c.bf16 %v4195_v36, %v4195_v36  ;;  %v4260_v29 = vpack.c.bf16 %v4196_v3, %v4196_v3  ;;  %v4261_v9 = vpack.c.bf16 %v4197_v4, %v4197_v4  ;;  %v4386_v40 = vunpack.c.l.b16 %v4258_v10 }
 0x31e   :  { %v4291_v17 = vpack.c.bf16 %v4227_v16, %v4227_v16  ;;  %v4292_v34 = vpack.c.bf16 %v4228_v59, %v4228_v59  ;;  %v4293_v11 = vpack.c.bf16 %v4229_v62, %v4229_v62  ;;  %v4418_v44 = vunpack.c.l.b16 %v4290_v27 }
 0x31f   :  { %v4387_v30 = vunpack.c.l.b16 %v4259_v12  ;;  %v4388_v51 = vunpack.c.l.b16 %v4260_v29  ;;  %v4389_v58 = vunpack.c.l.b16 %v4261_v9  ;;  %v3501_v19 = vadd.f32 %v8072_v8, %v3500_v15 }
 0x320   :  { %v3461_v25 = vadd.f32 %v8072_v8, %v3460_v39  ;;  %v4419_v41 = vunpack.c.l.b16 %v4291_v17  ;;  %v4420_v31 = vunpack.c.l.b16 %v4292_v34  ;;  %v5372_v46 = vunpack.i.l.s16 %v4386_v40 }
 0x321   :  { %v5373_v42 = vunpack.i.l.s16 %v4387_v30  ;;  %v3741_v43 = vrot.slane %v8081_v54, 2  ;;  %v3742_v26 = vrot.slane %v8081_v54, 4  ;;  %v5374_v47 = vunpack.i.l.s16 %v4388_v51 }
 0x322   :  { %v4421_v35 = vunpack.c.l.b16 %v4293_v11  ;;  %v5404_v14 = vunpack.i.l.s16 %v4418_v44  ;;  %v5375_v28 = vunpack.i.l.s16 %v4389_v58  ;;  %v5405_v33 = vunpack.i.l.s16 %v4419_v41 }
 0x323   :  { %v4595_v13 = vrot.slane %v5373_v42, 6  ;;  %v3590_v52 = vadd.f32 %v3589_v2, %v3501_v19  ;;  %v3550_v53 = vadd.f32 %v7729_v61, %v3461_v25  ;;  %v3693_v37 = vrot.slane %v3611_v57, 2 }
 0x324   :  { %v3694_v38 = vrot.slane %v3611_v57, 4  ;;  %v5406_v32 = vunpack.i.l.s16 %v4420_v31  ;;  %v4594_v48 = vrot.slane %v5372_v46, 7  ;;  %v3695_v20 = vrot.slane %v3611_v57, 6 }
 0x325   :  { %v4597_v56 = vrot.slane %v5374_v47, 5  ;;  %v3629_v21 = vmax.f32 %v3590_v52, 0.0  ;;  %v3613_v63 = vmax.f32 %v3550_v53, 0.0  ;;  %v5407_v50 = vunpack.i.l.s16 %v4421_v35 }
 0x326   :  { %v4646_v0 = vrot.slane %v5404_v14, 7  ;;  %v4596_v24 = vsel %vm4564_vm15, %v4595_v13, %v4594_v48  ;;  %v8092_v36 = vrot.slane %v5375_v28, 4  ;;  %v4647_v3 = vrot.slane %v5405_v33, 6 }
 0x327   :  { %v3747_v4 = vrot.slane %v3629_v21, 2  ;;  %v3748_v5 = vrot.slane %v3629_v21, 4  ;;  %v3749_v23 = vrot.slane %v3629_v21, 6  ;;  %v4649_v60 = vrot.slane %v5406_v32, 5 }
 0x328   :  { %v3910_v61 = vmax.f32 %v8081_v54, %v3629_v21  ;;  %v3699_v49 = vrot.slane %v3613_v63, 2  ;;  %v3700_v10 = vrot.slane %v3613_v63, 4  ;;  %v3701_v16 = vrot.slane %v3613_v63, 6 }
 0x329   :  { %v3911_v12 = vmax.f32 %v3741_v43, %v3747_v4  ;;  %v3912_v29 = vmax.f32 %v3742_v26, %v3748_v5  ;;  %v3913_v9 = vmax.f32 %v3743_v55, %v3749_v23  ;;  %v3878_v62 = vmax.f32 %v3611_v57, %v3613_v63 }
 0x32a   :  { %v5344_v59 = vrot.slane %v3910_v61, 9  ;;  %v3879_v27 = vmax.f32 %v3693_v37, %v3699_v49  ;;  %v3880_v15 = vmax.f32 %v3694_v38, %v3700_v10  ;;  %v3881_v51 = vmax.f32 %v3695_v20, %v3701_v16 }
 0x32b   :  { %v5345_v39 = vrot.slane %v3911_v12, 9  ;;  %v5346_v40 = vrot.slane %v3912_v29, 9  ;;  %v5347_v30 = vrot.slane %v3913_v9, 9  ;;  %v5312_v17 = vrot.slane %v3878_v62, 9 }
 0x32c   :  { %v4230_v58 = vmax.f32 %v3910_v61, %v5344_v59  ;;  %v5313_v34 = vrot.slane %v3879_v27, 9  ;;  %v5314_v11 = vrot.slane %v3880_v15, 9  ;;  %v4648_v54 = vsel %vm4564_vm15, %v4647_v3, %v4646_v0 }
 0x32d   :  { %v4231_v44 = vmax.f32 %v3911_v12, %v5345_v39  ;;  %v4232_v19 = vmax.f32 %v3912_v29, %v5346_v40  ;;  %v5315_v42 = vrot.slane %v3881_v51, 9  ;;  %v4198_v41 = vmax.f32 %v3878_v62, %v5312_v17 }
 0x32e   :  { %v4294_v25 = vpack.c.bf16 %v4230_v58, %v4230_v58  ;;  %v4199_v31 = vmax.f32 %v3879_v27, %v5313_v34  ;;  %v4200_v46 = vmax.f32 %v3880_v15, %v5314_v11  ;;  %v4651_v57 = vrot.slane %v5407_v50, 4 }
 0x32f   :  { %v4233_v2 = vmax.f32 %v3913_v9, %v5347_v30  ;;  %v4295_v43 = vpack.c.bf16 %v4231_v44, %v4231_v44  ;;  %v4296_v26 = vpack.c.bf16 %v4232_v19, %v4232_v19  ;;  %v4262_v35 = vpack.c.bf16 %v4198_v41, %v4198_v41 }
 0x330   :  { %v4422_v47 = vunpack.c.l.b16 %v4294_v25  ;;  %v4263_v14 = vpack.c.bf16 %v4199_v31, %v4199_v31  ;;  %v4264_v28 = vpack.c.bf16 %v4200_v46, %v4200_v46  ;;  %v4650_v13 = vsel %vm4567_vm0, %v4649_v60, %v4648_v54  ;;  %v3503_v31 = vpop.f32.mrf.mxu2  ;;  %v3592_v46 = vpop.f32.mrf.mxu3 }
 0x331   :  { %v4423_v55 = vunpack.c.l.b16 %v4295_v43  ;;  %v4424_v33 = vunpack.c.l.b16 %v4296_v26  ;;  %v4201_v52 = vmax.f32 %v3881_v51, %v5315_v42  ;;  %v4390_v37 = vunpack.c.l.b16 %v4262_v35  ;;  %v3463_v42 = vpop.f32.mrf.mxu0 }
 0x332   :  { %v5408_v53 = vunpack.i.l.s16 %v4422_v47  ;;  %v4391_v38 = vunpack.c.l.b16 %v4263_v14  ;;  %v4392_v32 = vunpack.c.l.b16 %v4264_v28  ;;  %v4598_v48 = vsel %vm4567_vm0, %v4597_v56, %v4596_v24 }
 0x333   :  { %v4297_v20 = vpack.c.bf16 %v4233_v2, %v4233_v2  ;;  %v5409_v21 = vunpack.i.l.s16 %v4423_v55  ;;  %v5410_v63 = vunpack.i.l.s16 %v4424_v33  ;;  %v5376_v0 = vunpack.i.l.s16 %v4390_v37 }
 0x334   :  { %v4653_v50 = vrot.slane %v5408_v53, 3  ;;  %v5377_v3 = vunpack.i.l.s16 %v4391_v38  ;;  %v5378_v4 = vunpack.i.l.s16 %v4392_v32  ;;  %v4652_v5 = vsel %vm8190_vm13, %v4651_v57, %v4650_v13 }
 0x335   :  { %v4655_v23 = vrot.slane %v5409_v21, 2  ;;  %v4657_v60 = vrot.slane %v5410_v63, 1  ;;  %v4265_v61 = vpack.c.bf16 %v4201_v52, %v4201_v52  ;;  %v4601_v10 = vrot.slane %v5376_v0, 3 }
 0x336   :  { %v4654_v49 = vsel %vm4573_vm2, %v4653_v50, %v4652_v5  ;;  %v4603_v12 = vrot.slane %v5377_v3, 2  ;;  %v4605_v29 = vrot.slane %v5378_v4, 1  ;;  %v4600_v56 = vsel %vm8191_vm14, %v8092_v36, %v4598_v48 }
 0x337   :  { %v4425_v24 = vunpack.c.l.b16 %v4297_v20  ;;  %v4656_v9 = vsel %vm8192_vm11, %v4655_v23, %v4654_v49  ;;  %v4602_v59 = vsel %vm4573_vm2, %v4601_v10, %v4600_v56  ;;  %v4393_v27 = vunpack.c.l.b16 %v4265_v61 }
 0x338   :  { %v4658_v16 = vsel %vm4579_vm4, %v4657_v60, %v4656_v9  ;;  %v4604_v15 = vsel %vm8193_vm7, %v4603_v12, %v4602_v59  ;;  %v3464_v2 = vadd.f32 %v8072_v8, %v3463_v42  ;;  %v3504_v43 = vadd.f32 %v8072_v8, %v3503_v31  ;;  %v3505_v26 = vpop.f32.mrf.mxu2  ;;  %v3594_v35 = vpop.f32.mrf.mxu3 }
 0x339   :  { %v5426_v62 = vpack.c.b16 %v4425_v24, %v4658_v16  ;;  %v4606_v39 = vsel %vm4579_vm4, %v4605_v29, %v4604_v15  ;;  %v3465_v57 = vpop.f32.mrf.mxu0  ;;  %v3506_v53 = vadd.f32 %v8072_v8, %v3505_v26 }
 0x33a   :  { %v5422_v30 = vpack.c.b16 %v4393_v27, %v4606_v39  ;;  %v3553_v47 = vadd.f32 %v7772_v22, %v3464_v2  ;;  %v3593_v14 = vadd.f32 %v3592_v46, %v3504_v43  ;;  %v3466_v37 = vadd.f32 %v8072_v8, %v3465_v57 }
 0x33b   :  { %v4697_v40 = vsel %vm7958_vm1, 0, %v5426_v62  ;;  %v3595_v5 = vadd.f32 %v3594_v35, %v3506_v53 }
 0x33c   :  { %v4708_v36 = vsel %vm7965_vm3, %v4697_v40, 0  ;;  %v4693_v17 = vsel %vm7958_vm1, 0, %v5422_v30  ;;  %v3614_v55 = vmax.f32 %v3553_v47, 0.0  ;;  %v3630_v52 = vmax.f32 %v3593_v14, 0.0 }
 0x33d   :  { %v4732_v51 = vunpack.c.l.b16 %v4708_v36  ;;  %v4733_v58 = vunpack.c.h.b16 %v4708_v36  ;;  %v4704_v34 = vsel %vm7965_vm3, %v4693_v17, 0  ;;  %v8125_v15 = vmax.f32 %v3595_v5, 0.0 }
 0x33e   :  { %v4724_v44 = vunpack.c.l.b16 %v4704_v34  ;;  %v4725_v19 = vunpack.c.h.b16 %v4704_v34  ;;  %v3702_v32 = vrot.slane %v3614_v55, 2  ;;  %v3703_v48 = vrot.slane %v3614_v55, 4 }
 0x33f   :  { %v4748_v11 = vpack.c.b16 %v4732_v51, %v4732_v51  ;;  %v4749_v54 = vpack.c.b16 %v4733_v58, %v4733_v58  ;;  %v3704_v20 = vrot.slane %v3614_v55, 6  ;;  %v3750_v4 = vrot.slane %v3630_v52, 2 }
 0x340   :  { %v4740_v25 = vpack.c.b16 %v4724_v44, %v4724_v44  ;;  %v4741_v41 = vpack.c.b16 %v4725_v19, %v4725_v19  ;;  %v3597_v63 = vpop.f32.mrf.mxu3  ;;  %v3751_v29 = vrot.slane %v3630_v52, 4  ;;  %v3752_v56 = vrot.slane %v3630_v52, 6 }
 0x341   :  { %4783 = vst [vmem:[#allocation3 + $0x38] sm:$0xf] %v4748_v11 }
 0x342   :  { %4784 = vst [vmem:[#allocation3 + $0x3c] sm:$0x1] %v4749_v54 }
 0x343   :  { %4775 = vst [vmem:[#allocation3 + $0x18] sm:$0xf] %v4740_v25 }
 0x344   :  { %4776 = vst [vmem:[#allocation3 + $0x1c] sm:$0x1] %v4741_v41 }
 0x356   :  { %v3468_v28 = vpop.f32.mrf.mxu0 }
 0x357   :  { %v3469_v13 = vadd.f32 %v8072_v8, %v3468_v28 }
 0x358   :  { %v3508_v21 = vpop.f32.mrf.mxu2 }
 0x359   :  { %v3558_v33 = vadd.f32 %v7830_v45, %v3469_v13  ;;  %v3509_v22 = vadd.f32 %v8072_v8, %v3508_v21  ;;  %v3555_v45 = vadd.f32 %v7801_v6, %v3466_v37 }
 0x35b   :  { %v3616_v38 = vmax.f32 %v3558_v33, 0.0  ;;  %v3598_v61 = vadd.f32 %v3597_v63, %v3509_v22  ;;  %v8127_v39 = vmax.f32 %v3555_v45, 0.0  ;;  %v3599_v22 = vpop.f32.mrf.mxu3 }
 0x35d   :  { %v3708_v50 = vrot.slane %v3616_v38, 2  ;;  %v3709_v0 = vrot.slane %v3616_v38, 4  ;;  %v3710_v3 = vrot.slane %v3616_v38, 6  ;;  %v3882_v23 = vmax.f32 %v3614_v55, %v3616_v38 }
 0x35e   :  { %v3470_v60 = vpop.f32.mrf.mxu0  ;;  %v3632_v16 = vmax.f32 %v3598_v61, 0.0  ;;  %v3705_v61 = vrot.slane %v8127_v39, 2 }
 0x35f   :  { %v3883_v49 = vmax.f32 %v3702_v32, %v3708_v50  ;;  %v3884_v10 = vmax.f32 %v3703_v48, %v3709_v0  ;;  %v3885_v12 = vmax.f32 %v3704_v20, %v3710_v3  ;;  %v5316_v24 = vrot.slane %v3882_v23, 9 }
 0x360   :  { %v3471_v9 = vadd.f32 %v8072_v8, %v3470_v60  ;;  %v3756_v30 = vrot.slane %v3632_v16, 2  ;;  %v3757_v36 = vrot.slane %v3632_v16, 4  ;;  %v3758_v51 = vrot.slane %v3632_v16, 6  ;;  %v3510_v17 = vpop.f32.mrf.mxu2 }
 0x361   :  { %v5317_v59 = vrot.slane %v3883_v49, 9  ;;  %v5318_v62 = vrot.slane %v3884_v10, 9  ;;  %v5319_v27 = vrot.slane %v3885_v12, 9  ;;  %v4202_v6 = vmax.f32 %v3882_v23, %v5316_v24 }
 0x362   :  { %v3560_v40 = vadd.f32 %v7854_v1, %v3471_v9  ;;  %v3914_v58 = vmax.f32 %v3630_v52, %v3632_v16  ;;  %v3915_v19 = vmax.f32 %v3750_v4, %v3756_v30  ;;  %v3916_v42 = vmax.f32 %v3751_v29, %v3757_v36 }
 0x363   :  { %v4203_v34 = vmax.f32 %v3883_v49, %v5317_v59  ;;  %v4204_v11 = vmax.f32 %v3884_v10, %v5318_v62  ;;  %v4205_v54 = vmax.f32 %v3885_v12, %v5319_v27  ;;  %v4266_v44 = vpack.c.bf16 %v4202_v6, %v4202_v6 }
 0x364   :  { %v3917_v25 = vmax.f32 %v3752_v56, %v3758_v51  ;;  %v5348_v41 = vrot.slane %v3914_v58, 9  ;;  %v3511_v31 = vadd.f32 %v8072_v8, %v3510_v17  ;;  %v5349_v43 = vrot.slane %v3915_v19, 9 }
 0x365   :  { %v4267_v46 = vpack.c.bf16 %v4203_v34, %v4203_v34  ;;  %v4268_v57 = vpack.c.bf16 %v4204_v11, %v4204_v11  ;;  %v4269_v2 = vpack.c.bf16 %v4205_v54, %v4205_v54  ;;  %v5350_v1 = vrot.slane %v3916_v42, 9 }
 0x366   :  { %v5351_v26 = vrot.slane %v3917_v25, 9  ;;  %v4234_v47 = vmax.f32 %v3914_v58, %v5348_v41  ;;  %v4394_v35 = vunpack.c.l.b16 %v4266_v44  ;;  %v4235_v55 = vmax.f32 %v3915_v19, %v5349_v43 }
 0x367   :  { %v4395_v14 = vunpack.c.l.b16 %v4267_v46  ;;  %v4396_v28 = vunpack.c.l.b16 %v4268_v57  ;;  %v4397_v13 = vunpack.c.l.b16 %v4269_v2  ;;  %v4236_v33 = vmax.f32 %v3916_v42, %v5350_v1 }
 0x368   :  { %v4237_v52 = vmax.f32 %v3917_v25, %v5351_v26  ;;  %v4298_v53 = vpack.c.bf16 %v4234_v47, %v4234_v47  ;;  %v5380_v37 = vunpack.i.l.s16 %v4394_v35  ;;  %v4299_v8 = vpack.c.bf16 %v4235_v55, %v4235_v55 }
 0x369   :  { %v5381_v38 = vunpack.i.l.s16 %v4395_v14  ;;  %v5382_v32 = vunpack.i.l.s16 %v4396_v28  ;;  %v5383_v48 = vunpack.i.l.s16 %v4397_v13  ;;  %v4300_v20 = vpack.c.bf16 %v4236_v33, %v4236_v33 }
 0x36a   :  { %v4301_v21 = vpack.c.bf16 %v4237_v52, %v4237_v52  ;;  %v4426_v63 = vunpack.c.l.b16 %v4298_v53  ;;  %v3753_v50 = vrot.slane %v8125_v15, 2  ;;  %v3754_v0 = vrot.slane %v8125_v15, 4 }
 0x36b   :  { %v3755_v3 = vrot.slane %v8125_v15, 6  ;;  %v4608_v4 = vrot.slane %v5381_v38, 6  ;;  %v4427_v5 = vunpack.c.l.b16 %v4299_v8  ;;  %v4428_v45 = vunpack.c.l.b16 %v4300_v20 }
 0x36c   :  { %v4429_v23 = vunpack.c.l.b16 %v4301_v21  ;;  %v5412_v60 = vunpack.i.l.s16 %v4426_v63  ;;  %v4607_v49 = vrot.slane %v5380_v37, 7  ;;  %v3600_v10 = vadd.f32 %v3599_v22, %v3511_v31 }
 0x36d   :  { %v3617_v12 = vmax.f32 %v3560_v40, 0.0  ;;  %v3706_v29 = vrot.slane %v8127_v39, 4  ;;  %v3707_v56 = vrot.slane %v8127_v39, 6  ;;  %v4610_v24 = vrot.slane %v5382_v32, 5 }
 0x36e   :  { %v8137_v9 = vrot.slane %v5383_v48, 4  ;;  %v5413_v16 = vunpack.i.l.s16 %v4427_v5  ;;  %v4609_v59 = vsel %vm4564_vm15, %v4608_v4, %v4607_v49  ;;  %v3633_v62 = vmax.f32 %v3600_v10, 0.0 }
 0x36f   :  { %v3711_v27 = vrot.slane %v3617_v12, 2  ;;  %v5414_v6 = vunpack.i.l.s16 %v4428_v45  ;;  %v5415_v30 = vunpack.i.l.s16 %v4429_v23  ;;  %v4659_v36 = vrot.slane %v5412_v60, 7 }
 0x370   :  { %v3712_v51 = vrot.slane %v3617_v12, 4  ;;  %v3759_v58 = vrot.slane %v3633_v62, 2  ;;  %v3760_v17 = vrot.slane %v3633_v62, 4  ;;  %v3761_v34 = vrot.slane %v3633_v62, 6 }
 0x371   :  { %v3918_v40 = vmax.f32 %v8125_v15, %v3633_v62  ;;  %v4611_v11 = vsel %vm4567_vm0, %v4610_v24, %v4609_v59  ;;  %v3713_v54 = vrot.slane %v3617_v12, 6  ;;  %v3886_v44 = vmax.f32 %v8127_v39, %v3617_v12 }
 0x372   :  { %v3887_v19 = vmax.f32 %v3705_v61, %v3711_v27  ;;  %v4660_v42 = vrot.slane %v5413_v16, 6  ;;  %v3919_v25 = vmax.f32 %v3753_v50, %v3759_v58  ;;  %v3920_v41 = vmax.f32 %v3754_v0, %v3760_v17 }
 0x373   :  { %v3921_v31 = vmax.f32 %v3755_v3, %v3761_v34  ;;  %v4662_v46 = vrot.slane %v5414_v6, 5  ;;  %v5352_v57 = vrot.slane %v3918_v40, 9  ;;  %v3888_v2 = vmax.f32 %v3706_v29, %v3712_v51 }
 0x374   :  { %v3889_v43 = vmax.f32 %v3707_v56, %v3713_v54  ;;  %v5353_v1 = vrot.slane %v3919_v25, 9  ;;  %v5354_v26 = vrot.slane %v3920_v41, 9  ;;  %v5320_v35 = vrot.slane %v3886_v44, 9 }
 0x375   :  { %v5355_v47 = vrot.slane %v3921_v31, 9  ;;  %v4238_v14 = vmax.f32 %v3918_v40, %v5352_v57  ;;  %v5321_v15 = vrot.slane %v3887_v19, 9  ;;  %v5322_v28 = vrot.slane %v3888_v2, 9 }
 0x376   :  { %v5323_v13 = vrot.slane %v3889_v43, 9  ;;  %v4661_v55 = vsel %vm4564_vm15, %v4660_v42, %v4659_v36  ;;  %v4239_v39 = vmax.f32 %v3919_v25, %v5353_v1  ;;  %v4240_v33 = vmax.f32 %v3920_v41, %v5354_v26  ;;  %vm8194_vm15 = vmmov %vm8186_vm5 }
 0x377   :  { %v4206_v52 = vmax.f32 %v3886_v44, %v5320_v35  ;;  %v4241_v53 = vmax.f32 %v3921_v31, %v5355_v47  ;;  %v4302_v37 = vpack.c.bf16 %v4238_v14, %v4238_v14  ;;  %v4207_v38 = vmax.f32 %v3887_v19, %v5321_v15 }
 0x378   :  { %v4208_v32 = vmax.f32 %v3888_v2, %v5322_v28  ;;  %v4664_v48 = vrot.slane %v5415_v30, 4  ;;  %v4303_v8 = vpack.c.bf16 %v4239_v39, %v4239_v39  ;;  %v4304_v20 = vpack.c.bf16 %v4240_v33, %v4240_v33 }
 0x379   :  { %v4270_v21 = vpack.c.bf16 %v4206_v52, %v4206_v52  ;;  %v4430_v63 = vunpack.c.l.b16 %v4302_v37  ;;  %v4209_v22 = vmax.f32 %v3889_v43, %v5323_v13  ;;  %v4271_v50 = vpack.c.bf16 %v4207_v38, %v4207_v38 }
 0x37a   :  { %v4272_v0 = vpack.c.bf16 %v4208_v32, %v4208_v32  ;;  %v4663_v3 = vsel %vm4567_vm0, %v4662_v46, %v4661_v55  ;;  %v4431_v4 = vunpack.c.l.b16 %v4303_v8  ;;  %v4432_v5 = vunpack.c.l.b16 %v4304_v20  ;;  %vm8195_vm0 = vmmov %vm8186_vm5 }
 0x37b   :  { %v4398_v45 = vunpack.c.l.b16 %v4270_v21  ;;  %v4305_v23 = vpack.c.bf16 %v4241_v53, %v4241_v53  ;;  %v5416_v60 = vunpack.i.l.s16 %v4430_v63  ;;  %v4399_v61 = vunpack.c.l.b16 %v4271_v50 }
 0x37c   :  { %v4400_v49 = vunpack.c.l.b16 %v4272_v0  ;;  %v5417_v10 = vunpack.i.l.s16 %v4431_v4  ;;  %v5418_v12 = vunpack.i.l.s16 %v4432_v5  ;;  %v4273_v24 = vpack.c.bf16 %v4209_v22, %v4209_v22 }
 0x37d   :  { %v5384_v29 = vunpack.i.l.s16 %v4398_v45  ;;  %v4666_v56 = vrot.slane %v5416_v60, 3  ;;  %v5385_v16 = vunpack.i.l.s16 %v4399_v61  ;;  %v5523_v62 = vmov 0  }
 0x37e   :  { %v5386_v59 = vunpack.i.l.s16 %v4400_v49  ;;  %21 = vst [vmem:[#allocation3] sm:$0xf] %v5523_v62  ;;  %v4665_v27 = vsel %vm8194_vm15, %v4664_v48, %v4663_v3  ;;  %v4668_v6 = vrot.slane %v5417_v10, 2  ;;  %v4670_v30 = vrot.slane %v5418_v12, 1 }
 0x37f   :  { %v4614_v36 = vrot.slane %v5384_v29, 3  ;;  %22 = vst [vmem:[#allocation3 + $0x4] sm:$0x1] %v5523_v62  ;;  %v4613_v51 = vsel %vm8195_vm0, %v8137_v9, %v4611_v11  ;;  %v4667_v58 = vsel %vm4573_vm2, %v4666_v56, %v4665_v27  ;;  %v4616_v17 = vrot.slane %v5385_v16, 2 }
 0x380   :  { %v4618_v34 = vrot.slane %v5386_v59, 1  ;;  %24 = vst [vmem:[#allocation3 + $0x48] sm:$0xf] %v5523_v62  ;;  %v4433_v40 = vunpack.c.l.b16 %v4305_v23  ;;  %v4669_v54 = vsel %vm8196_vm8, %v4668_v6, %v4667_v58  ;;  %v4401_v42 = vunpack.c.l.b16 %v4273_v24 }
 0x381   :  { %v4615_v44 = vsel %vm4573_vm2, %v4614_v36, %v4613_v51  ;;  %25 = vst [vmem:[#allocation3 + $0x4c] sm:$0x1] %v5523_v62  ;;  %v4671_v19 = vsel %vm4579_vm4, %v4670_v30, %v4669_v54 }
 0x382   :  { %v4617_v25 = vsel %vm8197_vm9, %v4616_v17, %v4615_v44  ;;  %v5427_v41 = vpack.c.b16 %v4433_v40, %v4671_v19 }
 0x383   :  { %v4619_v31 = vsel %vm4579_vm4, %v4618_v34, %v4617_v25 }
 0x384   :  { %v5423_v9 = vpack.c.b16 %v4401_v42, %v4619_v31  ;;  %v4698_v11 = vsel %vm7958_vm1, 0, %v5427_v41 }
 0x385   :  { %v4709_v46 = vsel %vm7965_vm3, %v4698_v11, 0 }
 0x386   :  { %v4694_v57 = vsel %vm7958_vm1, 0, %v5423_v9  ;;  %v4734_v2 = vunpack.c.l.b16 %v4709_v46  ;;  %v4735_v43 = vunpack.c.h.b16 %v4709_v46 }
 0x387   :  { %v4705_v1 = vsel %vm7965_vm3, %v4694_v57, 0 }
 0x388   :  { %v4726_v26 = vunpack.c.l.b16 %v4705_v1  ;;  %v4727_v47 = vunpack.c.h.b16 %v4705_v1  ;;  %v4750_v35 = vpack.c.b16 %v4734_v2, %v4734_v2  ;;  %v4751_v14 = vpack.c.b16 %v4735_v43, %v4735_v43 }
 0x38a   :  { %v4742_v15 = vpack.c.b16 %v4726_v26, %v4726_v26  ;;  %v4743_v28 = vpack.c.b16 %v4727_v47, %v4727_v47  ;;  %4785 = vst [vmem:[#allocation3 + $0x40] sm:$0xf] %v4750_v35 }
 0x38b   :  { %4786 = vst [vmem:[#allocation3 + $0x44] sm:$0x1] %v4751_v14 }
 0x38c   :  { %4777 = vst [vmem:[#allocation3 + $0x20] sm:$0xf] %v4742_v15 }
 0x38d   :  { %4778 = vst [vmem:[#allocation3 + $0x24] sm:$0x1] %v4743_v28 }
 0x38e   :  { %4799 = dma.vmem_to_hbm [thread:$0]  %s4792_s8, 1280, %s4794_s6, [#allocation4], %s5519_s13, %s5519_s13, %s5525_s11  }
 0x38f   :  { %5514 = dma.done.wait [#allocation4], 1280  }
 0x390   :  { %5515 = vsyncadd [#allocation4], 4294966016 }
 0x391   :  { %4804 = vsyncpa [#allocation4], 1 }

</bundles_post_ra>
